<compile_context>
chip_gen: v7x
topology: tpu7x:2x2x1
jax: 0.10.0
libtpu: 0.0.40
codegen_flags: <defaults>
</compile_context>

<pallas_src>
import math
import functools

import jax
import jax.numpy as jnp
from jax import lax
from jax.experimental import pallas as pl
from jax.experimental.pallas import tpu as pltpu


# ----------------------------------------------------------------------------
# Tiling helper
# ----------------------------------------------------------------------------

def _pick_tile(dim, target, mult):
    """Largest tile <= target that divides dim and is a multiple of mult,
    falling back to the full dimension (always a legal block size)."""
    if dim <= target:
        return dim
    t = (target // mult) * mult
    while t >= mult:
        if dim % t == 0:
            return t
        t -= mult
    return dim


# ----------------------------------------------------------------------------
# Tiled linear: y = act(x @ w + b), optionally fused with LayerNorm(res + y)
# ----------------------------------------------------------------------------

def linear_pallas(x, w, b, *, activation=None, residual=None, gamma=None,
                  beta=None, eps=1e-5, out_dtype=None,
                  tm=512, tn=512, tk=512):
    """x: [M, K] (bf16), w: [K, N] (bf16), b: [N] (f32) -> [M, N].

    If `residual` (+ gamma/beta) is given, the epilogue computes
    LayerNorm(residual + y) in f32; this requires the full output row per
    block (bn == N).
    """
    M, K = x.shape
    N = w.shape[1]
    fuse_ln = residual is not None
    out_dtype = out_dtype or x.dtype

    bm = _pick_tile(M, tm, 8)
    bn = N if fuse_ln else _pick_tile(N, tn, 128)
    bk = _pick_tile(K, tk, 128)
    # Shapes not divisible by the chosen tiles would violate the (8,128) rule.
    assert M % bm == 0 and N % bn == 0 and K % bk == 0, (M, N, K, bm, bn, bk)
    nk = K // bk

    def kernel(*refs):
        x_ref, w_ref, b_ref = refs[0:3]
        if fuse_ln:
            r_ref, g_ref, be_ref = refs[3:6]
        o_ref = refs[-2]
        acc_ref = refs[-1]

        @pl.when(pl.program_id(2) == 0)
        def _():
            acc_ref[...] = jnp.zeros_like(acc_ref)

        # bf16 x bf16 -> f32 accumulate on the MXU.
        acc_ref[...] += jnp.dot(x_ref[...], w_ref[...],
                                preferred_element_type=jnp.float32)

        @pl.when(pl.program_id(2) == nk - 1)
        def _():
            y = acc_ref[...] + b_ref[...].astype(jnp.float32)
            if activation == "relu":
                y = jnp.maximum(y, 0.0)
            if fuse_ln:
                y = y + r_ref[...].astype(jnp.float32)
                mean = jnp.mean(y, axis=-1, keepdims=True)
                var = jnp.mean((y - mean) ** 2, axis=-1, keepdims=True)
                y = (y - mean) * lax.rsqrt(var + eps)
                y = (y * g_ref[...].astype(jnp.float32)
                     + be_ref[...].astype(jnp.float32))
            o_ref[...] = y.astype(o_ref.dtype)

    inputs = [x, w, b.reshape(1, N)]
    in_specs = [
        pl.BlockSpec((bm, bk), lambda i, j, k: (i, k)),
        pl.BlockSpec((bk, bn), lambda i, j, k: (k, j)),
        pl.BlockSpec((1, bn), lambda i, j, k: (0, j)),
    ]
    if fuse_ln:
        inputs += [residual, gamma.reshape(1, N), beta.reshape(1, N)]
        in_specs += [
            pl.BlockSpec((bm, bn), lambda i, j, k: (i, j)),
            pl.BlockSpec((1, bn), lambda i, j, k: (0, j)),
            pl.BlockSpec((1, bn), lambda i, j, k: (0, j)),
        ]

    return pl.pallas_call(
        kernel,
        out_shape=jax.ShapeDtypeStruct((M, N), out_dtype),
        grid=(M // bm, N // bn, nk),
        in_specs=in_specs,
        out_specs=pl.BlockSpec((bm, bn), lambda i, j, k: (i, j)),
        scratch_shapes=[pltpu.VMEM((bm, bn), jnp.float32)],
        compiler_params=pltpu.CompilerParams(
            dimension_semantics=("parallel", "parallel", "arbitrary")),
    )(*inputs)


# ----------------------------------------------------------------------------
# Multi-head attention: grid over batch, heads handled in-register.
# Reads the fused projection slabs directly (no head-split HBM transposes)
# and writes a lane-dense [B, Tq, C] output.
# ----------------------------------------------------------------------------

def mha_pallas(q_slab, kv_slab, num_heads, *, attn_mask=None, kpm_bias=None,
               need_weights=False, out_dtype=None):
    """q_slab: [B, Tq, 3C] (packed QKV, kv_slab=None) or [B, Tq, C].
    kv_slab: None or [B, Tk, 2C] (packed K|V).
    attn_mask: optional [Tq, Tk] additive f32 mask (e.g. causal).
    kpm_bias : optional [B, 1, Tk] additive f32 key-padding bias (-inf-like).
    Returns out [B, Tq, C] (head-merged, lane-dense) and, if need_weights,
    head-averaged probabilities [B, Tq, Tk] f32 (fairseq convention)."""
    packed = kv_slab is None
    B, Tq, qw = q_slab.shape
    C = qw // 3 if packed else qw
    Tk = Tq if packed else kv_slab.shape[1]
    H = num_heads
    Dh = C // H
    has_mask = attn_mask is not None
    has_kpm = kpm_bias is not None
    out_dtype = out_dtype or q_slab.dtype

    def kernel(*refs):
        idx = 0
        q_ref = refs[idx]; idx += 1
        if packed:
            kv_ref = q_ref
            k_base, v_base = C, 2 * C
        else:
            kv_ref = refs[idx]; idx += 1
            k_base, v_base = 0, C
        mask_ref = None
        kpm_ref = None
        if has_mask:
            mask_ref = refs[idx]; idx += 1
        if has_kpm:
            kpm_ref = refs[idx]; idx += 1
        o_ref = refs[idx]; idx += 1
        w_ref = refs[idx] if need_weights else None

        bias = None                        # f32, broadcastable over [Tq, Tk]
        if has_mask:
            bias = mask_ref[...]           # [Tq, Tk]
        if has_kpm:
            row = kpm_ref[0]               # [1, Tk]
            bias = row if bias is None else bias + row

        p_acc = None
        for h in range(H):
            # Per-head static lane slices of the projection slabs (VMEM only;
            # 1/sqrt(Dh) is already folded into the Q projection weights).
            qh = q_ref[0, :, h * Dh:(h + 1) * Dh]                 # [Tq, Dh] bf16
            kh = kv_ref[0, :, k_base + h * Dh:k_base + (h + 1) * Dh]
            vh = kv_ref[0, :, v_base + h * Dh:v_base + (h + 1) * Dh]

            # q @ k^T contracting Dh directly (no XLU transpose of K).
            s = lax.dot_general(qh, kh, (((1,), (1,)), ((), ())),
                                preferred_element_type=jnp.float32)  # [Tq, Tk]
            if bias is not None:
                s = s + bias
            m = jnp.max(s, axis=-1, keepdims=True)
            p = jnp.exp(s - m)
            denom = jnp.sum(p, axis=-1, keepdims=True)
            probs = p * pl.reciprocal(denom, approx=True)         # f32
            o_h = jnp.dot(probs.astype(vh.dtype), vh,
                          preferred_element_type=jnp.float32)      # [Tq, Dh]
            # Lane-offset store into the lane-dense [Tq, C] output block.
            o_ref[0, :, h * Dh:(h + 1) * Dh] = o_h.astype(o_ref.dtype)
            if need_weights:
                p_acc = probs if p_acc is None else p_acc + probs

        if need_weights:
            w_ref[0] = (p_acc * (1.0 / H)).astype(w_ref.dtype)

    inputs = [q_slab]
    in_specs = [pl.BlockSpec((1, Tq, qw), lambda b: (b, 0, 0))]
    if not packed:
        inputs.append(kv_slab)
        in_specs.append(pl.BlockSpec((1, Tk, 2 * C), lambda b: (b, 0, 0)))
    if has_mask:
        inputs.append(attn_mask.astype(jnp.float32))
        in_specs.append(pl.BlockSpec((Tq, Tk), lambda b: (0, 0)))
    if has_kpm:
        inputs.append(kpm_bias.astype(jnp.float32))
        in_specs.append(pl.BlockSpec((1, 1, Tk), lambda b: (b, 0, 0)))

    if need_weights:
        out_shape = (jax.ShapeDtypeStruct((B, Tq, C), out_dtype),
                     jax.ShapeDtypeStruct((B, Tq, Tk), jnp.float32))
        out_specs = (pl.BlockSpec((1, Tq, C), lambda b: (b, 0, 0)),
                     pl.BlockSpec((1, Tq, Tk), lambda b: (b, 0, 0)))
    else:
        out_shape = jax.ShapeDtypeStruct((B, Tq, C), out_dtype)
        out_specs = pl.BlockSpec((1, Tq, C), lambda b: (b, 0, 0))

    return pl.pallas_call(
        kernel,
        out_shape=out_shape,
        grid=(B,),
        in_specs=in_specs,
        out_specs=out_specs,
        compiler_params=pltpu.CompilerParams(dimension_semantics=("parallel",)),
    )(*inputs)


# ----------------------------------------------------------------------------
# Decoder layer forward (post-norm, eval mode, nstack_cross=False path)
# ----------------------------------------------------------------------------

def decoder_layer_forward(x, enc_le, pad_mask, self_attn_mask, params,
                          num_heads):
    T, B, C = x.shape
    S = enc_le.shape[0]

    cdt = jnp.bfloat16
    # Batch-first [B, T, C] working layout: linears/LN are row-wise, and the
    # attention kernels then slice per-batch (1, T, k*C) blocks directly from
    # the projection slabs. Only two activation transposes at the boundaries.
    xb = x.astype(cdt).transpose(1, 0, 2).reshape(B * T, C)
    encb = enc_le.astype(cdt).transpose(1, 0, 2).reshape(B * S, C)

    mask = self_attn_mask.astype(jnp.float32) if self_attn_mask is not None else None
    kpm_bias = jnp.where(pad_mask, jnp.float32(-1e30),
                         jnp.float32(0.0)).reshape(B, 1, S)

    # --- self attention block (fused QKV projection) ---
    # TODO(synk): self_attn_padding_mask is assumed None (stated config).
    residual = xb
    p = params["self_attn"]
    qkv = linear_pallas(xb, p["wqkv"], p["bqkv"])                  # [B*T, 3C]
    attn_out = mha_pallas(qkv.reshape(B, T, 3 * C), None, num_heads,
                          attn_mask=mask, need_weights=False)      # [B, T, C]
    xb = linear_pallas(attn_out.reshape(B * T, C), p["wo"], p["bo"],
                       residual=residual,
                       gamma=params["ln_self"]["g"],
                       beta=params["ln_self"]["b"])

    # --- encoder (cross) attention block (fused KV projection) ---
    residual = xb
    p = params["enc_attn"]
    q = linear_pallas(xb, p["wq"], p["bq"])                        # [B*T, C]
    kv = linear_pallas(encb, p["wkv"], p["bkv"])                   # [B*S, 2C]
    attn_out, attn = mha_pallas(q.reshape(B, T, C), kv.reshape(B, S, 2 * C),
                                num_heads, kpm_bias=kpm_bias,
                                need_weights=True)
    xb = linear_pallas(attn_out.reshape(B * T, C), p["wo"], p["bo"],
                       residual=residual,
                       gamma=params["ln_enc"]["g"],
                       beta=params["ln_enc"]["b"])

    # --- feed-forward block ---
    residual = xb
    h = linear_pallas(xb, params["fc1_w"], params["fc1_b"], activation="relu")
    xb = linear_pallas(h, params["fc2_w"], params["fc2_b"],
                       residual=residual,
                       gamma=params["ln_final"]["g"],
                       beta=params["ln_final"]["b"],
                       out_dtype=jnp.float32)

    out = xb.reshape(B, T, C).transpose(1, 0, 2)                   # [T, B, C]
    return out, attn


# ----------------------------------------------------------------------------
# Deterministic parameter init (weights bf16, biases / LN params f32)
# ----------------------------------------------------------------------------

def init_linear(key, din, dout):
    k1, k2 = jax.random.split(key)
    w = jax.random.normal(k1, (din, dout), jnp.float32) / math.sqrt(din)
    b = jax.random.normal(k2, (dout,), jnp.float32) * 0.02
    return w, b


def init_params(key, c, ffn, num_heads):
    ks = jax.random.split(key, 10)
    scale = (c // num_heads) ** -0.5
    wdt = jnp.bfloat16

    wq, bq = init_linear(ks[0], c, c)
    wk, bk = init_linear(ks[1], c, c)
    wv, bv = init_linear(ks[2], c, c)
    wo, bo = init_linear(ks[3], c, c)
    # Fold the 1/sqrt(Dh) softmax scale into the Q projection (zero runtime cost).
    self_attn = dict(
        wqkv=jnp.concatenate([wq * scale, wk, wv], axis=1).astype(wdt),
        bqkv=jnp.concatenate([bq * scale, bk, bv], axis=0),
        wo=wo.astype(wdt), bo=bo)

    wq2, bq2 = init_linear(ks[4], c, c)
    wk2, bk2 = init_linear(ks[5], c, c)
    wv2, bv2 = init_linear(ks[6], c, c)
    wo2, bo2 = init_linear(ks[7], c, c)
    enc_attn = dict(
        wq=(wq2 * scale).astype(wdt), bq=bq2 * scale,
        wkv=jnp.concatenate([wk2, wv2], axis=1).astype(wdt),
        bkv=jnp.concatenate([bk2, bv2], axis=0),
        wo=wo2.astype(wdt), bo=bo2)

    fc1_w, fc1_b = init_linear(ks[8], c, ffn)
    fc2_w, fc2_b = init_linear(ks[9], ffn, c)
    ln = lambda: dict(g=jnp.ones((c,), jnp.float32),
                      b=jnp.zeros((c,), jnp.float32))
    return dict(self_attn=self_attn, enc_attn=enc_attn,
                fc1_w=fc1_w.astype(wdt), fc1_b=fc1_b,
                fc2_w=fc2_w.astype(wdt), fc2_b=fc2_b,
                ln_self=ln(), ln_enc=ln(), ln_final=ln())


# ----------------------------------------------------------------------------
# Main
# ----------------------------------------------------------------------------

if __name__ == "__main__":
    # Small but lane-friendly shapes: C and FFN multiples of 128,
    # row counts (T*B, S*B) multiples of 8.
    T, B, C = 16, 2, 128        # tgt_len, batch, decoder_embed_dim
    S = 16                      # encoder (leaf) length
    H = 4                       # decoder_attention_heads  (Dh = 32)
    FFN = 256                   # decoder_ffn_embed_dim

    key = jax.random.PRNGKey(0)
    k_x, k_enc, k_p = jax.random.split(key, 3)

    x = jax.random.normal(k_x, (T, B, C), jnp.float32)
    enc_le = jax.random.normal(k_enc, (S, B, C), jnp.float32)

    # causal self-attention mask [T, T]: large negative above the diagonal
    causal = jnp.triu(jnp.full((T, T), -1e9, jnp.float32), k=1)

    # encoder key padding mask [B, S]: True = padded
    pad_mask = jnp.zeros((B, S), jnp.bool_).at[1, S - 2:].set(True)

    params = init_params(k_p, C, FFN, H)

    fwd = jax.jit(functools.partial(decoder_layer_forward, num_heads=H))
    out, attn = fwd(x, enc_le, pad_mask, causal, params)
    jax.block_until_ready((out, attn))

    assert out.shape == (T, B, C)
    assert attn.shape == (B, T, S)
    assert bool(jnp.all(jnp.isfinite(out)))
    assert bool(jnp.all(jnp.isfinite(attn)))
    print("KERNEL_OK")
</pallas_src>

<mosaic_0001>
module attributes {stable_mosaic.version = 11 : i64} {
  func.func @kernel(%arg0: i32, %arg1: i32, %arg2: i32, %arg3: memref<32x128xbf16, #tpu.memory_space<vmem>>, %arg4: memref<128x256xbf16, #tpu.memory_space<vmem>>, %arg5: memref<1x256xf32, #tpu.memory_space<vmem>>, %arg6: memref<32x256xbf16, #tpu.memory_space<vmem>>, %arg7: memref<32x256xf32, #tpu.memory_space<vmem>>) attributes {dimension_semantics = [#tpu.dimension_semantics<parallel>, #tpu.dimension_semantics<parallel>, #tpu.dimension_semantics<arbitrary>], iteration_bounds = array<i64: 1, 1, 1>, scalar_prefetch = 0 : i64, scratch_operands = 1 : i64, tpu.core_type = #tpu.core_type<tc>, window_params = [{transform_indices = @transform_0, window_bounds = array<i64: 32, 128>}, {transform_indices = @transform_1, window_bounds = array<i64: 128, 256>}, {transform_indices = @transform_2, window_bounds = array<i64: 1, 256>}, {transform_indices = @transform_3, window_bounds = array<i64: 32, 256>}]} {
    %c0_i32 = arith.constant 0 : i32
    %0 = arith.cmpi eq, %arg2, %c0_i32 : i32
    %1 = arith.extui %0 : i1 to i32
    %c0_i32_0 = arith.constant 0 : i32
    %2 = arith.cmpi ne, %1, %c0_i32_0 : i32
    scf.if %2 {
      %cst_10 = arith.constant 0.000000e+00 : f32
      %12 = vector.broadcast %cst_10 : f32 to vector<32x256xf32>
      %c0_11 = arith.constant 0 : index
      %c0_12 = arith.constant 0 : index
      %13 = vector.load %arg7[%c0_11, %c0_12] : memref<32x256xf32, #tpu.memory_space<vmem>>, vector<32x256xf32>
      tpu.vector_store %arg7[%c0_11, %c0_12], %12 {strides = array<i32>} : memref<32x256xf32, #tpu.memory_space<vmem>>, vector<32x256xf32>,
    } else {
    }
    %c0 = arith.constant 0 : index
    %c0_1 = arith.constant 0 : index
    %3 = vector.load %arg7[%c0, %c0_1] : memref<32x256xf32, #tpu.memory_space<vmem>>, vector<32x256xf32>
    %c0_2 = arith.constant 0 : index
    %c0_3 = arith.constant 0 : index
    %4 = vector.load %arg3[%c0_2, %c0_3] : memref<32x128xbf16, #tpu.memory_space<vmem>>, vector<32x128xbf16>
    %c0_4 = arith.constant 0 : index
    %c0_5 = arith.constant 0 : index
    %5 = vector.load %arg4[%c0_4, %c0_5] : memref<128x256xbf16, #tpu.memory_space<vmem>>, vector<128x256xbf16>
    %cst = arith.constant dense<0.000000e+00> : vector<32x256xf32>
    %6 = tpu.matmul %4, %5, %cst {dimension_numbers = #tpu.dot_dimension_numbers<[1], [0], [0], [1], [0, 0, 1, 1], [], []>} : vector<32x128xbf16>, vector<128x256xbf16>, vector<32x256xf32> -> vector<32x256xf32>
    %7 = arith.addf %3, %6 : vector<32x256xf32>
    %c0_6 = arith.constant 0 : index
    %c0_7 = arith.constant 0 : index
    %8 = vector.load %arg7[%c0_6, %c0_7] : memref<32x256xf32, #tpu.memory_space<vmem>>, vector<32x256xf32>
    tpu.vector_store %arg7[%c0_6, %c0_7], %7 {strides = array<i32>} : memref<32x256xf32, #tpu.memory_space<vmem>>, vector<32x256xf32>,
    %c0_i32_8 = arith.constant 0 : i32
    %9 = arith.cmpi eq, %arg2, %c0_i32_8 : i32
    %10 = arith.extui %9 : i1 to i32
    %c0_i32_9 = arith.constant 0 : i32
    %11 = arith.cmpi ne, %10, %c0_i32_9 : i32
    scf.if %11 {
      %c0_10 = arith.constant 0 : index
      %c0_11 = arith.constant 0 : index
      %12 = vector.load %arg7[%c0_10, %c0_11] : memref<32x256xf32, #tpu.memory_space<vmem>>, vector<32x256xf32>
      %c0_12 = arith.constant 0 : index
      %c0_13 = arith.constant 0 : index
      %13 = vector.load %arg5[%c0_12, %c0_13] : memref<1x256xf32, #tpu.memory_space<vmem>>, vector<1x256xf32>
      %14 = vector.broadcast %13 : vector<1x256xf32> to vector<32x256xf32>
      %15 = arith.addf %12, %14 : vector<32x256xf32>
      %16 = arith.truncf %15 : vector<32x256xf32> to vector<32x256xbf16>
      %c0_14 = arith.constant 0 : index
      %c0_15 = arith.constant 0 : index
      %17 = vector.load %arg6[%c0_14, %c0_15] : memref<32x256xbf16, #tpu.memory_space<vmem>>, vector<32x256xbf16>
      tpu.vector_store %arg6[%c0_14, %c0_15], %16 {strides = array<i32>} : memref<32x256xbf16, #tpu.memory_space<vmem>>, vector<32x256xbf16>,
    } else {
    }
    return
  }
  func.func @transform_0(%arg0: i32, %arg1: i32, %arg2: i32) -> (i32, i32) {
    %c0_i32 = arith.constant 0 : i32
    return %arg0, %arg2 : i32, i32
  }
  func.func @transform_1(%arg0: i32, %arg1: i32, %arg2: i32) -> (i32, i32) {
    %c0_i32 = arith.constant 0 : i32
    return %arg2, %arg1 : i32, i32
  }
  func.func @transform_2(%arg0: i32, %arg1: i32, %arg2: i32) -> (i32, i32) {
    %c0_i32 = arith.constant 0 : i32
    %c0_i32_0 = arith.constant 0 : i32
    return %c0_i32, %arg1 : i32, i32
  }
  func.func @transform_3(%arg0: i32, %arg1: i32, %arg2: i32) -> (i32, i32) {
    %c0_i32 = arith.constant 0 : i32
    return %arg0, %arg1 : i32, i32
  }
}

module attributes {stable_mosaic.version = 11 : i64} {
  func.func @kernel(%arg0: i32, %arg1: i32, %arg2: i32, %arg3: memref<32x128xbf16, #tpu.memory_space<vmem>>, %arg4: memref<128x384xbf16, #tpu.memory_space<vmem>>, %arg5: memref<1x384xf32, #tpu.memory_space<vmem>>, %arg6: memref<32x384xbf16, #tpu.memory_space<vmem>>, %arg7: memref<32x384xf32, #tpu.memory_space<vmem>>) attributes {dimension_semantics = [#tpu.dimension_semantics<parallel>, #tpu.dimension_semantics<parallel>, #tpu.dimension_semantics<arbitrary>], iteration_bounds = array<i64: 1, 1, 1>, scalar_prefetch = 0 : i64, scratch_operands = 1 : i64, tpu.core_type = #tpu.core_type<tc>, window_params = [{transform_indices = @transform_0, window_bounds = array<i64: 32, 128>}, {transform_indices = @transform_1, window_bounds = array<i64: 128, 384>}, {transform_indices = @transform_2, window_bounds = array<i64: 1, 384>}, {transform_indices = @transform_3, window_bounds = array<i64: 32, 384>}]} {
    %c0_i32 = arith.constant 0 : i32
    %0 = arith.cmpi eq, %arg2, %c0_i32 : i32
    %1 = arith.extui %0 : i1 to i32
    %c0_i32_0 = arith.constant 0 : i32
    %2 = arith.cmpi ne, %1, %c0_i32_0 : i32
    scf.if %2 {
      %cst_10 = arith.constant 0.000000e+00 : f32
      %12 = vector.broadcast %cst_10 : f32 to vector<32x384xf32>
      %c0_11 = arith.constant 0 : index
      %c0_12 = arith.constant 0 : index
      %13 = vector.load %arg7[%c0_11, %c0_12] : memref<32x384xf32, #tpu.memory_space<vmem>>, vector<32x384xf32>
      tpu.vector_store %arg7[%c0_11, %c0_12], %12 {strides = array<i32>} : memref<32x384xf32, #tpu.memory_space<vmem>>, vector<32x384xf32>,
    } else {
    }
    %c0 = arith.constant 0 : index
    %c0_1 = arith.constant 0 : index
    %3 = vector.load %arg7[%c0, %c0_1] : memref<32x384xf32, #tpu.memory_space<vmem>>, vector<32x384xf32>
    %c0_2 = arith.constant 0 : index
    %c0_3 = arith.constant 0 : index
    %4 = vector.load %arg3[%c0_2, %c0_3] : memref<32x128xbf16, #tpu.memory_space<vmem>>, vector<32x128xbf16>
    %c0_4 = arith.constant 0 : index
    %c0_5 = arith.constant 0 : index
    %5 = vector.load %arg4[%c0_4, %c0_5] : memref<128x384xbf16, #tpu.memory_space<vmem>>, vector<128x384xbf16>
    %cst = arith.constant dense<0.000000e+00> : vector<32x384xf32>
    %6 = tpu.matmul %4, %5, %cst {dimension_numbers = #tpu.dot_dimension_numbers<[1], [0], [0], [1], [0, 0, 1, 1], [], []>} : vector<32x128xbf16>, vector<128x384xbf16>, vector<32x384xf32> -> vector<32x384xf32>
    %7 = arith.addf %3, %6 : vector<32x384xf32>
    %c0_6 = arith.constant 0 : index
    %c0_7 = arith.constant 0 : index
    %8 = vector.load %arg7[%c0_6, %c0_7] : memref<32x384xf32, #tpu.memory_space<vmem>>, vector<32x384xf32>
    tpu.vector_store %arg7[%c0_6, %c0_7], %7 {strides = array<i32>} : memref<32x384xf32, #tpu.memory_space<vmem>>, vector<32x384xf32>,
    %c0_i32_8 = arith.constant 0 : i32
    %9 = arith.cmpi eq, %arg2, %c0_i32_8 : i32
    %10 = arith.extui %9 : i1 to i32
    %c0_i32_9 = arith.constant 0 : i32
    %11 = arith.cmpi ne, %10, %c0_i32_9 : i32
    scf.if %11 {
      %c0_10 = arith.constant 0 : index
      %c0_11 = arith.constant 0 : index
      %12 = vector.load %arg7[%c0_10, %c0_11] : memref<32x384xf32, #tpu.memory_space<vmem>>, vector<32x384xf32>
      %c0_12 = arith.constant 0 : index
      %c0_13 = arith.constant 0 : index
      %13 = vector.load %arg5[%c0_12, %c0_13] : memref<1x384xf32, #tpu.memory_space<vmem>>, vector<1x384xf32>
      %14 = vector.broadcast %13 : vector<1x384xf32> to vector<32x384xf32>
      %15 = arith.addf %12, %14 : vector<32x384xf32>
      %16 = arith.truncf %15 : vector<32x384xf32> to vector<32x384xbf16>
      %c0_14 = arith.constant 0 : index
      %c0_15 = arith.constant 0 : index
      %17 = vector.load %arg6[%c0_14, %c0_15] : memref<32x384xbf16, #tpu.memory_space<vmem>>, vector<32x384xbf16>
      tpu.vector_store %arg6[%c0_14, %c0_15], %16 {strides = array<i32>} : memref<32x384xbf16, #tpu.memory_space<vmem>>, vector<32x384xbf16>,
    } else {
    }
    return
  }
  func.func @transform_0(%arg0: i32, %arg1: i32, %arg2: i32) -> (i32, i32) {
    %c0_i32 = arith.constant 0 : i32
    return %arg0, %arg2 : i32, i32
  }
  func.func @transform_1(%arg0: i32, %arg1: i32, %arg2: i32) -> (i32, i32) {
    %c0_i32 = arith.constant 0 : i32
    return %arg2, %arg1 : i32, i32
  }
  func.func @transform_2(%arg0: i32, %arg1: i32, %arg2: i32) -> (i32, i32) {
    %c0_i32 = arith.constant 0 : i32
    %c0_i32_0 = arith.constant 0 : i32
    return %c0_i32, %arg1 : i32, i32
  }
  func.func @transform_3(%arg0: i32, %arg1: i32, %arg2: i32) -> (i32, i32) {
    %c0_i32 = arith.constant 0 : i32
    return %arg0, %arg1 : i32, i32
  }
}

module attributes {stable_mosaic.version = 11 : i64} {
  func.func @kernel(%arg0: i32, %arg1: memref<1x16x384xbf16, #tpu.memory_space<vmem>>, %arg2: memref<16x16xf32, #tpu.memory_space<vmem>>, %arg3: memref<1x16x128xbf16, #tpu.memory_space<vmem>>) attributes {dimension_semantics = [#tpu.dimension_semantics<parallel>], iteration_bounds = array<i64: 2>, scalar_prefetch = 0 : i64, scratch_operands = 0 : i64, tpu.core_type = #tpu.core_type<tc>, window_params = [{transform_indices = @transform_0, window_bounds = array<i64: 1, 16, 384>}, {pipeline_mode = #tpu.pipeline_mode<synchronous>, transform_indices = @transform_1, window_bounds = array<i64: 16, 16>}, {transform_indices = @transform_2, window_bounds = array<i64: 1, 16, 128>}]} {
    %c0 = arith.constant 0 : index
    %c0_0 = arith.constant 0 : index
    %0 = vector.load %arg2[%c0, %c0_0] : memref<16x16xf32, #tpu.memory_space<vmem>>, vector<16x16xf32>
    %c0_1 = arith.constant 0 : index
    %c0_2 = arith.constant 0 : index
    %c0_3 = arith.constant 0 : index
    %1 = vector.load %arg1[%c0_1, %c0_2, %c0_3] : memref<1x16x384xbf16, #tpu.memory_space<vmem>>, vector<1x16x32xbf16>
    %2 = vector.shape_cast %1 : vector<1x16x32xbf16> to vector<16x32xbf16>
    %c0_4 = arith.constant 0 : index
    %c0_5 = arith.constant 0 : index
    %c128 = arith.constant 128 : index
    %3 = vector.load %arg1[%c0_4, %c0_5, %c128] : memref<1x16x384xbf16, #tpu.memory_space<vmem>>, vector<1x16x32xbf16>
    %4 = vector.shape_cast %3 : vector<1x16x32xbf16> to vector<16x32xbf16>
    %c0_6 = arith.constant 0 : index
    %c0_7 = arith.constant 0 : index
    %c256 = arith.constant 256 : index
    %5 = vector.load %arg1[%c0_6, %c0_7, %c256] : memref<1x16x384xbf16, #tpu.memory_space<vmem>>, vector<1x16x32xbf16>
    %6 = vector.shape_cast %5 : vector<1x16x32xbf16> to vector<16x32xbf16>
    %cst = arith.constant dense<0.000000e+00> : vector<16x16xf32>
    %7 = tpu.matmul %2, %4, %cst {dimension_numbers = #tpu.dot_dimension_numbers<[1], [1], [0], [0], [0, 0, 1, 0], [], []>} : vector<16x32xbf16>, vector<16x32xbf16>, vector<16x16xf32> -> vector<16x16xf32>
    %8 = arith.addf %7, %0 : vector<16x16xf32>
    %cst_8 = arith.constant dense<0xFF800000> : vector<16xf32>
    %9 = vector.multi_reduction <maximumf>, %8, %cst_8 [1] : vector<16x16xf32> to vector<16xf32>
    %10 = vector.shape_cast %9 : vector<16xf32> to vector<16x1xf32>
    %11 = vector.broadcast %10 : vector<16x1xf32> to vector<16x16xf32>
    %12 = arith.subf %8, %11 : vector<16x16xf32>
    %13 = math.exp %12 : vector<16x16xf32>
    %cst_9 = arith.constant dense<0.000000e+00> : vector<16xf32>
    %14 = vector.multi_reduction <add>, %13, %cst_9 [1] : vector<16x16xf32> to vector<16xf32>
    %15 = vector.shape_cast %14 : vector<16xf32> to vector<16x1xf32>
    %16 = tpu.reciprocal %15 {approx = true} : vector<16x1xf32> -> vector<16x1xf32>
    %17 = vector.broadcast %16 : vector<16x1xf32> to vector<16x16xf32>
    %18 = arith.mulf %13, %17 : vector<16x16xf32>
    %19 = arith.truncf %18 : vector<16x16xf32> to vector<16x16xbf16>
    %cst_10 = arith.constant dense<0.000000e+00> : vector<16x32xf32>
    %20 = tpu.matmul %19, %6, %cst_10 {dimension_numbers = #tpu.dot_dimension_numbers<[1], [0], [0], [1], [0, 0, 1, 1], [], []>} : vector<16x16xbf16>, vector<16x32xbf16>, vector<16x32xf32> -> vector<16x32xf32>
    %21 = arith.truncf %20 : vector<16x32xf32> to vector<16x32xbf16>
    %c0_11 = arith.constant 0 : index
    %c0_12 = arith.constant 0 : index
    %c0_13 = arith.constant 0 : index
    %22 = vector.load %arg3[%c0_11, %c0_12, %c0_13] : memref<1x16x128xbf16, #tpu.memory_space<vmem>>, vector<1x16x32xbf16>
    %23 = vector.shape_cast %22 : vector<1x16x32xbf16> to vector<16x32xbf16>
    %24 = vector.shape_cast %21 : vector<16x32xbf16> to vector<1x16x32xbf16>
    tpu.vector_store %arg3[%c0_11, %c0_12, %c0_13], %24 {strides = array<i32>} : memref<1x16x128xbf16, #tpu.memory_space<vmem>>, vector<1x16x32xbf16>,
    %c0_14 = arith.constant 0 : index
    %c0_15 = arith.constant 0 : index
    %c32 = arith.constant 32 : index
    %25 = vector.load %arg1[%c0_14, %c0_15, %c32] : memref<1x16x384xbf16, #tpu.memory_space<vmem>>, vector<1x16x32xbf16>
    %26 = vector.shape_cast %25 : vector<1x16x32xbf16> to vector<16x32xbf16>
    %c0_16 = arith.constant 0 : index
    %c0_17 = arith.constant 0 : index
    %c160 = arith.constant 160 : index
    %27 = vector.load %arg1[%c0_16, %c0_17, %c160] : memref<1x16x384xbf16, #tpu.memory_space<vmem>>, vector<1x16x32xbf16>
    %28 = vector.shape_cast %27 : vector<1x16x32xbf16> to vector<16x32xbf16>
    %c0_18 = arith.constant 0 : index
    %c0_19 = arith.constant 0 : index
    %c288 = arith.constant 288 : index
    %29 = vector.load %arg1[%c0_18, %c0_19, %c288] : memref<1x16x384xbf16, #tpu.memory_space<vmem>>, vector<1x16x32xbf16>
    %30 = vector.shape_cast %29 : vector<1x16x32xbf16> to vector<16x32xbf16>
    %cst_20 = arith.constant dense<0.000000e+00> : vector<16x16xf32>
    %31 = tpu.matmul %26, %28, %cst_20 {dimension_numbers = #tpu.dot_dimension_numbers<[1], [1], [0], [0], [0, 0, 1, 0], [], []>} : vector<16x32xbf16>, vector<16x32xbf16>, vector<16x16xf32> -> vector<16x16xf32>
    %32 = arith.addf %31, %0 : vector<16x16xf32>
    %cst_21 = arith.constant dense<0xFF800000> : vector<16xf32>
    %33 = vector.multi_reduction <maximumf>, %32, %cst_21 [1] : vector<16x16xf32> to vector<16xf32>
    %34 = vector.shape_cast %33 : vector<16xf32> to vector<16x1xf32>
    %35 = vector.broadcast %34 : vector<16x1xf32> to vector<16x16xf32>
    %36 = arith.subf %32, %35 : vector<16x16xf32>
    %37 = math.exp %36 : vector<16x16xf32>
    %cst_22 = arith.constant dense<0.000000e+00> : vector<16xf32>
    %38 = vector.multi_reduction <add>, %37, %cst_22 [1] : vector<16x16xf32> to vector<16xf32>
    %39 = vector.shape_cast %38 : vector<16xf32> to vector<16x1xf32>
    %40 = tpu.reciprocal %39 {approx = true} : vector<16x1xf32> -> vector<16x1xf32>
    %41 = vector.broadcast %40 : vector<16x1xf32> to vector<16x16xf32>
    %42 = arith.mulf %37, %41 : vector<16x16xf32>
    %43 = arith.truncf %42 : vector<16x16xf32> to vector<16x16xbf16>
    %cst_23 = arith.constant dense<0.000000e+00> : vector<16x32xf32>
    %44 = tpu.matmul %43, %30, %cst_23 {dimension_numbers = #tpu.dot_dimension_numbers<[1], [0], [0], [1], [0, 0, 1, 1], [], []>} : vector<16x16xbf16>, vector<16x32xbf16>, vector<16x32xf32> -> vector<16x32xf32>
    %45 = arith.truncf %44 : vector<16x32xf32> to vector<16x32xbf16>
    %c0_24 = arith.constant 0 : index
    %c0_25 = arith.constant 0 : index
    %c32_26 = arith.constant 32 : index
    %46 = vector.load %arg3[%c0_24, %c0_25, %c32_26] : memref<1x16x128xbf16, #tpu.memory_space<vmem>>, vector<1x16x32xbf16>
    %47 = vector.shape_cast %46 : vector<1x16x32xbf16> to vector<16x32xbf16>
    %48 = vector.shape_cast %45 : vector<16x32xbf16> to vector<1x16x32xbf16>
    tpu.vector_store %arg3[%c0_24, %c0_25, %c32_26], %48 {strides = array<i32>} : memref<1x16x128xbf16, #tpu.memory_space<vmem>>, vector<1x16x32xbf16>,
    %c0_27 = arith.constant 0 : index
    %c0_28 = arith.constant 0 : index
    %c64 = arith.constant 64 : index
    %49 = vector.load %arg1[%c0_27, %c0_28, %c64] : memref<1x16x384xbf16, #tpu.memory_space<vmem>>, vector<1x16x32xbf16>
    %50 = vector.shape_cast %49 : vector<1x16x32xbf16> to vector<16x32xbf16>
    %c0_29 = arith.constant 0 : index
    %c0_30 = arith.constant 0 : index
    %c192 = arith.constant 192 : index
    %51 = vector.load %arg1[%c0_29, %c0_30, %c192] : memref<1x16x384xbf16, #tpu.memory_space<vmem>>, vector<1x16x32xbf16>
    %52 = vector.shape_cast %51 : vector<1x16x32xbf16> to vector<16x32xbf16>
    %c0_31 = arith.constant 0 : index
    %c0_32 = arith.constant 0 : index
    %c320 = arith.constant 320 : index
    %53 = vector.load %arg1[%c0_31, %c0_32, %c320] : memref<1x16x384xbf16, #tpu.memory_space<vmem>>, vector<1x16x32xbf16>
    %54 = vector.shape_cast %53 : vector<1x16x32xbf16> to vector<16x32xbf16>
    %cst_33 = arith.constant dense<0.000000e+00> : vector<16x16xf32>
    %55 = tpu.matmul %50, %52, %cst_33 {dimension_numbers = #tpu.dot_dimension_numbers<[1], [1], [0], [0], [0, 0, 1, 0], [], []>} : vector<16x32xbf16>, vector<16x32xbf16>, vector<16x16xf32> -> vector<16x16xf32>
    %56 = arith.addf %55, %0 : vector<16x16xf32>
    %cst_34 = arith.constant dense<0xFF800000> : vector<16xf32>
    %57 = vector.multi_reduction <maximumf>, %56, %cst_34 [1] : vector<16x16xf32> to vector<16xf32>
    %58 = vector.shape_cast %57 : vector<16xf32> to vector<16x1xf32>
    %59 = vector.broadcast %58 : vector<16x1xf32> to vector<16x16xf32>
    %60 = arith.subf %56, %59 : vector<16x16xf32>
    %61 = math.exp %60 : vector<16x16xf32>
    %cst_35 = arith.constant dense<0.000000e+00> : vector<16xf32>
    %62 = vector.multi_reduction <add>, %61, %cst_35 [1] : vector<16x16xf32> to vector<16xf32>
    %63 = vector.shape_cast %62 : vector<16xf32> to vector<16x1xf32>
    %64 = tpu.reciprocal %63 {approx = true} : vector<16x1xf32> -> vector<16x1xf32>
    %65 = vector.broadcast %64 : vector<16x1xf32> to vector<16x16xf32>
    %66 = arith.mulf %61, %65 : vector<16x16xf32>
    %67 = arith.truncf %66 : vector<16x16xf32> to vector<16x16xbf16>
    %cst_36 = arith.constant dense<0.000000e+00> : vector<16x32xf32>
    %68 = tpu.matmul %67, %54, %cst_36 {dimension_numbers = #tpu.dot_dimension_numbers<[1], [0], [0], [1], [0, 0, 1, 1], [], []>} : vector<16x16xbf16>, vector<16x32xbf16>, vector<16x32xf32> -> vector<16x32xf32>
    %69 = arith.truncf %68 : vector<16x32xf32> to vector<16x32xbf16>
    %c0_37 = arith.constant 0 : index
    %c0_38 = arith.constant 0 : index
    %c64_39 = arith.constant 64 : index
    %70 = vector.load %arg3[%c0_37, %c0_38, %c64_39] : memref<1x16x128xbf16, #tpu.memory_space<vmem>>, vector<1x16x32xbf16>
    %71 = vector.shape_cast %70 : vector<1x16x32xbf16> to vector<16x32xbf16>
    %72 = vector.shape_cast %69 : vector<16x32xbf16> to vector<1x16x32xbf16>
    tpu.vector_store %arg3[%c0_37, %c0_38, %c64_39], %72 {strides = array<i32>} : memref<1x16x128xbf16, #tpu.memory_space<vmem>>, vector<1x16x32xbf16>,
    %c0_40 = arith.constant 0 : index
    %c0_41 = arith.constant 0 : index
    %c96 = arith.constant 96 : index
    %73 = vector.load %arg1[%c0_40, %c0_41, %c96] : memref<1x16x384xbf16, #tpu.memory_space<vmem>>, vector<1x16x32xbf16>
    %74 = vector.shape_cast %73 : vector<1x16x32xbf16> to vector<16x32xbf16>
    %c0_42 = arith.constant 0 : index
    %c0_43 = arith.constant 0 : index
    %c224 = arith.constant 224 : index
    %75 = vector.load %arg1[%c0_42, %c0_43, %c224] : memref<1x16x384xbf16, #tpu.memory_space<vmem>>, vector<1x16x32xbf16>
    %76 = vector.shape_cast %75 : vector<1x16x32xbf16> to vector<16x32xbf16>
    %c0_44 = arith.constant 0 : index
    %c0_45 = arith.constant 0 : index
    %c352 = arith.constant 352 : index
    %77 = vector.load %arg1[%c0_44, %c0_45, %c352] : memref<1x16x384xbf16, #tpu.memory_space<vmem>>, vector<1x16x32xbf16>
    %78 = vector.shape_cast %77 : vector<1x16x32xbf16> to vector<16x32xbf16>
    %cst_46 = arith.constant dense<0.000000e+00> : vector<16x16xf32>
    %79 = tpu.matmul %74, %76, %cst_46 {dimension_numbers = #tpu.dot_dimension_numbers<[1], [1], [0], [0], [0, 0, 1, 0], [], []>} : vector<16x32xbf16>, vector<16x32xbf16>, vector<16x16xf32> -> vector<16x16xf32>
    %80 = arith.addf %79, %0 : vector<16x16xf32>
    %cst_47 = arith.constant dense<0xFF800000> : vector<16xf32>
    %81 = vector.multi_reduction <maximumf>, %80, %cst_47 [1] : vector<16x16xf32> to vector<16xf32>
    %82 = vector.shape_cast %81 : vector<16xf32> to vector<16x1xf32>
    %83 = vector.broadcast %82 : vector<16x1xf32> to vector<16x16xf32>
    %84 = arith.subf %80, %83 : vector<16x16xf32>
    %85 = math.exp %84 : vector<16x16xf32>
    %cst_48 = arith.constant dense<0.000000e+00> : vector<16xf32>
    %86 = vector.multi_reduction <add>, %85, %cst_48 [1] : vector<16x16xf32> to vector<16xf32>
    %87 = vector.shape_cast %86 : vector<16xf32> to vector<16x1xf32>
    %88 = tpu.reciprocal %87 {approx = true} : vector<16x1xf32> -> vector<16x1xf32>
    %89 = vector.broadcast %88 : vector<16x1xf32> to vector<16x16xf32>
    %90 = arith.mulf %85, %89 : vector<16x16xf32>
    %91 = arith.truncf %90 : vector<16x16xf32> to vector<16x16xbf16>
    %cst_49 = arith.constant dense<0.000000e+00> : vector<16x32xf32>
    %92 = tpu.matmul %91, %78, %cst_49 {dimension_numbers = #tpu.dot_dimension_numbers<[1], [0], [0], [1], [0, 0, 1, 1], [], []>} : vector<16x16xbf16>, vector<16x32xbf16>, vector<16x32xf32> -> vector<16x32xf32>
    %93 = arith.truncf %92 : vector<16x32xf32> to vector<16x32xbf16>
    %c0_50 = arith.constant 0 : index
    %c0_51 = arith.constant 0 : index
    %c96_52 = arith.constant 96 : index
    %94 = vector.load %arg3[%c0_50, %c0_51, %c96_52] : memref<1x16x128xbf16, #tpu.memory_space<vmem>>, vector<1x16x32xbf16>
    %95 = vector.shape_cast %94 : vector<1x16x32xbf16> to vector<16x32xbf16>
    %96 = vector.shape_cast %93 : vector<16x32xbf16> to vector<1x16x32xbf16>
    tpu.vector_store %arg3[%c0_50, %c0_51, %c96_52], %96 {strides = array<i32>} : memref<1x16x128xbf16, #tpu.memory_space<vmem>>, vector<1x16x32xbf16>,
    return
  }
  func.func @transform_0(%arg0: i32) -> (i32, i32, i32) {
    %c0_i32 = arith.constant 0 : i32
    %c0_i32_0 = arith.constant 0 : i32
    %c0_i32_1 = arith.constant 0 : i32
    return %arg0, %c0_i32, %c0_i32_0 : i32, i32, i32
  }
  func.func @transform_1(%arg0: i32) -> (i32, i32) {
    %c0_i32 = arith.constant 0 : i32
    %c0_i32_0 = arith.constant 0 : i32
    %c0_i32_1 = arith.constant 0 : i32
    return %c0_i32, %c0_i32_0 : i32, i32
  }
  func.func @transform_2(%arg0: i32) -> (i32, i32, i32) {
    %c0_i32 = arith.constant 0 : i32
    %c0_i32_0 = arith.constant 0 : i32
    %c0_i32_1 = arith.constant 0 : i32
    return %arg0, %c0_i32, %c0_i32_0 : i32, i32, i32
  }
}

module attributes {stable_mosaic.version = 11 : i64} {
  func.func @kernel(%arg0: i32, %arg1: i32, %arg2: i32, %arg3: memref<32x128xbf16, #tpu.memory_space<vmem>>, %arg4: memref<128x128xbf16, #tpu.memory_space<vmem>>, %arg5: memref<1x128xf32, #tpu.memory_space<vmem>>, %arg6: memref<32x128xbf16, #tpu.memory_space<vmem>>, %arg7: memref<1x128xf32, #tpu.memory_space<vmem>>, %arg8: memref<1x128xf32, #tpu.memory_space<vmem>>, %arg9: memref<32x128xbf16, #tpu.memory_space<vmem>>, %arg10: memref<32x128xf32, #tpu.memory_space<vmem>>) attributes {dimension_semantics = [#tpu.dimension_semantics<parallel>, #tpu.dimension_semantics<parallel>, #tpu.dimension_semantics<arbitrary>], iteration_bounds = array<i64: 1, 1, 1>, scalar_prefetch = 0 : i64, scratch_operands = 1 : i64, tpu.core_type = #tpu.core_type<tc>, window_params = [{transform_indices = @transform_0, window_bounds = array<i64: 32, 128>}, {transform_indices = @transform_1, window_bounds = array<i64: 128, 128>}, {transform_indices = @transform_2, window_bounds = array<i64: 1, 128>}, {transform_indices = @transform_3, window_bounds = array<i64: 32, 128>}, {transform_indices = @transform_4, window_bounds = array<i64: 1, 128>}, {transform_indices = @transform_5, window_bounds = array<i64: 1, 128>}, {transform_indices = @transform_6, window_bounds = array<i64: 32, 128>}]} {
    %c0_i32 = arith.constant 0 : i32
    %0 = arith.cmpi eq, %arg2, %c0_i32 : i32
    %1 = arith.extui %0 : i1 to i32
    %c0_i32_0 = arith.constant 0 : i32
    %2 = arith.cmpi ne, %1, %c0_i32_0 : i32
    scf.if %2 {
      %cst_10 = arith.constant 0.000000e+00 : f32
      %12 = vector.broadcast %cst_10 : f32 to vector<32x128xf32>
      %c0_11 = arith.constant 0 : index
      %c0_12 = arith.constant 0 : index
      %13 = vector.load %arg10[%c0_11, %c0_12] : memref<32x128xf32, #tpu.memory_space<vmem>>, vector<32x128xf32>
      tpu.vector_store %arg10[%c0_11, %c0_12], %12 {strides = array<i32>} : memref<32x128xf32, #tpu.memory_space<vmem>>, vector<32x128xf32>,
    } else {
    }
    %c0 = arith.constant 0 : index
    %c0_1 = arith.constant 0 : index
    %3 = vector.load %arg10[%c0, %c0_1] : memref<32x128xf32, #tpu.memory_space<vmem>>, vector<32x128xf32>
    %c0_2 = arith.constant 0 : index
    %c0_3 = arith.constant 0 : index
    %4 = vector.load %arg3[%c0_2, %c0_3] : memref<32x128xbf16, #tpu.memory_space<vmem>>, vector<32x128xbf16>
    %c0_4 = arith.constant 0 : index
    %c0_5 = arith.constant 0 : index
    %5 = vector.load %arg4[%c0_4, %c0_5] : memref<128x128xbf16, #tpu.memory_space<vmem>>, vector<128x128xbf16>
    %cst = arith.constant dense<0.000000e+00> : vector<32x128xf32>
    %6 = tpu.matmul %4, %5, %cst {dimension_numbers = #tpu.dot_dimension_numbers<[1], [0], [0], [1], [0, 0, 1, 1], [], []>} : vector<32x128xbf16>, vector<128x128xbf16>, vector<32x128xf32> -> vector<32x128xf32>
    %7 = arith.addf %3, %6 : vector<32x128xf32>
    %c0_6 = arith.constant 0 : index
    %c0_7 = arith.constant 0 : index
    %8 = vector.load %arg10[%c0_6, %c0_7] : memref<32x128xf32, #tpu.memory_space<vmem>>, vector<32x128xf32>
    tpu.vector_store %arg10[%c0_6, %c0_7], %7 {strides = array<i32>} : memref<32x128xf32, #tpu.memory_space<vmem>>, vector<32x128xf32>,
    %c0_i32_8 = arith.constant 0 : i32
    %9 = arith.cmpi eq, %arg2, %c0_i32_8 : i32
    %10 = arith.extui %9 : i1 to i32
    %c0_i32_9 = arith.constant 0 : i32
    %11 = arith.cmpi ne, %10, %c0_i32_9 : i32
    scf.if %11 {
      %c0_10 = arith.constant 0 : index
      %c0_11 = arith.constant 0 : index
      %12 = vector.load %arg10[%c0_10, %c0_11] : memref<32x128xf32, #tpu.memory_space<vmem>>, vector<32x128xf32>
      %c0_12 = arith.constant 0 : index
      %c0_13 = arith.constant 0 : index
      %13 = vector.load %arg5[%c0_12, %c0_13] : memref<1x128xf32, #tpu.memory_space<vmem>>, vector<1x128xf32>
      %14 = vector.broadcast %13 : vector<1x128xf32> to vector<32x128xf32>
      %15 = arith.addf %12, %14 : vector<32x128xf32>
      %c0_14 = arith.constant 0 : index
      %c0_15 = arith.constant 0 : index
      %16 = vector.load %arg6[%c0_14, %c0_15] : memref<32x128xbf16, #tpu.memory_space<vmem>>, vector<32x128xbf16>
      %17 = arith.extf %16 : vector<32x128xbf16> to vector<32x128xf32>
      %18 = arith.addf %15, %17 : vector<32x128xf32>
      %cst_16 = arith.constant dense<0.000000e+00> : vector<32xf32>
      %19 = vector.multi_reduction <add>, %18, %cst_16 [1] : vector<32x128xf32> to vector<32xf32>
      %20 = vector.shape_cast %19 : vector<32xf32> to vector<32x1xf32>
      %cst_17 = arith.constant 1.280000e+02 : f32
      %21 = vector.broadcast %cst_17 : f32 to vector<32x1xf32>
      %22 = arith.divf %20, %21 : vector<32x1xf32>
      %23 = vector.broadcast %22 : vector<32x1xf32> to vector<32x128xf32>
      %24 = arith.subf %18, %23 : vector<32x128xf32>
      %25 = arith.mulf %24, %24 : vector<32x128xf32>
      %cst_18 = arith.constant dense<0.000000e+00> : vector<32xf32>
      %26 = vector.multi_reduction <add>, %25, %cst_18 [1] : vector<32x128xf32> to vector<32xf32>
      %27 = vector.shape_cast %26 : vector<32xf32> to vector<32x1xf32>
      %cst_19 = arith.constant 1.280000e+02 : f32
      %28 = vector.broadcast %cst_19 : f32 to vector<32x1xf32>
      %29 = arith.divf %27, %28 : vector<32x1xf32>
      %30 = vector.broadcast %22 : vector<32x1xf32> to vector<32x128xf32>
      %31 = arith.subf %18, %30 : vector<32x128xf32>
      %cst_20 = arith.constant 9.99999974E-6 : f32
      %32 = vector.broadcast %cst_20 : f32 to vector<32x1xf32>
      %33 = arith.addf %29, %32 : vector<32x1xf32>
      %34 = math.rsqrt %33 : vector<32x1xf32>
      %35 = vector.broadcast %34 : vector<32x1xf32> to vector<32x128xf32>
      %36 = arith.mulf %31, %35 : vector<32x128xf32>
      %c0_21 = arith.constant 0 : index
      %c0_22 = arith.constant 0 : index
      %37 = vector.load %arg7[%c0_21, %c0_22] : memref<1x128xf32, #tpu.memory_space<vmem>>, vector<1x128xf32>
      %38 = vector.broadcast %37 : vector<1x128xf32> to vector<32x128xf32>
      %39 = arith.mulf %36, %38 : vector<32x128xf32>
      %c0_23 = arith.constant 0 : index
      %c0_24 = arith.constant 0 : index
      %40 = vector.load %arg8[%c0_23, %c0_24] : memref<1x128xf32, #tpu.memory_space<vmem>>, vector<1x128xf32>
      %41 = vector.broadcast %40 : vector<1x128xf32> to vector<32x128xf32>
      %42 = arith.addf %39, %41 : vector<32x128xf32>
      %43 = arith.truncf %42 : vector<32x128xf32> to vector<32x128xbf16>
      %c0_25 = arith.constant 0 : index
      %c0_26 = arith.constant 0 : index
      %44 = vector.load %arg9[%c0_25, %c0_26] : memref<32x128xbf16, #tpu.memory_space<vmem>>, vector<32x128xbf16>
      tpu.vector_store %arg9[%c0_25, %c0_26], %43 {strides = array<i32>} : memref<32x128xbf16, #tpu.memory_space<vmem>>, vector<32x128xbf16>,
    } else {
    }
    return
  }
  func.func @transform_0(%arg0: i32, %arg1: i32, %arg2: i32) -> (i32, i32) {
    %c0_i32 = arith.constant 0 : i32
    return %arg0, %arg2 : i32, i32
  }
  func.func @transform_1(%arg0: i32, %arg1: i32, %arg2: i32) -> (i32, i32) {
    %c0_i32 = arith.constant 0 : i32
    return %arg2, %arg1 : i32, i32
  }
  func.func @transform_2(%arg0: i32, %arg1: i32, %arg2: i32) -> (i32, i32) {
    %c0_i32 = arith.constant 0 : i32
    %c0_i32_0 = arith.constant 0 : i32
    return %c0_i32, %arg1 : i32, i32
  }
  func.func @transform_3(%arg0: i32, %arg1: i32, %arg2: i32) -> (i32, i32) {
    %c0_i32 = arith.constant 0 : i32
    return %arg0, %arg1 : i32, i32
  }
  func.func @transform_4(%arg0: i32, %arg1: i32, %arg2: i32) -> (i32, i32) {
    %c0_i32 = arith.constant 0 : i32
    %c0_i32_0 = arith.constant 0 : i32
    return %c0_i32, %arg1 : i32, i32
  }
  func.func @transform_5(%arg0: i32, %arg1: i32, %arg2: i32) -> (i32, i32) {
    %c0_i32 = arith.constant 0 : i32
    %c0_i32_0 = arith.constant 0 : i32
    return %c0_i32, %arg1 : i32, i32
  }
  func.func @transform_6(%arg0: i32, %arg1: i32, %arg2: i32) -> (i32, i32) {
    %c0_i32 = arith.constant 0 : i32
    return %arg0, %arg1 : i32, i32
  }
}

module attributes {stable_mosaic.version = 11 : i64} {
  func.func @kernel(%arg0: i32, %arg1: i32, %arg2: i32, %arg3: memref<32x128xbf16, #tpu.memory_space<vmem>>, %arg4: memref<128x128xbf16, #tpu.memory_space<vmem>>, %arg5: memref<1x128xf32, #tpu.memory_space<vmem>>, %arg6: memref<32x128xbf16, #tpu.memory_space<vmem>>, %arg7: memref<32x128xf32, #tpu.memory_space<vmem>>) attributes {dimension_semantics = [#tpu.dimension_semantics<parallel>, #tpu.dimension_semantics<parallel>, #tpu.dimension_semantics<arbitrary>], iteration_bounds = array<i64: 1, 1, 1>, scalar_prefetch = 0 : i64, scratch_operands = 1 : i64, tpu.core_type = #tpu.core_type<tc>, window_params = [{transform_indices = @transform_0, window_bounds = array<i64: 32, 128>}, {transform_indices = @transform_1, window_bounds = array<i64: 128, 128>}, {transform_indices = @transform_2, window_bounds = array<i64: 1, 128>}, {transform_indices = @transform_3, window_bounds = array<i64: 32, 128>}]} {
    %c0_i32 = arith.constant 0 : i32
    %0 = arith.cmpi eq, %arg2, %c0_i32 : i32
    %1 = arith.extui %0 : i1 to i32
    %c0_i32_0 = arith.constant 0 : i32
    %2 = arith.cmpi ne, %1, %c0_i32_0 : i32
    scf.if %2 {
      %cst_10 = arith.constant 0.000000e+00 : f32
      %12 = vector.broadcast %cst_10 : f32 to vector<32x128xf32>
      %c0_11 = arith.constant 0 : index
      %c0_12 = arith.constant 0 : index
      %13 = vector.load %arg7[%c0_11, %c0_12] : memref<32x128xf32, #tpu.memory_space<vmem>>, vector<32x128xf32>
      tpu.vector_store %arg7[%c0_11, %c0_12], %12 {strides = array<i32>} : memref<32x128xf32, #tpu.memory_space<vmem>>, vector<32x128xf32>,
    } else {
    }
    %c0 = arith.constant 0 : index
    %c0_1 = arith.constant 0 : index
    %3 = vector.load %arg7[%c0, %c0_1] : memref<32x128xf32, #tpu.memory_space<vmem>>, vector<32x128xf32>
    %c0_2 = arith.constant 0 : index
    %c0_3 = arith.constant 0 : index
    %4 = vector.load %arg3[%c0_2, %c0_3] : memref<32x128xbf16, #tpu.memory_space<vmem>>, vector<32x128xbf16>
    %c0_4 = arith.constant 0 : index
    %c0_5 = arith.constant 0 : index
    %5 = vector.load %arg4[%c0_4, %c0_5] : memref<128x128xbf16, #tpu.memory_space<vmem>>, vector<128x128xbf16>
    %cst = arith.constant dense<0.000000e+00> : vector<32x128xf32>
    %6 = tpu.matmul %4, %5, %cst {dimension_numbers = #tpu.dot_dimension_numbers<[1], [0], [0], [1], [0, 0, 1, 1], [], []>} : vector<32x128xbf16>, vector<128x128xbf16>, vector<32x128xf32> -> vector<32x128xf32>
    %7 = arith.addf %3, %6 : vector<32x128xf32>
    %c0_6 = arith.constant 0 : index
    %c0_7 = arith.constant 0 : index
    %8 = vector.load %arg7[%c0_6, %c0_7] : memref<32x128xf32, #tpu.memory_space<vmem>>, vector<32x128xf32>
    tpu.vector_store %arg7[%c0_6, %c0_7], %7 {strides = array<i32>} : memref<32x128xf32, #tpu.memory_space<vmem>>, vector<32x128xf32>,
    %c0_i32_8 = arith.constant 0 : i32
    %9 = arith.cmpi eq, %arg2, %c0_i32_8 : i32
    %10 = arith.extui %9 : i1 to i32
    %c0_i32_9 = arith.constant 0 : i32
    %11 = arith.cmpi ne, %10, %c0_i32_9 : i32
    scf.if %11 {
      %c0_10 = arith.constant 0 : index
      %c0_11 = arith.constant 0 : index
      %12 = vector.load %arg7[%c0_10, %c0_11] : memref<32x128xf32, #tpu.memory_space<vmem>>, vector<32x128xf32>
      %c0_12 = arith.constant 0 : index
      %c0_13 = arith.constant 0 : index
      %13 = vector.load %arg5[%c0_12, %c0_13] : memref<1x128xf32, #tpu.memory_space<vmem>>, vector<1x128xf32>
      %14 = vector.broadcast %13 : vector<1x128xf32> to vector<32x128xf32>
      %15 = arith.addf %12, %14 : vector<32x128xf32>
      %16 = arith.truncf %15 : vector<32x128xf32> to vector<32x128xbf16>
      %c0_14 = arith.constant 0 : index
      %c0_15 = arith.constant 0 : index
      %17 = vector.load %arg6[%c0_14, %c0_15] : memref<32x128xbf16, #tpu.memory_space<vmem>>, vector<32x128xbf16>
      tpu.vector_store %arg6[%c0_14, %c0_15], %16 {strides = array<i32>} : memref<32x128xbf16, #tpu.memory_space<vmem>>, vector<32x128xbf16>,
    } else {
    }
    return
  }
  func.func @transform_0(%arg0: i32, %arg1: i32, %arg2: i32) -> (i32, i32) {
    %c0_i32 = arith.constant 0 : i32
    return %arg0, %arg2 : i32, i32
  }
  func.func @transform_1(%arg0: i32, %arg1: i32, %arg2: i32) -> (i32, i32) {
    %c0_i32 = arith.constant 0 : i32
    return %arg2, %arg1 : i32, i32
  }
  func.func @transform_2(%arg0: i32, %arg1: i32, %arg2: i32) -> (i32, i32) {
    %c0_i32 = arith.constant 0 : i32
    %c0_i32_0 = arith.constant 0 : i32
    return %c0_i32, %arg1 : i32, i32
  }
  func.func @transform_3(%arg0: i32, %arg1: i32, %arg2: i32) -> (i32, i32) {
    %c0_i32 = arith.constant 0 : i32
    return %arg0, %arg1 : i32, i32
  }
}

module attributes {stable_mosaic.version = 11 : i64} {
  func.func @kernel(%arg0: i32, %arg1: i32, %arg2: i32, %arg3: memref<32x128xbf16, #tpu.memory_space<vmem>>, %arg4: memref<128x256xbf16, #tpu.memory_space<vmem>>, %arg5: memref<1x256xf32, #tpu.memory_space<vmem>>, %arg6: memref<32x256xbf16, #tpu.memory_space<vmem>>, %arg7: memref<32x256xf32, #tpu.memory_space<vmem>>) attributes {dimension_semantics = [#tpu.dimension_semantics<parallel>, #tpu.dimension_semantics<parallel>, #tpu.dimension_semantics<arbitrary>], iteration_bounds = array<i64: 1, 1, 1>, scalar_prefetch = 0 : i64, scratch_operands = 1 : i64, tpu.core_type = #tpu.core_type<tc>, window_params = [{transform_indices = @transform_0, window_bounds = array<i64: 32, 128>}, {transform_indices = @transform_1, window_bounds = array<i64: 128, 256>}, {transform_indices = @transform_2, window_bounds = array<i64: 1, 256>}, {transform_indices = @transform_3, window_bounds = array<i64: 32, 256>}]} {
    %c0_i32 = arith.constant 0 : i32
    %0 = arith.cmpi eq, %arg2, %c0_i32 : i32
    %1 = arith.extui %0 : i1 to i32
    %c0_i32_0 = arith.constant 0 : i32
    %2 = arith.cmpi ne, %1, %c0_i32_0 : i32
    scf.if %2 {
      %cst_10 = arith.constant 0.000000e+00 : f32
      %12 = vector.broadcast %cst_10 : f32 to vector<32x256xf32>
      %c0_11 = arith.constant 0 : index
      %c0_12 = arith.constant 0 : index
      %13 = vector.load %arg7[%c0_11, %c0_12] : memref<32x256xf32, #tpu.memory_space<vmem>>, vector<32x256xf32>
      tpu.vector_store %arg7[%c0_11, %c0_12], %12 {strides = array<i32>} : memref<32x256xf32, #tpu.memory_space<vmem>>, vector<32x256xf32>,
    } else {
    }
    %c0 = arith.constant 0 : index
    %c0_1 = arith.constant 0 : index
    %3 = vector.load %arg7[%c0, %c0_1] : memref<32x256xf32, #tpu.memory_space<vmem>>, vector<32x256xf32>
    %c0_2 = arith.constant 0 : index
    %c0_3 = arith.constant 0 : index
    %4 = vector.load %arg3[%c0_2, %c0_3] : memref<32x128xbf16, #tpu.memory_space<vmem>>, vector<32x128xbf16>
    %c0_4 = arith.constant 0 : index
    %c0_5 = arith.constant 0 : index
    %5 = vector.load %arg4[%c0_4, %c0_5] : memref<128x256xbf16, #tpu.memory_space<vmem>>, vector<128x256xbf16>
    %cst = arith.constant dense<0.000000e+00> : vector<32x256xf32>
    %6 = tpu.matmul %4, %5, %cst {dimension_numbers = #tpu.dot_dimension_numbers<[1], [0], [0], [1], [0, 0, 1, 1], [], []>} : vector<32x128xbf16>, vector<128x256xbf16>, vector<32x256xf32> -> vector<32x256xf32>
    %7 = arith.addf %3, %6 : vector<32x256xf32>
    %c0_6 = arith.constant 0 : index
    %c0_7 = arith.constant 0 : index
    %8 = vector.load %arg7[%c0_6, %c0_7] : memref<32x256xf32, #tpu.memory_space<vmem>>, vector<32x256xf32>
    tpu.vector_store %arg7[%c0_6, %c0_7], %7 {strides = array<i32>} : memref<32x256xf32, #tpu.memory_space<vmem>>, vector<32x256xf32>,
    %c0_i32_8 = arith.constant 0 : i32
    %9 = arith.cmpi eq, %arg2, %c0_i32_8 : i32
    %10 = arith.extui %9 : i1 to i32
    %c0_i32_9 = arith.constant 0 : i32
    %11 = arith.cmpi ne, %10, %c0_i32_9 : i32
    scf.if %11 {
      %c0_10 = arith.constant 0 : index
      %c0_11 = arith.constant 0 : index
      %12 = vector.load %arg7[%c0_10, %c0_11] : memref<32x256xf32, #tpu.memory_space<vmem>>, vector<32x256xf32>
      %c0_12 = arith.constant 0 : index
      %c0_13 = arith.constant 0 : index
      %13 = vector.load %arg5[%c0_12, %c0_13] : memref<1x256xf32, #tpu.memory_space<vmem>>, vector<1x256xf32>
      %14 = vector.broadcast %13 : vector<1x256xf32> to vector<32x256xf32>
      %15 = arith.addf %12, %14 : vector<32x256xf32>
      %cst_14 = arith.constant 0.000000e+00 : f32
      %16 = vector.broadcast %cst_14 : f32 to vector<32x256xf32>
      %17 = arith.maximumf %15, %16 : vector<32x256xf32>
      %18 = arith.truncf %17 : vector<32x256xf32> to vector<32x256xbf16>
      %c0_15 = arith.constant 0 : index
      %c0_16 = arith.constant 0 : index
      %19 = vector.load %arg6[%c0_15, %c0_16] : memref<32x256xbf16, #tpu.memory_space<vmem>>, vector<32x256xbf16>
      tpu.vector_store %arg6[%c0_15, %c0_16], %18 {strides = array<i32>} : memref<32x256xbf16, #tpu.memory_space<vmem>>, vector<32x256xbf16>,
    } else {
    }
    return
  }
  func.func @transform_0(%arg0: i32, %arg1: i32, %arg2: i32) -> (i32, i32) {
    %c0_i32 = arith.constant 0 : i32
    return %arg0, %arg2 : i32, i32
  }
  func.func @transform_1(%arg0: i32, %arg1: i32, %arg2: i32) -> (i32, i32) {
    %c0_i32 = arith.constant 0 : i32
    return %arg2, %arg1 : i32, i32
  }
  func.func @transform_2(%arg0: i32, %arg1: i32, %arg2: i32) -> (i32, i32) {
    %c0_i32 = arith.constant 0 : i32
    %c0_i32_0 = arith.constant 0 : i32
    return %c0_i32, %arg1 : i32, i32
  }
  func.func @transform_3(%arg0: i32, %arg1: i32, %arg2: i32) -> (i32, i32) {
    %c0_i32 = arith.constant 0 : i32
    return %arg0, %arg1 : i32, i32
  }
}

module attributes {stable_mosaic.version = 11 : i64} {
  func.func @kernel(%arg0: i32, %arg1: memref<1x16x128xbf16, #tpu.memory_space<vmem>>, %arg2: memref<1x16x256xbf16, #tpu.memory_space<vmem>>, %arg3: memref<1x1x16xf32, #tpu.memory_space<vmem>>, %arg4: memref<1x16x128xbf16, #tpu.memory_space<vmem>>, %arg5: memref<1x16x16xf32, #tpu.memory_space<vmem>>) attributes {dimension_semantics = [#tpu.dimension_semantics<parallel>], iteration_bounds = array<i64: 2>, scalar_prefetch = 0 : i64, scratch_operands = 0 : i64, tpu.core_type = #tpu.core_type<tc>, window_params = [{transform_indices = @transform_0, window_bounds = array<i64: 1, 16, 128>}, {transform_indices = @transform_1, window_bounds = array<i64: 1, 16, 256>}, {transform_indices = @transform_2, window_bounds = array<i64: 1, 1, 16>}, {transform_indices = @transform_3, window_bounds = array<i64: 1, 16, 128>}, {transform_indices = @transform_4, window_bounds = array<i64: 1, 16, 16>}]} {
    %c0 = arith.constant 0 : index
    %c0_0 = arith.constant 0 : index
    %c0_1 = arith.constant 0 : index
    %0 = vector.load %arg3[%c0, %c0_0, %c0_1] : memref<1x1x16xf32, #tpu.memory_space<vmem>>, vector<1x1x16xf32>
    %1 = vector.shape_cast %0 : vector<1x1x16xf32> to vector<1x16xf32>
    %c0_2 = arith.constant 0 : index
    %c0_3 = arith.constant 0 : index
    %c0_4 = arith.constant 0 : index
    %2 = vector.load %arg1[%c0_2, %c0_3, %c0_4] : memref<1x16x128xbf16, #tpu.memory_space<vmem>>, vector<1x16x32xbf16>
    %3 = vector.shape_cast %2 : vector<1x16x32xbf16> to vector<16x32xbf16>
    %c0_5 = arith.constant 0 : index
    %c0_6 = arith.constant 0 : index
    %c0_7 = arith.constant 0 : index
    %4 = vector.load %arg2[%c0_5, %c0_6, %c0_7] : memref<1x16x256xbf16, #tpu.memory_space<vmem>>, vector<1x16x32xbf16>
    %5 = vector.shape_cast %4 : vector<1x16x32xbf16> to vector<16x32xbf16>
    %c0_8 = arith.constant 0 : index
    %c0_9 = arith.constant 0 : index
    %c128 = arith.constant 128 : index
    %6 = vector.load %arg2[%c0_8, %c0_9, %c128] : memref<1x16x256xbf16, #tpu.memory_space<vmem>>, vector<1x16x32xbf16>
    %7 = vector.shape_cast %6 : vector<1x16x32xbf16> to vector<16x32xbf16>
    %cst = arith.constant dense<0.000000e+00> : vector<16x16xf32>
    %8 = tpu.matmul %3, %5, %cst {dimension_numbers = #tpu.dot_dimension_numbers<[1], [1], [0], [0], [0, 0, 1, 0], [], []>} : vector<16x32xbf16>, vector<16x32xbf16>, vector<16x16xf32> -> vector<16x16xf32>
    %9 = vector.broadcast %1 : vector<1x16xf32> to vector<16x16xf32>
    %10 = arith.addf %8, %9 : vector<16x16xf32>
    %cst_10 = arith.constant dense<0xFF800000> : vector<16xf32>
    %11 = vector.multi_reduction <maximumf>, %10, %cst_10 [1] : vector<16x16xf32> to vector<16xf32>
    %12 = vector.shape_cast %11 : vector<16xf32> to vector<16x1xf32>
    %13 = vector.broadcast %12 : vector<16x1xf32> to vector<16x16xf32>
    %14 = arith.subf %10, %13 : vector<16x16xf32>
    %15 = math.exp %14 : vector<16x16xf32>
    %cst_11 = arith.constant dense<0.000000e+00> : vector<16xf32>
    %16 = vector.multi_reduction <add>, %15, %cst_11 [1] : vector<16x16xf32> to vector<16xf32>
    %17 = vector.shape_cast %16 : vector<16xf32> to vector<16x1xf32>
    %18 = tpu.reciprocal %17 {approx = true} : vector<16x1xf32> -> vector<16x1xf32>
    %19 = vector.broadcast %18 : vector<16x1xf32> to vector<16x16xf32>
    %20 = arith.mulf %15, %19 : vector<16x16xf32>
    %21 = arith.truncf %20 : vector<16x16xf32> to vector<16x16xbf16>
    %cst_12 = arith.constant dense<0.000000e+00> : vector<16x32xf32>
    %22 = tpu.matmul %21, %7, %cst_12 {dimension_numbers = #tpu.dot_dimension_numbers<[1], [0], [0], [1], [0, 0, 1, 1], [], []>} : vector<16x16xbf16>, vector<16x32xbf16>, vector<16x32xf32> -> vector<16x32xf32>
    %23 = arith.truncf %22 : vector<16x32xf32> to vector<16x32xbf16>
    %c0_13 = arith.constant 0 : index
    %c0_14 = arith.constant 0 : index
    %c0_15 = arith.constant 0 : index
    %24 = vector.load %arg4[%c0_13, %c0_14, %c0_15] : memref<1x16x128xbf16, #tpu.memory_space<vmem>>, vector<1x16x32xbf16>
    %25 = vector.shape_cast %24 : vector<1x16x32xbf16> to vector<16x32xbf16>
    %26 = vector.shape_cast %23 : vector<16x32xbf16> to vector<1x16x32xbf16>
    tpu.vector_store %arg4[%c0_13, %c0_14, %c0_15], %26 {strides = array<i32>} : memref<1x16x128xbf16, #tpu.memory_space<vmem>>, vector<1x16x32xbf16>,
    %c0_16 = arith.constant 0 : index
    %c0_17 = arith.constant 0 : index
    %c32 = arith.constant 32 : index
    %27 = vector.load %arg1[%c0_16, %c0_17, %c32] : memref<1x16x128xbf16, #tpu.memory_space<vmem>>, vector<1x16x32xbf16>
    %28 = vector.shape_cast %27 : vector<1x16x32xbf16> to vector<16x32xbf16>
    %c0_18 = arith.constant 0 : index
    %c0_19 = arith.constant 0 : index
    %c32_20 = arith.constant 32 : index
    %29 = vector.load %arg2[%c0_18, %c0_19, %c32_20] : memref<1x16x256xbf16, #tpu.memory_space<vmem>>, vector<1x16x32xbf16>
    %30 = vector.shape_cast %29 : vector<1x16x32xbf16> to vector<16x32xbf16>
    %c0_21 = arith.constant 0 : index
    %c0_22 = arith.constant 0 : index
    %c160 = arith.constant 160 : index
    %31 = vector.load %arg2[%c0_21, %c0_22, %c160] : memref<1x16x256xbf16, #tpu.memory_space<vmem>>, vector<1x16x32xbf16>
    %32 = vector.shape_cast %31 : vector<1x16x32xbf16> to vector<16x32xbf16>
    %cst_23 = arith.constant dense<0.000000e+00> : vector<16x16xf32>
    %33 = tpu.matmul %28, %30, %cst_23 {dimension_numbers = #tpu.dot_dimension_numbers<[1], [1], [0], [0], [0, 0, 1, 0], [], []>} : vector<16x32xbf16>, vector<16x32xbf16>, vector<16x16xf32> -> vector<16x16xf32>
    %34 = vector.broadcast %1 : vector<1x16xf32> to vector<16x16xf32>
    %35 = arith.addf %33, %34 : vector<16x16xf32>
    %cst_24 = arith.constant dense<0xFF800000> : vector<16xf32>
    %36 = vector.multi_reduction <maximumf>, %35, %cst_24 [1] : vector<16x16xf32> to vector<16xf32>
    %37 = vector.shape_cast %36 : vector<16xf32> to vector<16x1xf32>
    %38 = vector.broadcast %37 : vector<16x1xf32> to vector<16x16xf32>
    %39 = arith.subf %35, %38 : vector<16x16xf32>
    %40 = math.exp %39 : vector<16x16xf32>
    %cst_25 = arith.constant dense<0.000000e+00> : vector<16xf32>
    %41 = vector.multi_reduction <add>, %40, %cst_25 [1] : vector<16x16xf32> to vector<16xf32>
    %42 = vector.shape_cast %41 : vector<16xf32> to vector<16x1xf32>
    %43 = tpu.reciprocal %42 {approx = true} : vector<16x1xf32> -> vector<16x1xf32>
    %44 = vector.broadcast %43 : vector<16x1xf32> to vector<16x16xf32>
    %45 = arith.mulf %40, %44 : vector<16x16xf32>
    %46 = arith.truncf %45 : vector<16x16xf32> to vector<16x16xbf16>
    %cst_26 = arith.constant dense<0.000000e+00> : vector<16x32xf32>
    %47 = tpu.matmul %46, %32, %cst_26 {dimension_numbers = #tpu.dot_dimension_numbers<[1], [0], [0], [1], [0, 0, 1, 1], [], []>} : vector<16x16xbf16>, vector<16x32xbf16>, vector<16x32xf32> -> vector<16x32xf32>
    %48 = arith.truncf %47 : vector<16x32xf32> to vector<16x32xbf16>
    %c0_27 = arith.constant 0 : index
    %c0_28 = arith.constant 0 : index
    %c32_29 = arith.constant 32 : index
    %49 = vector.load %arg4[%c0_27, %c0_28, %c32_29] : memref<1x16x128xbf16, #tpu.memory_space<vmem>>, vector<1x16x32xbf16>
    %50 = vector.shape_cast %49 : vector<1x16x32xbf16> to vector<16x32xbf16>
    %51 = vector.shape_cast %48 : vector<16x32xbf16> to vector<1x16x32xbf16>
    tpu.vector_store %arg4[%c0_27, %c0_28, %c32_29], %51 {strides = array<i32>} : memref<1x16x128xbf16, #tpu.memory_space<vmem>>, vector<1x16x32xbf16>,
    %52 = arith.addf %20, %45 : vector<16x16xf32>
    %c0_30 = arith.constant 0 : index
    %c0_31 = arith.constant 0 : index
    %c64 = arith.constant 64 : index
    %53 = vector.load %arg1[%c0_30, %c0_31, %c64] : memref<1x16x128xbf16, #tpu.memory_space<vmem>>, vector<1x16x32xbf16>
    %54 = vector.shape_cast %53 : vector<1x16x32xbf16> to vector<16x32xbf16>
    %c0_32 = arith.constant 0 : index
    %c0_33 = arith.constant 0 : index
    %c64_34 = arith.constant 64 : index
    %55 = vector.load %arg2[%c0_32, %c0_33, %c64_34] : memref<1x16x256xbf16, #tpu.memory_space<vmem>>, vector<1x16x32xbf16>
    %56 = vector.shape_cast %55 : vector<1x16x32xbf16> to vector<16x32xbf16>
    %c0_35 = arith.constant 0 : index
    %c0_36 = arith.constant 0 : index
    %c192 = arith.constant 192 : index
    %57 = vector.load %arg2[%c0_35, %c0_36, %c192] : memref<1x16x256xbf16, #tpu.memory_space<vmem>>, vector<1x16x32xbf16>
    %58 = vector.shape_cast %57 : vector<1x16x32xbf16> to vector<16x32xbf16>
    %cst_37 = arith.constant dense<0.000000e+00> : vector<16x16xf32>
    %59 = tpu.matmul %54, %56, %cst_37 {dimension_numbers = #tpu.dot_dimension_numbers<[1], [1], [0], [0], [0, 0, 1, 0], [], []>} : vector<16x32xbf16>, vector<16x32xbf16>, vector<16x16xf32> -> vector<16x16xf32>
    %60 = vector.broadcast %1 : vector<1x16xf32> to vector<16x16xf32>
    %61 = arith.addf %59, %60 : vector<16x16xf32>
    %cst_38 = arith.constant dense<0xFF800000> : vector<16xf32>
    %62 = vector.multi_reduction <maximumf>, %61, %cst_38 [1] : vector<16x16xf32> to vector<16xf32>
    %63 = vector.shape_cast %62 : vector<16xf32> to vector<16x1xf32>
    %64 = vector.broadcast %63 : vector<16x1xf32> to vector<16x16xf32>
    %65 = arith.subf %61, %64 : vector<16x16xf32>
    %66 = math.exp %65 : vector<16x16xf32>
    %cst_39 = arith.constant dense<0.000000e+00> : vector<16xf32>
    %67 = vector.multi_reduction <add>, %66, %cst_39 [1] : vector<16x16xf32> to vector<16xf32>
    %68 = vector.shape_cast %67 : vector<16xf32> to vector<16x1xf32>
    %69 = tpu.reciprocal %68 {approx = true} : vector<16x1xf32> -> vector<16x1xf32>
    %70 = vector.broadcast %69 : vector<16x1xf32> to vector<16x16xf32>
    %71 = arith.mulf %66, %70 : vector<16x16xf32>
    %72 = arith.truncf %71 : vector<16x16xf32> to vector<16x16xbf16>
    %cst_40 = arith.constant dense<0.000000e+00> : vector<16x32xf32>
    %73 = tpu.matmul %72, %58, %cst_40 {dimension_numbers = #tpu.dot_dimension_numbers<[1], [0], [0], [1], [0, 0, 1, 1], [], []>} : vector<16x16xbf16>, vector<16x32xbf16>, vector<16x32xf32> -> vector<16x32xf32>
    %74 = arith.truncf %73 : vector<16x32xf32> to vector<16x32xbf16>
    %c0_41 = arith.constant 0 : index
    %c0_42 = arith.constant 0 : index
    %c64_43 = arith.constant 64 : index
    %75 = vector.load %arg4[%c0_41, %c0_42, %c64_43] : memref<1x16x128xbf16, #tpu.memory_space<vmem>>, vector<1x16x32xbf16>
    %76 = vector.shape_cast %75 : vector<1x16x32xbf16> to vector<16x32xbf16>
    %77 = vector.shape_cast %74 : vector<16x32xbf16> to vector<1x16x32xbf16>
    tpu.vector_store %arg4[%c0_41, %c0_42, %c64_43], %77 {strides = array<i32>} : memref<1x16x128xbf16, #tpu.memory_space<vmem>>, vector<1x16x32xbf16>,
    %78 = arith.addf %52, %71 : vector<16x16xf32>
    %c0_44 = arith.constant 0 : index
    %c0_45 = arith.constant 0 : index
    %c96 = arith.constant 96 : index
    %79 = vector.load %arg1[%c0_44, %c0_45, %c96] : memref<1x16x128xbf16, #tpu.memory_space<vmem>>, vector<1x16x32xbf16>
    %80 = vector.shape_cast %79 : vector<1x16x32xbf16> to vector<16x32xbf16>
    %c0_46 = arith.constant 0 : index
    %c0_47 = arith.constant 0 : index
    %c96_48 = arith.constant 96 : index
    %81 = vector.load %arg2[%c0_46, %c0_47, %c96_48] : memref<1x16x256xbf16, #tpu.memory_space<vmem>>, vector<1x16x32xbf16>
    %82 = vector.shape_cast %81 : vector<1x16x32xbf16> to vector<16x32xbf16>
    %c0_49 = arith.constant 0 : index
    %c0_50 = arith.constant 0 : index
    %c224 = arith.constant 224 : index
    %83 = vector.load %arg2[%c0_49, %c0_50, %c224] : memref<1x16x256xbf16, #tpu.memory_space<vmem>>, vector<1x16x32xbf16>
    %84 = vector.shape_cast %83 : vector<1x16x32xbf16> to vector<16x32xbf16>
    %cst_51 = arith.constant dense<0.000000e+00> : vector<16x16xf32>
    %85 = tpu.matmul %80, %82, %cst_51 {dimension_numbers = #tpu.dot_dimension_numbers<[1], [1], [0], [0], [0, 0, 1, 0], [], []>} : vector<16x32xbf16>, vector<16x32xbf16>, vector<16x16xf32> -> vector<16x16xf32>
    %86 = vector.broadcast %1 : vector<1x16xf32> to vector<16x16xf32>
    %87 = arith.addf %85, %86 : vector<16x16xf32>
    %cst_52 = arith.constant dense<0xFF800000> : vector<16xf32>
    %88 = vector.multi_reduction <maximumf>, %87, %cst_52 [1] : vector<16x16xf32> to vector<16xf32>
    %89 = vector.shape_cast %88 : vector<16xf32> to vector<16x1xf32>
    %90 = vector.broadcast %89 : vector<16x1xf32> to vector<16x16xf32>
    %91 = arith.subf %87, %90 : vector<16x16xf32>
    %92 = math.exp %91 : vector<16x16xf32>
    %cst_53 = arith.constant dense<0.000000e+00> : vector<16xf32>
    %93 = vector.multi_reduction <add>, %92, %cst_53 [1] : vector<16x16xf32> to vector<16xf32>
    %94 = vector.shape_cast %93 : vector<16xf32> to vector<16x1xf32>
    %95 = tpu.reciprocal %94 {approx = true} : vector<16x1xf32> -> vector<16x1xf32>
    %96 = vector.broadcast %95 : vector<16x1xf32> to vector<16x16xf32>
    %97 = arith.mulf %92, %96 : vector<16x16xf32>
    %98 = arith.truncf %97 : vector<16x16xf32> to vector<16x16xbf16>
    %cst_54 = arith.constant dense<0.000000e+00> : vector<16x32xf32>
    %99 = tpu.matmul %98, %84, %cst_54 {dimension_numbers = #tpu.dot_dimension_numbers<[1], [0], [0], [1], [0, 0, 1, 1], [], []>} : vector<16x16xbf16>, vector<16x32xbf16>, vector<16x32xf32> -> vector<16x32xf32>
    %100 = arith.truncf %99 : vector<16x32xf32> to vector<16x32xbf16>
    %c0_55 = arith.constant 0 : index
    %c0_56 = arith.constant 0 : index
    %c96_57 = arith.constant 96 : index
    %101 = vector.load %arg4[%c0_55, %c0_56, %c96_57] : memref<1x16x128xbf16, #tpu.memory_space<vmem>>, vector<1x16x32xbf16>
    %102 = vector.shape_cast %101 : vector<1x16x32xbf16> to vector<16x32xbf16>
    %103 = vector.shape_cast %100 : vector<16x32xbf16> to vector<1x16x32xbf16>
    tpu.vector_store %arg4[%c0_55, %c0_56, %c96_57], %103 {strides = array<i32>} : memref<1x16x128xbf16, #tpu.memory_space<vmem>>, vector<1x16x32xbf16>,
    %104 = arith.addf %78, %97 : vector<16x16xf32>
    %cst_58 = arith.constant 2.500000e-01 : f32
    %105 = vector.broadcast %cst_58 : f32 to vector<16x16xf32>
    %106 = arith.mulf %104, %105 : vector<16x16xf32>
    %c0_59 = arith.constant 0 : index
    %c0_60 = arith.constant 0 : index
    %c0_61 = arith.constant 0 : index
    %107 = vector.load %arg5[%c0_59, %c0_60, %c0_61] : memref<1x16x16xf32, #tpu.memory_space<vmem>>, vector<1x16x16xf32>
    %108 = vector.shape_cast %107 : vector<1x16x16xf32> to vector<16x16xf32>
    %109 = vector.shape_cast %106 : vector<16x16xf32> to vector<1x16x16xf32>
    tpu.vector_store %arg5[%c0_59, %c0_60, %c0_61], %109 {strides = array<i32>} : memref<1x16x16xf32, #tpu.memory_space<vmem>>, vector<1x16x16xf32>,
    return
  }
  func.func @transform_0(%arg0: i32) -> (i32, i32, i32) {
    %c0_i32 = arith.constant 0 : i32
    %c0_i32_0 = arith.constant 0 : i32
    %c0_i32_1 = arith.constant 0 : i32
    return %arg0, %c0_i32, %c0_i32_0 : i32, i32, i32
  }
  func.func @transform_1(%arg0: i32) -> (i32, i32, i32) {
    %c0_i32 = arith.constant 0 : i32
    %c0_i32_0 = arith.constant 0 : i32
    %c0_i32_1 = arith.constant 0 : i32
    return %arg0, %c0_i32, %c0_i32_0 : i32, i32, i32
  }
  func.func @transform_2(%arg0: i32) -> (i32, i32, i32) {
    %c0_i32 = arith.constant 0 : i32
    %c0_i32_0 = arith.constant 0 : i32
    %c0_i32_1 = arith.constant 0 : i32
    return %arg0, %c0_i32, %c0_i32_0 : i32, i32, i32
  }
  func.func @transform_3(%arg0: i32) -> (i32, i32, i32) {
    %c0_i32 = arith.constant 0 : i32
    %c0_i32_0 = arith.constant 0 : i32
    %c0_i32_1 = arith.constant 0 : i32
    return %arg0, %c0_i32, %c0_i32_0 : i32, i32, i32
  }
  func.func @transform_4(%arg0: i32) -> (i32, i32, i32) {
    %c0_i32 = arith.constant 0 : i32
    %c0_i32_0 = arith.constant 0 : i32
    %c0_i32_1 = arith.constant 0 : i32
    return %arg0, %c0_i32, %c0_i32_0 : i32, i32, i32
  }
}

module attributes {stable_mosaic.version = 11 : i64} {
  func.func @kernel(%arg0: i32, %arg1: i32, %arg2: i32, %arg3: memref<32x256xbf16, #tpu.memory_space<vmem>>, %arg4: memref<256x128xbf16, #tpu.memory_space<vmem>>, %arg5: memref<1x128xf32, #tpu.memory_space<vmem>>, %arg6: memref<32x128xbf16, #tpu.memory_space<vmem>>, %arg7: memref<1x128xf32, #tpu.memory_space<vmem>>, %arg8: memref<1x128xf32, #tpu.memory_space<vmem>>, %arg9: memref<32x128xf32, #tpu.memory_space<vmem>>, %arg10: memref<32x128xf32, #tpu.memory_space<vmem>>) attributes {dimension_semantics = [#tpu.dimension_semantics<parallel>, #tpu.dimension_semantics<parallel>, #tpu.dimension_semantics<arbitrary>], iteration_bounds = array<i64: 1, 1, 1>, scalar_prefetch = 0 : i64, scratch_operands = 1 : i64, tpu.core_type = #tpu.core_type<tc>, window_params = [{transform_indices = @transform_0, window_bounds = array<i64: 32, 256>}, {transform_indices = @transform_1, window_bounds = array<i64: 256, 128>}, {transform_indices = @transform_2, window_bounds = array<i64: 1, 128>}, {transform_indices = @transform_3, window_bounds = array<i64: 32, 128>}, {transform_indices = @transform_4, window_bounds = array<i64: 1, 128>}, {transform_indices = @transform_5, window_bounds = array<i64: 1, 128>}, {transform_indices = @transform_6, window_bounds = array<i64: 32, 128>}]} {
    %c0_i32 = arith.constant 0 : i32
    %0 = arith.cmpi eq, %arg2, %c0_i32 : i32
    %1 = arith.extui %0 : i1 to i32
    %c0_i32_0 = arith.constant 0 : i32
    %2 = arith.cmpi ne, %1, %c0_i32_0 : i32
    scf.if %2 {
      %cst_10 = arith.constant 0.000000e+00 : f32
      %12 = vector.broadcast %cst_10 : f32 to vector<32x128xf32>
      %c0_11 = arith.constant 0 : index
      %c0_12 = arith.constant 0 : index
      %13 = vector.load %arg10[%c0_11, %c0_12] : memref<32x128xf32, #tpu.memory_space<vmem>>, vector<32x128xf32>
      tpu.vector_store %arg10[%c0_11, %c0_12], %12 {strides = array<i32>} : memref<32x128xf32, #tpu.memory_space<vmem>>, vector<32x128xf32>,
    } else {
    }
    %c0 = arith.constant 0 : index
    %c0_1 = arith.constant 0 : index
    %3 = vector.load %arg10[%c0, %c0_1] : memref<32x128xf32, #tpu.memory_space<vmem>>, vector<32x128xf32>
    %c0_2 = arith.constant 0 : index
    %c0_3 = arith.constant 0 : index
    %4 = vector.load %arg3[%c0_2, %c0_3] : memref<32x256xbf16, #tpu.memory_space<vmem>>, vector<32x256xbf16>
    %c0_4 = arith.constant 0 : index
    %c0_5 = arith.constant 0 : index
    %5 = vector.load %arg4[%c0_4, %c0_5] : memref<256x128xbf16, #tpu.memory_space<vmem>>, vector<256x128xbf16>
    %cst = arith.constant dense<0.000000e+00> : vector<32x128xf32>
    %6 = tpu.matmul %4, %5, %cst {dimension_numbers = #tpu.dot_dimension_numbers<[1], [0], [0], [1], [0, 0, 1, 1], [], []>} : vector<32x256xbf16>, vector<256x128xbf16>, vector<32x128xf32> -> vector<32x128xf32>
    %7 = arith.addf %3, %6 : vector<32x128xf32>
    %c0_6 = arith.constant 0 : index
    %c0_7 = arith.constant 0 : index
    %8 = vector.load %arg10[%c0_6, %c0_7] : memref<32x128xf32, #tpu.memory_space<vmem>>, vector<32x128xf32>
    tpu.vector_store %arg10[%c0_6, %c0_7], %7 {strides = array<i32>} : memref<32x128xf32, #tpu.memory_space<vmem>>, vector<32x128xf32>,
    %c0_i32_8 = arith.constant 0 : i32
    %9 = arith.cmpi eq, %arg2, %c0_i32_8 : i32
    %10 = arith.extui %9 : i1 to i32
    %c0_i32_9 = arith.constant 0 : i32
    %11 = arith.cmpi ne, %10, %c0_i32_9 : i32
    scf.if %11 {
      %c0_10 = arith.constant 0 : index
      %c0_11 = arith.constant 0 : index
      %12 = vector.load %arg10[%c0_10, %c0_11] : memref<32x128xf32, #tpu.memory_space<vmem>>, vector<32x128xf32>
      %c0_12 = arith.constant 0 : index
      %c0_13 = arith.constant 0 : index
      %13 = vector.load %arg5[%c0_12, %c0_13] : memref<1x128xf32, #tpu.memory_space<vmem>>, vector<1x128xf32>
      %14 = vector.broadcast %13 : vector<1x128xf32> to vector<32x128xf32>
      %15 = arith.addf %12, %14 : vector<32x128xf32>
      %c0_14 = arith.constant 0 : index
      %c0_15 = arith.constant 0 : index
      %16 = vector.load %arg6[%c0_14, %c0_15] : memref<32x128xbf16, #tpu.memory_space<vmem>>, vector<32x128xbf16>
      %17 = arith.extf %16 : vector<32x128xbf16> to vector<32x128xf32>
      %18 = arith.addf %15, %17 : vector<32x128xf32>
      %cst_16 = arith.constant dense<0.000000e+00> : vector<32xf32>
      %19 = vector.multi_reduction <add>, %18, %cst_16 [1] : vector<32x128xf32> to vector<32xf32>
      %20 = vector.shape_cast %19 : vector<32xf32> to vector<32x1xf32>
      %cst_17 = arith.constant 1.280000e+02 : f32
      %21 = vector.broadcast %cst_17 : f32 to vector<32x1xf32>
      %22 = arith.divf %20, %21 : vector<32x1xf32>
      %23 = vector.broadcast %22 : vector<32x1xf32> to vector<32x128xf32>
      %24 = arith.subf %18, %23 : vector<32x128xf32>
      %25 = arith.mulf %24, %24 : vector<32x128xf32>
      %cst_18 = arith.constant dense<0.000000e+00> : vector<32xf32>
      %26 = vector.multi_reduction <add>, %25, %cst_18 [1] : vector<32x128xf32> to vector<32xf32>
      %27 = vector.shape_cast %26 : vector<32xf32> to vector<32x1xf32>
      %cst_19 = arith.constant 1.280000e+02 : f32
      %28 = vector.broadcast %cst_19 : f32 to vector<32x1xf32>
      %29 = arith.divf %27, %28 : vector<32x1xf32>
      %30 = vector.broadcast %22 : vector<32x1xf32> to vector<32x128xf32>
      %31 = arith.subf %18, %30 : vector<32x128xf32>
      %cst_20 = arith.constant 9.99999974E-6 : f32
      %32 = vector.broadcast %cst_20 : f32 to vector<32x1xf32>
      %33 = arith.addf %29, %32 : vector<32x1xf32>
      %34 = math.rsqrt %33 : vector<32x1xf32>
      %35 = vector.broadcast %34 : vector<32x1xf32> to vector<32x128xf32>
      %36 = arith.mulf %31, %35 : vector<32x128xf32>
      %c0_21 = arith.constant 0 : index
      %c0_22 = arith.constant 0 : index
      %37 = vector.load %arg7[%c0_21, %c0_22] : memref<1x128xf32, #tpu.memory_space<vmem>>, vector<1x128xf32>
      %38 = vector.broadcast %37 : vector<1x128xf32> to vector<32x128xf32>
      %39 = arith.mulf %36, %38 : vector<32x128xf32>
      %c0_23 = arith.constant 0 : index
      %c0_24 = arith.constant 0 : index
      %40 = vector.load %arg8[%c0_23, %c0_24] : memref<1x128xf32, #tpu.memory_space<vmem>>, vector<1x128xf32>
      %41 = vector.broadcast %40 : vector<1x128xf32> to vector<32x128xf32>
      %42 = arith.addf %39, %41 : vector<32x128xf32>
      %c0_25 = arith.constant 0 : index
      %c0_26 = arith.constant 0 : index
      %43 = vector.load %arg9[%c0_25, %c0_26] : memref<32x128xf32, #tpu.memory_space<vmem>>, vector<32x128xf32>
      tpu.vector_store %arg9[%c0_25, %c0_26], %42 {strides = array<i32>} : memref<32x128xf32, #tpu.memory_space<vmem>>, vector<32x128xf32>,
    } else {
    }
    return
  }
  func.func @transform_0(%arg0: i32, %arg1: i32, %arg2: i32) -> (i32, i32) {
    %c0_i32 = arith.constant 0 : i32
    return %arg0, %arg2 : i32, i32
  }
  func.func @transform_1(%arg0: i32, %arg1: i32, %arg2: i32) -> (i32, i32) {
    %c0_i32 = arith.constant 0 : i32
    return %arg2, %arg1 : i32, i32
  }
  func.func @transform_2(%arg0: i32, %arg1: i32, %arg2: i32) -> (i32, i32) {
    %c0_i32 = arith.constant 0 : i32
    %c0_i32_0 = arith.constant 0 : i32
    return %c0_i32, %arg1 : i32, i32
  }
  func.func @transform_3(%arg0: i32, %arg1: i32, %arg2: i32) -> (i32, i32) {
    %c0_i32 = arith.constant 0 : i32
    return %arg0, %arg1 : i32, i32
  }
  func.func @transform_4(%arg0: i32, %arg1: i32, %arg2: i32) -> (i32, i32) {
    %c0_i32 = arith.constant 0 : i32
    %c0_i32_0 = arith.constant 0 : i32
    return %c0_i32, %arg1 : i32, i32
  }
  func.func @transform_5(%arg0: i32, %arg1: i32, %arg2: i32) -> (i32, i32) {
    %c0_i32 = arith.constant 0 : i32
    %c0_i32_0 = arith.constant 0 : i32
    return %c0_i32, %arg1 : i32, i32
  }
  func.func @transform_6(%arg0: i32, %arg1: i32, %arg2: i32) -> (i32, i32) {
    %c0_i32 = arith.constant 0 : i32
    return %arg0, %arg1 : i32, i32
  }
}

</mosaic_0001>

<bundles_post_ra>
// kernel: decoder_layer_forward.13
= control target key start
LH: loop header
LB: loop body
LE: loop exit
PB: predicated region body
PF: predicated region fallthrough
CT: control target
= control target key end

     0   :  { %v348_v1 = vmov 0   ;;  %v229_v19 = vlaneseq  ;;  %s438_s1 = inlined_call_operand.vmem [shape: bf16[128,256], index: 1, kind: input, shape index: {}]   ;;  %s439_s0 = inlined_call_operand.vmem [shape: bf16[32,128], index: 0, kind: input, shape index: {}]   ;;  %s440_s2 = inlined_call_operand.vmem [shape: f32[1,256], index: 2, kind: input, shape index: {}]   ;;  %s441_s3 = inlined_call_operand.vmem [shape: bf16[32,256], index: 3, kind: output, shape index: {}]  }
   0x1   :  { %v322_v0 = vld [vmem:[%s438_s1 + $0x4] ss:$8 sps:$4 sm:$0xff]   ;;  %179 = vmatprep.mubr.bf16.mxu0 %v348_v1  ;;  %189 = vmatprep.mubr.bf16.mxu1 %v348_v1  ;;  %v324_v2 = vld [vmem:[%s438_s1] ss:$8 sps:$4 sm:$0xff]   ;;  %v325_v3 = vld [vmem:[%s438_s1 + $0x14] ss:$8 sps:$4 sm:$0xff]  }
   0x2   :  { %147 = vmatprep.subr.bf16.mxu0 %v322_v0  ;;  %305 = vmatprep.subr.bf16.mxu1 %v322_v0  ;;  %v327_v4 = vld [vmem:[%s438_s1 + $0x10] ss:$8 sps:$4 sm:$0xff]   ;;  %v328_v5 = vld [vmem:[%s438_s1 + $0x24] ss:$8 sps:$4 sm:$0xff]   ;;  %v330_v6 = vld [vmem:[%s438_s1 + $0x20] ss:$8 sps:$4 sm:$0xff]  }
   0x3   :  { %148 = vmatpush1.bf16.msra.mxu0 %v324_v2  ;;  %313 = vmatpush1.bf16.msra.mxu1 %v324_v2  ;;  %v331_v7 = vld [vmem:[%s438_s1 + $0x34] ss:$8 sps:$4 sm:$0xff]   ;;  %v333_v8 = vld [vmem:[%s438_s1 + $0x30] ss:$8 sps:$4 sm:$0xff]   ;;  %v334_v9 = vld [vmem:[%s438_s1 + $0x44] ss:$8 sps:$4 sm:$0xff]  }
   0x4   :  { %149 = vmatprep.subr.bf16.mxu0 %v325_v3  ;;  %306 = vmatprep.subr.bf16.mxu1 %v325_v3  ;;  %v336_v10 = vld [vmem:[%s438_s1 + $0x40] ss:$8 sps:$4 sm:$0xff]   ;;  %v337_v11 = vld [vmem:[%s438_s1 + $0x54] ss:$8 sps:$4 sm:$0xff]   ;;  %v339_v12 = vld [vmem:[%s438_s1 + $0x50] ss:$8 sps:$4 sm:$0xff]  }
   0x5   :  { %v340_v13 = vld [vmem:[%s438_s1 + $0x64] ss:$8 sps:$4 sm:$0xff]   ;;  %v342_v14 = vld [vmem:[%s438_s1 + $0x60] ss:$8 sps:$4 sm:$0xff]   ;;  %v343_v15 = vld [vmem:[%s438_s1 + $0x74] ss:$8 sps:$4 sm:$0xff]  }
   0x6   :  { %v345_v16 = vld [vmem:[%s438_s1 + $0x70] ss:$8 sps:$4 sm:$0xff]   ;;  %v346_v17 = vld [vmem:[%s439_s0] sm:$0xff]   ;;  %v347_v18 = vld [vmem:[%s439_s0 + $0x8] sm:$0xff]   ;;  %v230_v20 = vshrl.u32 %v229_v19, 7 }
   0x7   :  { %150 = vmatpush1.bf16.msra.mxu0 %v327_v4  ;;  %314 = vmatpush1.bf16.msra.mxu1 %v327_v4  ;;  %v227_v22 = vld [vmem:[%s440_s2] sm:$0x3] }
   0x8   :  { %151 = vmatprep.subr.bf16.mxu0 %v328_v5  ;;  %307 = vmatprep.subr.bf16.mxu1 %v328_v5  ;;  %v231_v21 = vsub.s32 0, %v230_v20  ;;  %v235_v23 = vsub.s32 1, %v230_v20 }
   0xa   :  { %v232_v24 = vrot.slane %v227_v22, %v231_v21  ;;  %v236_v25 = vrot.slane %v227_v22, %v235_v23 }
   0xb   :  { %152 = vmatpush1.bf16.msra.mxu0 %v330_v6  ;;  %315 = vmatpush1.bf16.msra.mxu1 %v330_v6 }
   0xc   :  { %153 = vmatprep.subr.bf16.mxu0 %v331_v7  ;;  %308 = vmatprep.subr.bf16.mxu1 %v331_v7 }
   0xf   :  { %154 = vmatpush1.bf16.msra.mxu0 %v333_v8  ;;  %316 = vmatpush1.bf16.msra.mxu1 %v333_v8 }
  0x10   :  { %155 = vmatprep.subr.bf16.mxu0 %v334_v9  ;;  %309 = vmatprep.subr.bf16.mxu1 %v334_v9 }
  0x13   :  { %156 = vmatpush1.bf16.msra.mxu0 %v336_v10  ;;  %317 = vmatpush1.bf16.msra.mxu1 %v336_v10 }
  0x14   :  { %157 = vmatprep.subr.bf16.mxu0 %v337_v11  ;;  %310 = vmatprep.subr.bf16.mxu1 %v337_v11 }
  0x17   :  { %158 = vmatpush1.bf16.msra.mxu0 %v339_v12  ;;  %318 = vmatpush1.bf16.msra.mxu1 %v339_v12 }
  0x18   :  { %159 = vmatprep.subr.bf16.mxu0 %v340_v13  ;;  %311 = vmatprep.subr.bf16.mxu1 %v340_v13 }
  0x1b   :  { %160 = vmatpush1.bf16.msra.mxu0 %v342_v14  ;;  %319 = vmatpush1.bf16.msra.mxu1 %v342_v14 }
  0x1c   :  { %161 = vmatprep.subr.bf16.mxu0 %v343_v15  ;;  %312 = vmatprep.subr.bf16.mxu1 %v343_v15 }
  0x1f   :  { %162 = vmatpush1.bf16.msra.mxu0 %v345_v16  ;;  %320 = vmatpush1.bf16.msra.mxu1 %v345_v16 }
  0x22   :  { %180 = vmatmul.mubr.bf16.vlgmr.msra.gmra.mrb[0].mxu0 %v346_v17  ;;  %190 = vmatmul.mubr.bf16.vlgmr.msra.gmra.mrb[0].mxu1 %v347_v18 }
  0xf5   :  { %v181_v26 = vpop.f32.mrb[0].mxu0  ;;  %v191_v27 = vpop.f32.mrb[0].mxu1 }
  0xf6   :  { %v239_v28 = vadd.f32 %v232_v24, %v181_v26  ;;  %v243_v29 = vadd.f32 %v232_v24, %v191_v27  ;;  %v183_v30 = vpop.f32.mrb[1].mxu0  ;;  %v193_v31 = vpop.f32.mrb[1].mxu1 }
  0xf7   :  { %v240_v32 = vadd.f32 %v236_v25, %v183_v30  ;;  %v244_v33 = vadd.f32 %v236_v25, %v193_v31  ;;  %v185_v34 = vpop.f32.mrb[2].mxu0  ;;  %v195_v35 = vpop.f32.mrb[2].mxu1 }
  0xf8   :  { %v241_v36 = vadd.f32 %v232_v24, %v185_v34  ;;  %v245_v37 = vadd.f32 %v232_v24, %v195_v35  ;;  %v187_v38 = vpop.f32.mrb[3].mxu0  ;;  %v197_v39 = vpop.f32.mrb[3].mxu1 }
  0xf9   :  { %v301_v40 = vpack.c.bf16 %v240_v32, %v239_v28  ;;  %v303_v41 = vpack.c.bf16 %v244_v33, %v243_v29  ;;  %v242_v42 = vadd.f32 %v236_v25, %v187_v38  ;;  %v246_v43 = vadd.f32 %v236_v25, %v197_v39 }
  0xfb   :  { %271 = vst [vmem:[%s441_s3] sm:$0xff] %v301_v40  ;;  %273 = vst [vmem:[%s441_s3 + $0x10] sm:$0xff] %v303_v41  ;;  %v302_v44 = vpack.c.bf16 %v242_v42, %v241_v36  ;;  %v304_v45 = vpack.c.bf16 %v246_v43, %v245_v37 }
  0xfd   :  { %272 = vst [vmem:[%s441_s3 + $0x8] sm:$0xff] %v302_v44  ;;  %274 = vst [vmem:[%s441_s3 + $0x18] sm:$0xff] %v304_v45 }

// kernel: decoder_layer_forward.11
= control target key start
LH: loop header
LB: loop body
LE: loop exit
PB: predicated region body
PF: predicated region fallthrough
CT: control target
= control target key end

     0   :  { %s469_s1 = inlined_call_operand.vmem [shape: bf16[128,128], index: 1, kind: input, shape index: {}]   ;;  %s470_s0 = inlined_call_operand.vmem [shape: bf16[32,128], index: 0, kind: input, shape index: {}]   ;;  %s471_s3 = inlined_call_operand.vmem [shape: bf16[32,128], index: 3, kind: input, shape index: {}]   ;;  %s472_s2 = inlined_call_operand.vmem [shape: f32[1,128], index: 2, kind: input, shape index: {}]   ;;  %s473_s4 = inlined_call_operand.vmem [shape: f32[1,128], index: 4, kind: input, shape index: {}]   ;;  %s474_s5 = inlined_call_operand.vmem [shape: f32[1,128], index: 5, kind: input, shape index: {}]   ;;  %s475_s6 = inlined_call_operand.vmem [shape: bf16[32,128], index: 6, kind: output, shape index: {}]  }
   0x1   :  { %v365_v0 = vld [vmem:[%s469_s1] sm:$0xff]   ;;  %v366_v1 = vld [vmem:[%s469_s1 + $0x8] sm:$0xff]   ;;  %v367_v2 = vld [vmem:[%s469_s1 + $0x10] sm:$0xff]  }
   0x2   :  { %345 = vmatprep.subr.bf16.mxu0 %v365_v0  ;;  %v368_v3 = vld [vmem:[%s469_s1 + $0x18] sm:$0xff]   ;;  %v373_v4 = vld [vmem:[%s470_s0] sm:$0xff]   ;;  %v370_v6 = vld [vmem:[%s469_s1 + $0x28] sm:$0xff]  }
   0x3   :  { %346 = vmatpush3.bf16.msra.mxu0 %v365_v0  ;;  %361 = vmatprep.mubr.bf16.mxu0 %v373_v4  ;;  %v369_v5 = vld [vmem:[%s469_s1 + $0x20] sm:$0xff]   ;;  %v371_v7 = vld [vmem:[%s469_s1 + $0x30] sm:$0xff]   ;;  %v372_v8 = vld [vmem:[%s469_s1 + $0x38] sm:$0xff]  }
   0x4   :  { %347 = vmatprep.subr.bf16.mxu0 %v366_v1  ;;  %v374_v9 = vld [vmem:[%s470_s0 + $0x8] sm:$0xff]   ;;  %v316_v11 = vld [vmem:[%s471_s3] sm:$0xff]  }
   0x5   :  { %v333_v10 = vld [vmem:[%s471_s3 + $0x8] sm:$0xff]   ;;  %v304_v12 = vld [vmem:[%s472_s2] ss:$0 sm:$0xff]  ;;  %v317_v15 = vunpack.c.l.bf16 %v316_v11  ;;  %v318_v26 = vunpack.c.h.bf16 %v316_v11 }
   0x6   :  { %v321_v13 = vunpack.c.l.bf16 %v333_v10  ;;  %v322_v23 = vunpack.c.h.bf16 %v333_v10  ;;  %v305_v59 = vld [vmem:[%s473_s4] ss:$0 sm:$0xff] }
   0x7   :  { %348 = vmatpush3.bf16.msra.mxu0 %v366_v1  ;;  %v306_v0 = vld [vmem:[%s474_s5] ss:$0 sm:$0xff] }
   0x8   :  { %349 = vmatprep.subr.bf16.mxu0 %v367_v2 }
   0xb   :  { %350 = vmatpush3.bf16.msra.mxu0 %v367_v2 }
   0xc   :  { %351 = vmatprep.subr.bf16.mxu0 %v368_v3 }
   0xf   :  { %352 = vmatpush3.bf16.msra.mxu0 %v368_v3 }
  0x10   :  { %353 = vmatprep.subr.bf16.mxu0 %v369_v5 }
  0x13   :  { %354 = vmatpush3.bf16.msra.mxu0 %v369_v5 }
  0x14   :  { %355 = vmatprep.subr.bf16.mxu0 %v370_v6 }
  0x17   :  { %356 = vmatpush3.bf16.msra.mxu0 %v370_v6 }
  0x18   :  { %357 = vmatprep.subr.bf16.mxu0 %v371_v7 }
  0x1b   :  { %358 = vmatpush3.bf16.msra.mxu0 %v371_v7 }
  0x1c   :  { %359 = vmatprep.subr.bf16.mxu0 %v372_v8 }
  0x1f   :  { %360 = vmatpush3.bf16.msra.mxu0 %v372_v8 }
  0x22   :  { %362 = vmatmul.mubr.bf16.vlgmr.msra.gmra.mrb[0].mxu0 %v374_v9 }
  0xf5   :  { %v363_v14 = vpop.f32.mrb[0].mxu0 }
  0xf6   :  { %v189_v16 = vadd.f32 %v363_v14, %v304_v12  ;;  %v150_v17 = vpop.f32.mrb[1].mxu0 }
  0xf7   :  { %v187_v18 = vadd.f32 %v304_v12, %v150_v17  ;;  %v364_v19 = vpop.f32.mrb[2].mxu0 }
  0xf8   :  { %v190_v20 = vadd.f32 %v364_v19, %v304_v12  ;;  %v153_v21 = vpop.f32.mrb[3].mxu0  ;;  %v201_v22 = vadd.f32 %v321_v13, %v189_v16 }
  0xf9   :  { %v188_v24 = vadd.f32 %v304_v12, %v153_v21  ;;  %v199_v25 = vadd.f32 %v317_v15, %v187_v18 }
  0xfa   :  { %207 = vadd.xlane.f32.xlu1 %v201_v22  ;;  %v202_v27 = vadd.f32 %v322_v23, %v190_v20 }
  0xfb   :  { %203 = vadd.xlane.f32.xlu0 %v199_v25  ;;  %v200_v28 = vadd.f32 %v318_v26, %v188_v24 }
  0xfe   :  { %209 = vadd.xlane.f32.xlu1 %v202_v27 }
  0xff   :  { %205 = vadd.xlane.f32.xlu0 %v200_v28 }
 0x187   :  { %v208_v29 = vpop.xlane.xlu1 %207 }
 0x188   :  { %v204_v30 = vpop.xlane.xlu0 %203  ;;  %v214_v31 = vmul.f32 0.0078125, %v208_v29 }
 0x189   :  { %v212_v32 = vmul.f32 0.0078125, %v204_v30 }
 0x18a   :  { %v218_v36 = vsub.f32 %v201_v22, %v214_v31 }
 0x18b   :  { %v216_v33 = vsub.f32 %v199_v25, %v212_v32  ;;  %v210_v34 = vpop.xlane.xlu1 %209 }
 0x18c   :  { %v206_v35 = vpop.xlane.xlu0 %205  ;;  %v215_v37 = vmul.f32 0.0078125, %v210_v34  ;;  %v222_v42 = vmul.f32 %v218_v36, %v218_v36 }
 0x18d   :  { %v213_v38 = vmul.f32 0.0078125, %v206_v35  ;;  %v220_v39 = vmul.f32 %v216_v33, %v216_v33 }
 0x18e   :  { %v219_v41 = vsub.f32 %v202_v27, %v215_v37 }
 0x18f   :  { %v217_v40 = vsub.f32 %v200_v28, %v213_v38  ;;  %224 = vadd.xlane.f32.xlu0 %v220_v39 }
 0x190   :  { %v223_v44 = vmul.f32 %v219_v41, %v219_v41 }
 0x191   :  { %v221_v43 = vmul.f32 %v217_v40, %v217_v40 }
 0x193   :  { %228 = vadd.xlane.f32.xlu0 %v222_v42  ;;  %226 = vadd.xlane.f32.xlu1 %v221_v43 }
 0x197   :  { %230 = vadd.xlane.f32.xlu1 %v223_v44 }
 0x21c   :  { %v225_v45 = vpop.xlane.xlu0 %224 }
 0x21d   :  { %v232_v46 = vmul.f32 0.0078125, %v225_v45 }
 0x21f   :  { %v236_v47 = vadd.f32 1e-05, %v232_v46 }
 0x220   :  { %v227_v48 = vpop.xlane.xlu1 %226  ;;  %v229_v49 = vpop.xlane.xlu0 %228 }
 0x221   :  { %375 = vrsqrt.f32 %v236_v47  ;;  %v233_v50 = vmul.f32 0.0078125, %v227_v48  ;;  %v234_v51 = vmul.f32 0.0078125, %v229_v49 }
 0x223   :  { %v237_v52 = vadd.f32 1e-05, %v233_v50  ;;  %v238_v53 = vadd.f32 1e-05, %v234_v51 }
 0x224   :  { %v231_v54 = vpop.xlane.xlu1 %230 }
 0x225   :  { %377 = vrsqrt.f32 %v237_v52  ;;  %v235_v55 = vmul.f32 0.0078125, %v231_v54 }
 0x226   :  { %379 = vrsqrt.f32 %v238_v53 }
 0x227   :  { %v239_v56 = vadd.f32 1e-05, %v235_v55 }
 0x229   :  { %381 = vrsqrt.f32 %v239_v56 }
 0x22b   :  { %v376_v57 = vpop.eup %375 }
 0x22c   :  { %v244_v58 = vmul.f32 %v376_v57, %v216_v33 }
 0x22e   :  { %v255_v62 = vmul.f32 %v305_v59, %v244_v58 }
 0x22f   :  { %v378_v60 = vpop.eup %377 }
 0x230   :  { %v380_v61 = vpop.eup %379  ;;  %v245_v63 = vmul.f32 %v378_v60, %v217_v40  ;;  %v266_v4 = vadd.f32 %v306_v0, %v255_v62 }
 0x231   :  { %v246_v1 = vmul.f32 %v380_v61, %v218_v36 }
 0x232   :  { %v256_v2 = vmul.f32 %v305_v59, %v245_v63 }
 0x233   :  { %v382_v3 = vpop.eup %381  ;;  %v257_v6 = vmul.f32 %v305_v59, %v246_v1 }
 0x234   :  { %v267_v5 = vadd.f32 %v306_v0, %v256_v2  ;;  %v247_v7 = vmul.f32 %v382_v3, %v219_v41 }
 0x235   :  { %v268_v10 = vadd.f32 %v306_v0, %v257_v6 }
 0x236   :  { %v326_v8 = vpack.c.bf16 %v267_v5, %v266_v4  ;;  %v258_v9 = vmul.f32 %v305_v59, %v247_v7 }
 0x238   :  { %327 = vst [vmem:[%s475_s6] sm:$0xff] %v326_v8   ;;  %v269_v11 = vadd.f32 %v306_v0, %v258_v9 }
 0x23a   :  { %v331_v12 = vpack.c.bf16 %v269_v11, %v268_v10 }
 0x23c   :  { %334 = vst [vmem:[%s475_s6 + $0x8] sm:$0xff] %v331_v12  }

// kernel: decoder_layer_forward.9
= control target key start
LH: loop header
LB: loop body
LE: loop exit
PB: predicated region body
PF: predicated region fallthrough
CT: control target
= control target key end

     0   :  { %v548_v1 = vmov 0   ;;  %v362_v27 = vlaneseq  ;;  %s674_s1 = inlined_call_operand.vmem [shape: bf16[128,384], index: 1, kind: input, shape index: {}]   ;;  %s675_s0 = inlined_call_operand.vmem [shape: bf16[32,128], index: 0, kind: input, shape index: {}]   ;;  %s676_s2 = inlined_call_operand.vmem [shape: f32[1,384], index: 2, kind: input, shape index: {}]   ;;  %s677_s3 = inlined_call_operand.vmem [shape: bf16[32,384], index: 3, kind: output, shape index: {}]  }
   0x1   :  { %v514_v0 = vld [vmem:[%s674_s1 + $0x4] ss:$12 sps:$4 sm:$0xff]   ;;  %251 = vmatprep.mubr.bf16.mxu0 %v548_v1  ;;  %v516_v2 = vld [vmem:[%s674_s1] ss:$12 sps:$4 sm:$0xff]   ;;  %v517_v3 = vld [vmem:[%s674_s1 + $0x1c] ss:$12 sps:$4 sm:$0xff]  }
   0x2   :  { %219 = vmatprep.subr.bf16.mxu0 %v514_v0  ;;  %v519_v4 = vld [vmem:[%s674_s1 + $0x18] ss:$12 sps:$4 sm:$0xff]   ;;  %v520_v5 = vld [vmem:[%s674_s1 + $0x8] ss:$12 sps:$4 sm:$0xff]   ;;  %v524_v7 = vld [vmem:[%s674_s1 + $0x20] ss:$12 sps:$4 sm:$0xff]  }
   0x3   :  { %220 = vmatpush1.bf16.msra.mxu0 %v516_v2  ;;  %v521_v6 = vld [vmem:[%s674_s1 + $0x34] ss:$12 sps:$4 sm:$0xff]   ;;  %493 = vmatprep.subr.bf16.mxu1 %v520_v5  ;;  %v523_v8 = vld [vmem:[%s674_s1 + $0x30] ss:$12 sps:$4 sm:$0xff]   ;;  %v525_v9 = vld [vmem:[%s674_s1 + $0x4c] ss:$12 sps:$4 sm:$0xff]  }
   0x4   :  { %221 = vmatprep.subr.bf16.mxu0 %v517_v3  ;;  %494 = vmatpush3.bf16.msra.mxu1 %v520_v5  ;;  %v528_v10 = vld [vmem:[%s674_s1 + $0x38] ss:$12 sps:$4 sm:$0xff]   ;;  %v527_v11 = vld [vmem:[%s674_s1 + $0x48] ss:$12 sps:$4 sm:$0xff]   ;;  %v532_v12 = vld [vmem:[%s674_s1 + $0x50] ss:$12 sps:$4 sm:$0xff]  }
   0x5   :  { %495 = vmatprep.subr.bf16.mxu1 %v524_v7  ;;  %v529_v13 = vld [vmem:[%s674_s1 + $0x64] ss:$12 sps:$4 sm:$0xff]   ;;  %v531_v14 = vld [vmem:[%s674_s1 + $0x60] ss:$12 sps:$4 sm:$0xff]   ;;  %v536_v15 = vld [vmem:[%s674_s1 + $0x68] ss:$12 sps:$4 sm:$0xff]  }
   0x6   :  { %v533_v16 = vld [vmem:[%s674_s1 + $0x7c] ss:$12 sps:$4 sm:$0xff]   ;;  %v535_v17 = vld [vmem:[%s674_s1 + $0x78] ss:$12 sps:$4 sm:$0xff]   ;;  %v540_v19 = vld [vmem:[%s674_s1 + $0x80] ss:$12 sps:$4 sm:$0xff]  }
   0x7   :  { %222 = vmatpush1.bf16.msra.mxu0 %v519_v4  ;;  %v545_v18 = vld [vmem:[%s675_s0] sm:$0xff]   ;;  %v539_v21 = vld [vmem:[%s674_s1 + $0x90] ss:$12 sps:$4 sm:$0xff]   ;;  %v541_v23 = vld [vmem:[%s674_s1 + $0xac] ss:$12 sps:$4 sm:$0xff]   ;;  %v363_v28 = vshrl.u32 %v362_v27, 7 }
   0x8   :  { %223 = vmatprep.subr.bf16.mxu0 %v521_v6  ;;  %496 = vmatpush3.bf16.msra.mxu1 %v524_v7  ;;  %v537_v20 = vld [vmem:[%s674_s1 + $0x94] ss:$12 sps:$4 sm:$0xff]   ;;  %v544_v22 = vld [vmem:[%s674_s1 + $0x98] ss:$12 sps:$4 sm:$0xff]   ;;  %v546_v25 = vld [vmem:[%s674_s1 + $0xb0] ss:$12 sps:$4 sm:$0xff]  }
   0x9   :  { %497 = vmatprep.subr.bf16.mxu1 %v528_v10  ;;  %509 = vmatprep.mubr.bf16.mxu1 %v545_v18  ;;  %v543_v24 = vld [vmem:[%s674_s1 + $0xa8] ss:$12 sps:$4 sm:$0xff]   ;;  %v364_v29 = vsub.s32 0, %v363_v28  ;;  %v360_v30 = vld [vmem:[%s676_s2] sm:$0x7]  ;;  %v368_v31 = vsub.s32 1, %v363_v28 }
   0xa   :  { %v547_v26 = vld [vmem:[%s675_s0 + $0x8] sm:$0xff]   ;;  %v372_v32 = vsub.s32 2, %v363_v28 }
   0xb   :  { %224 = vmatpush1.bf16.msra.mxu0 %v523_v8  ;;  %v365_v33 = vrot.slane %v360_v30, %v364_v29  ;;  %v369_v34 = vrot.slane %v360_v30, %v368_v31 }
   0xc   :  { %225 = vmatprep.subr.bf16.mxu0 %v525_v9  ;;  %498 = vmatpush3.bf16.msra.mxu1 %v528_v10  ;;  %v373_v36 = vrot.slane %v360_v30, %v372_v32 }
   0xd   :  { %499 = vmatprep.subr.bf16.mxu1 %v532_v12 }
   0xf   :  { %226 = vmatpush1.bf16.msra.mxu0 %v527_v11 }
  0x10   :  { %227 = vmatprep.subr.bf16.mxu0 %v529_v13  ;;  %500 = vmatpush3.bf16.msra.mxu1 %v532_v12 }
  0x11   :  { %501 = vmatprep.subr.bf16.mxu1 %v536_v15 }
  0x13   :  { %228 = vmatpush1.bf16.msra.mxu0 %v531_v14 }
  0x14   :  { %229 = vmatprep.subr.bf16.mxu0 %v533_v16  ;;  %502 = vmatpush3.bf16.msra.mxu1 %v536_v15 }
  0x15   :  { %503 = vmatprep.subr.bf16.mxu1 %v540_v19 }
  0x17   :  { %230 = vmatpush1.bf16.msra.mxu0 %v535_v17 }
  0x18   :  { %231 = vmatprep.subr.bf16.mxu0 %v537_v20  ;;  %504 = vmatpush3.bf16.msra.mxu1 %v540_v19 }
  0x19   :  { %505 = vmatprep.subr.bf16.mxu1 %v544_v22 }
  0x1b   :  { %232 = vmatpush1.bf16.msra.mxu0 %v539_v21 }
  0x1c   :  { %233 = vmatprep.subr.bf16.mxu0 %v541_v23  ;;  %506 = vmatpush3.bf16.msra.mxu1 %v544_v22 }
  0x1d   :  { %507 = vmatprep.subr.bf16.mxu1 %v546_v25 }
  0x1f   :  { %234 = vmatpush1.bf16.msra.mxu0 %v543_v24 }
  0x20   :  { %508 = vmatpush3.bf16.msra.mxu1 %v546_v25 }
  0x22   :  { %252 = vmatmul.mubr.bf16.vlgmr.msra.gmra.mrb[0].mxu0 %v545_v18 }
  0x23   :  { %261 = vmatprep.mubr.bf16.mxu0 %v548_v1  ;;  %510 = vmatmul.mubr.bf16.vlgmr.msra.gmra.mrb[0].mxu1 %v547_v26 }
  0x2a   :  { %262 = vmatmul.mubr.bf16.gmra.mrb[4].mxu0 %v547_v26 }
  0xf5   :  { %v253_v35 = vpop.f32.mrb[0].mxu0 }
  0xf6   :  { %v377_v37 = vadd.f32 %v365_v33, %v253_v35  ;;  %v255_v38 = vpop.f32.mrb[1].mxu0  ;;  %v511_v43 = vpop.f32.mrb[0].mxu1 }
  0xf7   :  { %v378_v39 = vadd.f32 %v369_v34, %v255_v38  ;;  %v257_v40 = vpop.f32.mrb[2].mxu0  ;;  %v385_v46 = vadd.f32 %v511_v43, %v373_v36  ;;  %v306_v47 = vpop.f32.mrb[1].mxu1 }
  0xf8   :  { %v380_v41 = vadd.f32 %v365_v33, %v257_v40  ;;  %v259_v42 = vpop.f32.mrb[3].mxu0  ;;  %v379_v48 = vadd.f32 %v373_v36, %v306_v47  ;;  %v512_v49 = vpop.f32.mrb[2].mxu1 }
  0xf9   :  { %v475_v44 = vpack.c.bf16 %v378_v39, %v377_v37  ;;  %v381_v45 = vadd.f32 %v369_v34, %v259_v42  ;;  %v480_v51 = vpack.c.bf16 %v385_v46, %v385_v46  ;;  %v388_v52 = vadd.f32 %v512_v49, %v373_v36  ;;  %v309_v53 = vpop.f32.mrb[3].mxu1 }
  0xfa   :  { %v476_v54 = vpack.c.bf16 %v379_v48, %v379_v48  ;;  %v382_v55 = vadd.f32 %v373_v36, %v309_v53 }
  0xfb   :  { %429 = vst [vmem:[%s677_s3] sm:$0xff] %v475_v44  ;;  %v477_v50 = vpack.c.bf16 %v381_v45, %v380_v41  ;;  %434 = vst [vmem:[%s677_s3 + $0x20] sm:$0xf] %v480_v51  ;;  %v482_v56 = vpack.c.bf16 %v388_v52, %v388_v52 }
  0xfc   :  { %430 = vst [vmem:[%s677_s3 + $0x8] sm:$0xf] %v476_v54  ;;  %v478_v59 = vpack.c.bf16 %v382_v55, %v382_v55 }
  0xfd   :  { %431 = vst [vmem:[%s677_s3 + $0xc] sm:$0xff] %v477_v50  ;;  %v263_v57 = vpop.f32.mrb[4].mxu0  ;;  %436 = vst [vmem:[%s677_s3 + $0x2c] sm:$0xf] %v482_v56 }
  0xfe   :  { %v383_v58 = vadd.f32 %v365_v33, %v263_v57  ;;  %v265_v60 = vpop.f32.mrb[5].mxu0  ;;  %432 = vst [vmem:[%s677_s3 + $0x14] sm:$0xf] %v478_v59 }
  0xff   :  { %v384_v61 = vadd.f32 %v369_v34, %v265_v60  ;;  %v267_v62 = vpop.f32.mrb[6].mxu0 }
 0x100   :  { %v386_v63 = vadd.f32 %v365_v33, %v267_v62  ;;  %v269_v0 = vpop.f32.mrb[7].mxu0 }
 0x101   :  { %v479_v1 = vpack.c.bf16 %v384_v61, %v383_v58  ;;  %v387_v2 = vadd.f32 %v369_v34, %v269_v0 }
 0x103   :  { %433 = vst [vmem:[%s677_s3 + $0x18] sm:$0xff] %v479_v1  ;;  %v481_v3 = vpack.c.bf16 %v387_v2, %v386_v63 }
 0x105   :  { %435 = vst [vmem:[%s677_s3 + $0x24] sm:$0xff] %v481_v3 }

// kernel: decoder_layer_forward.10
= control target key start
LH: loop header
LB: loop body
LE: loop exit
PB: predicated region body
PF: predicated region fallthrough
CT: control target
= control target key end

     0   :  { %s1019_s9 = smov 0   ;;  %s1149_s0 = inlined_call_operand.vmem [shape: bf16[2,16,384], index: 0, kind: input, shape index: {}]   ;;  %s1150_s1 = inlined_call_operand.vmem [shape: f32[16,16], index: 1, kind: input, shape index: {}]   ;;  %s1151_s2 = inlined_call_operand.vmem [shape: bf16[2,16,128], index: 2, kind: output, shape index: {}]  }
   0x1 LB: > { %s822_s10 = sadd.s32 4294967295, %s997_s9   ;;  %p826_p0 = scmp.ge.s32.totalorder %s997_s9, 1  ;;  %s997_s9 = sphi %s1019_s9, %s12_s9  }
   0x2   : > { %p112_p1 = scmp.lt.s32.totalorder %s997_s9, 3 }
   0x4   : > { %p113_p2 = pnand %p826_p0, %p112_p1 }
   0x5   : > { %p134_p3 = scmp.lt.s32.totalorder (!%p113_p2), %s822_s10, 1  ;;  %v999_v0 = vmov (!%p113_p2), 0.0   ;;  %vm1000_vm0 = vmmov (!%p113_p2), 0   ;;  %vm163_vm1 = vcmask (!%p113_p2), 261120   ;;  %v1051_v4 = vld [vmem:[%s1150_s1] sm:$0xff] (!%p113_p2)  ;;  %v1056_v6 = vld [vmem:[%s1150_s1 + $0x8] sm:$0xff] (!%p113_p2) }
   0x6   : > { %116 = sbr.rel (%p113_p2) target bundleno = 1495 (0x5d7), region = 28  ;;  %885 = vmatprep.subr.bf16.mxu0 (!%p113_p2), %v999_v0  ;;  %887 = vmatprep.mubr.msk.bf16.mxu0 (!%p113_p2), %vm1000_vm0, %v999_v0  ;;  %vm211_vm2 = vcmask (!%p113_p2), 130048   ;;  %s1001_s19 = smov (!%p113_p2), 96   ;;  %vm293_vm3 = vcmask (!%p113_p2), 257024   ;;  %vm450_vm4 = vcmask (!%p113_p2), 519424   ;;  %vm607_vm5 = vcmask (!%p113_p2), 781824  }
   0x7   : > { %891 = vmatprep.subr.bf16.mxu1 (!%p113_p2), %v999_v0  ;;  %893 = vmatprep.mubr.msk.bf16.mxu1 (!%p113_p2), %vm1000_vm0, %v999_v0  ;;  %s1002_s20 = smov (!%p113_p2), 32   ;;  %s1003_s21 = smov (!%p113_p2), 64   ;;  %vm764_vm6 = vcmask (!%p113_p2), 1044224  }
   0xd   : > { %s1153_s10 = smov (!%p134_p3, %s822_s10), 1 }
   0xe   : > { %s933_s11 = smul.u32 24, %s1153_s10  ;;  %s860_s22 = sshll.u32 %s1153_s10, 3 }
   0xf   : > { %s1097_s25 = scalar_lea.vmem %s1151_s2, %s860_s22 }
  0x10   : > { %s1039_s14 = scalar_lea.vmem %s1149_s0, %s933_s11 }
  0x11   : > { %v947_v1 = vld [vmem:[%s1039_s14 + $0x4] ss:$12 sps:$4 sm:$0xff]   ;;  %v948_v3 = vld [vmem:[%s1039_s14] ss:$12 sps:$4 sm:$0xff]   ;;  %v955_v27 = vld [vmem:[%s1039_s14 + $0x8] ss:$12 sps:$4 sm:$0xff]  }
  0x12   : > { %v168_v2 = vsel %vm163_vm1, %v947_v1, 0  ;;  %v949_v14 = vld [vmem:[%s1039_s14 + $0x4] ss:$12 sps:$4 sm:$0xff]   ;;  %v950_v26 = vld [vmem:[%s1039_s14] ss:$12 sps:$4 sm:$0xff]   ;;  %892 = vmatpush3.bf16.msra.mxu1 %v955_v27 }
  0x13   : > { %886 = vmatpush3.bf16.xpose.msra.mxu0 %v168_v2  ;;  %v952_v15 = vld [vmem:[%s1039_s14 + $0x4] ss:$12 sps:$4 sm:$0xff]   ;;  %897 = vmatprep.subr.bf16.mxu1 %v999_v0  ;;  %v953_v29 = vld [vmem:[%s1039_s14] ss:$12 sps:$4 sm:$0xff]  }
  0x14   : > { %903 = vmatprep.subr.bf16.mxu0 %v999_v0  ;;  %v951_v28 = vld [vmem:[%s1039_s14 + $0x4] ss:$12 sps:$4 sm:$0xff]   ;;  %v954_v30 = vld [vmem:[%s1039_s14] ss:$12 sps:$4 sm:$0xff]  }
  0x1a   : > { %888 = vmatmul.mubr.msk.bf16.vlgmr.msra.gmra.mrb[0].mxu0 %vm163_vm1, %v948_v3 }
  0x1b   : > { %905 = vmatprep.mubr.msk.bf16.mxu0 %vm1000_vm0, %v999_v0 }
  0xed   : > { %v204_v5 = vpop.f32.mrb[0].mxu0 }
  0xee   : > { %v205_v7 = vadd.f32 %v204_v5, %v1051_v4  ;;  %v889_v8 = vpop.f32.mrb[1].mxu0 }
  0xef   : > { %v207_v9 = vpop.f32.mrb[2].mxu0 }
  0xf0   : > { %v208_v10 = vadd.f32 %v207_v9, %v1056_v6  ;;  %v890_v11 = vpop.f32.mrb[3].mxu0  ;;  %v212_v12 = vsel %vm211_vm2, %v205_v7, -inf }
  0xf1   : > { %213 = vmax.xlane.f32.xlu0 %v212_v12 }
  0xf2   : > { %v215_v13 = vsel %vm211_vm2, %v208_v10, -inf }
  0xf5   : > { %216 = vmax.xlane.f32.xlu0 %v215_v13 }
 0x10b   : > { %314 = vrot.lane.b32.xlu0 %v949_v14, %s1001_s19 }
 0x10f   : > { %628 = vrot.lane.b32.xlu0 %v952_v15, %s1002_s20 }
 0x17e   : > { %v214_v16 = vpop.xlane.xlu0 %213 }
 0x17f   : > { %v218_v17 = vsub.f32 %v205_v7, %v214_v16 }
 0x181   : > { %v220_v18 = vmul.f32 1.442695, %v218_v17 }
 0x182   : > { %v217_v19 = vpop.xlane.xlu0 %216 }
 0x183   : > { %959 = vpow2.f32 %v220_v18  ;;  %v219_v20 = vsub.f32 %v208_v10, %v217_v19 }
 0x185   : > { %v222_v21 = vmul.f32 1.442695, %v219_v20 }
 0x186   : > { %v315_v35 = vpop.permute.xlu0 %314 }
 0x187   : > { %961 = vpow2.f32 %v222_v21  ;;  %v320_v39 = vsel %vm163_vm1, %v315_v35, 0 }
 0x18a   : > { %v629_v43 = vpop.permute.xlu0 %628 }
 0x18b   : > { %v634_v45 = vsel %vm163_vm1, %v629_v43, 0 }
 0x18d   : > { %v960_v22 = vpop.eup %959 }
 0x18e   : > { %v224_v23 = vsel %vm211_vm2, %v960_v22, 0.0 }
 0x18f   : > { %225 = vadd.xlane.f32.xlu1 %v224_v23 }
 0x191   : > { %v962_v24 = vpop.eup %961 }
 0x192   : > { %v227_v25 = vsel %vm211_vm2, %v962_v24, 0.0 }
 0x193   : > { %228 = vadd.xlane.f32.xlu1 %v227_v25 }
 0x1a4   : > { %307 = vrot.lane.b32.xlu1 %v950_v26, %s1001_s19 }
 0x1a8   : > { %471 = vrot.lane.b32.xlu1 %v951_v28, %s1003_s21 }
 0x1ac   : > { %464 = vrot.lane.b32.xlu1 %v953_v29, %s1003_s21 }
 0x1b0   : > { %621 = vrot.lane.b32.xlu1 %v954_v30, %s1002_s20 }
 0x21c   : > { %v226_v31 = vpop.xlane.xlu1 %225 }
 0x21d   : > { %963 = vrcp.f32 %v226_v31 }
 0x220   : > { %v229_v32 = vpop.xlane.xlu1 %228 }
 0x221   : > { %965 = vrcp.f32 %v229_v32 }
 0x224   : > { %v308_v38 = vpop.permute.xlu1 %307 }
 0x227   : > { %v964_v33 = vpop.eup %963 }
 0x228   : > { %v232_v36 = vmul.f32 %v964_v33, %v960_v22  ;;  %v472_v41 = vpop.permute.xlu1 %471 }
 0x229   : > { %v477_v42 = vsel %vm163_vm1, %v472_v41, 0 }
 0x22b   : > { %v966_v34 = vpop.eup %965 }
 0x22c   : > { %v233_v37 = vmul.f32 %v966_v34, %v962_v24  ;;  %v465_v44 = vpop.permute.xlu1 %464 }
 0x22e   : > { %v234_v40 = vpack.c.bf16 %v233_v37, %v232_v36 }
 0x230   : > { %894 = vmatmul.mubr.msk.bf16.vlgmr.msra.gmra.mrb[0].mxu1 %vm211_vm2, %v234_v40  ;;  %v622_v46 = vpop.permute.xlu1 %621  ;;  %v957_v40 = vld [vmem:[%s1039_s14 + $0x8] ss:$12 sps:$4 sm:$0xff]  }
 0x231   : > { %898 = vmatpush3.bf16.xpose.msra.mxu1 %v320_v39  ;;  %899 = vmatprep.mubr.msk.bf16.mxu1 %vm1000_vm0, %v999_v0  ;;  %v956_v39 = vld [vmem:[%s1039_s14 + $0x8] ss:$12 sps:$4 sm:$0xff]  }
 0x232   : > { %909 = vmatprep.subr.bf16.mxu1 %v999_v0 }
 0x238   : > { %900 = vmatmul.mubr.msk.bf16.vlgmr.msra.gmra.mrb[4].mxu1 %vm163_vm1, %v308_v38 }
 0x239   : > { %910 = vmatpush3.bf16.xpose.msra.mxu1 %v477_v42  ;;  %911 = vmatprep.mubr.msk.bf16.mxu1 %vm1000_vm0, %v999_v0 }
 0x23a   : > { %921 = vmatprep.subr.bf16.mxu1 %v999_v0 }
 0x240   : > { %912 = vmatmul.mubr.msk.bf16.vlgmr.msra.gmra.mrb[8].mxu1 %vm163_vm1, %v465_v44 }
 0x241   : > { %922 = vmatpush3.bf16.xpose.msra.mxu1 %v634_v45  ;;  %923 = vmatprep.mubr.msk.bf16.mxu1 %vm1000_vm0, %v999_v0 }
 0x248   : > { %924 = vmatmul.mubr.msk.bf16.vlgmr.msra.gmra.mrb[12].mxu1 %vm163_vm1, %v622_v46  ;;  %v958_v46 = vld [vmem:[%s1039_s14 + $0x8] ss:$12 sps:$4 sm:$0xff]  }
 0x303   : > { %v278_v47 = vpop.f32.mrb[0].mxu1 }
 0x304   : > { %v861_v48 = vpack.c.bf16 %v278_v47, %v278_v47  ;;  %v895_v49 = vpop.f32.mrb[1].mxu1 }
 0x305   : > { %v281_v50 = vpop.f32.mrb[2].mxu1 }
 0x306   : > { %294 = vst.msk [vmem:[%s1097_s25] sm:$0xf] %vm293_vm3, %v861_v48  ;;  %v862_v51 = vpack.c.bf16 %v281_v50, %v281_v50  ;;  %v896_v52 = vpop.f32.mrb[3].mxu1 }
 0x308   : > { %295 = vst.msk [vmem:[%s1097_s25 + $0x4] sm:$0xf] %vm293_vm3, %v862_v51 }
 0x30b   : > { %v356_v53 = vpop.f32.mrb[4].mxu1 }
 0x30c   : > { %v357_v54 = vadd.f32 %v356_v53, %v1051_v4  ;;  %v901_v55 = vpop.f32.mrb[5].mxu1 }
 0x30d   : > { %v359_v56 = vpop.f32.mrb[6].mxu1 }
 0x30e   : > { %v360_v57 = vadd.f32 %v359_v56, %v1056_v6  ;;  %v902_v58 = vpop.f32.mrb[7].mxu1  ;;  %v363_v59 = vsel %vm211_vm2, %v357_v54, -inf }
 0x30f   : > { %364 = vmax.xlane.f32.xlu0 %v363_v59 }
 0x310   : > { %v366_v60 = vsel %vm211_vm2, %v360_v57, -inf }
 0x311   : > { %367 = vmax.xlane.f32.xlu1 %v366_v60 }
 0x313   : > { %v513_v61 = vpop.f32.mrb[8].mxu1 }
 0x314   : > { %v514_v62 = vadd.f32 %v513_v61, %v1051_v4  ;;  %v913_v63 = vpop.f32.mrb[9].mxu1 }
 0x315   : > { %v516_v1 = vpop.f32.mrb[10].mxu1 }
 0x316   : > { %v517_v2 = vadd.f32 %v516_v1, %v1056_v6  ;;  %v914_v3 = vpop.f32.mrb[11].mxu1  ;;  %v520_v5 = vsel %vm211_vm2, %v514_v62, -inf }
 0x317   : > { %521 = vmax.xlane.f32.xlu0 %v520_v5 }
 0x318   : > { %v523_v7 = vsel %vm211_vm2, %v517_v2, -inf }
 0x31b   : > { %524 = vmax.xlane.f32.xlu0 %v523_v7  ;;  %v670_v8 = vpop.f32.mrb[12].mxu1 }
 0x31c   : > { %v671_v9 = vadd.f32 %v670_v8, %v1051_v4  ;;  %v925_v10 = vpop.f32.mrb[13].mxu1 }
 0x31d   : > { %v673_v11 = vpop.f32.mrb[14].mxu1 }
 0x31e   : > { %v674_v12 = vadd.f32 %v673_v11, %v1056_v6  ;;  %v677_v13 = vsel %vm211_vm2, %v671_v9, -inf  ;;  %v926_v14 = vpop.f32.mrb[15].mxu1 }
 0x31f   : > { %678 = vmax.xlane.f32.xlu0 %v677_v13 }
 0x320   : > { %v680_v15 = vsel %vm211_vm2, %v674_v12, -inf }
 0x321   : > { %681 = vmax.xlane.f32.xlu1 %v680_v15 }
 0x39c   : > { %v365_v16 = vpop.xlane.xlu0 %364 }
 0x39d   : > { %v369_v17 = vsub.f32 %v357_v54, %v365_v16 }
 0x39e   : > { %v368_v18 = vpop.xlane.xlu1 %367 }
 0x39f   : > { %v371_v19 = vmul.f32 1.442695, %v369_v17  ;;  %v370_v20 = vsub.f32 %v360_v57, %v368_v18 }
 0x3a1   : > { %967 = vpow2.f32 %v371_v19  ;;  %v373_v21 = vmul.f32 1.442695, %v370_v20 }
 0x3a3   : > { %969 = vpow2.f32 %v373_v21 }
 0x3a4   : > { %v522_v4 = vpop.xlane.xlu0 %521 }
 0x3a5   : > { %v526_v22 = vsub.f32 %v514_v62, %v522_v4 }
 0x3a7   : > { %v528_v23 = vmul.f32 1.442695, %v526_v22 }
 0x3a8   : > { %v525_v24 = vpop.xlane.xlu0 %524 }
 0x3a9   : > { %971 = vpow2.f32 %v528_v23  ;;  %v527_v6 = vsub.f32 %v517_v2, %v525_v24 }
 0x3ab   : > { %v968_v25 = vpop.eup %967  ;;  %v530_v26 = vmul.f32 1.442695, %v527_v6 }
 0x3ac   : > { %v679_v27 = vpop.xlane.xlu0 %678  ;;  %v375_v28 = vsel %vm211_vm2, %v968_v25, 0.0 }
 0x3ad   : > { %v970_v29 = vpop.eup %969  ;;  %973 = vpow2.f32 %v530_v26  ;;  %v683_v30 = vsub.f32 %v671_v9, %v679_v27  ;;  %376 = vadd.xlane.f32.xlu0 %v375_v28 }
 0x3ae   : > { %v378_v31 = vsel %vm211_vm2, %v970_v29, 0.0  ;;  %v682_v41 = vpop.xlane.xlu1 %681 }
 0x3af   : > { %v685_v32 = vmul.f32 1.442695, %v683_v30  ;;  %379 = vadd.xlane.f32.xlu1 %v378_v31  ;;  %v684_v42 = vsub.f32 %v674_v12, %v682_v41 }
 0x3b1   : > { %975 = vpow2.f32 %v685_v32  ;;  %v687_v43 = vmul.f32 1.442695, %v684_v42 }
 0x3b3   : > { %v972_v33 = vpop.eup %971  ;;  %977 = vpow2.f32 %v687_v43 }
 0x3b4   : > { %v532_v34 = vsel %vm211_vm2, %v972_v33, 0.0 }
 0x3b5   : > { %533 = vadd.xlane.f32.xlu0 %v532_v34 }
 0x3b7   : > { %v974_v35 = vpop.eup %973 }
 0x3b8   : > { %v535_v36 = vsel %vm211_vm2, %v974_v35, 0.0 }
 0x3b9   : > { %536 = vadd.xlane.f32.xlu1 %v535_v36 }
 0x3bb   : > { %v976_v37 = vpop.eup %975 }
 0x3bc   : > { %v689_v38 = vsel %vm211_vm2, %v976_v37, 0.0 }
 0x3bd   : > { %690 = vadd.xlane.f32.xlu0 %v689_v38  ;;  %v978_v44 = vpop.eup %977 }
 0x3be   : > { %v692_v45 = vsel %vm211_vm2, %v978_v44, 0.0 }
 0x3ca   : > { %548 = vrot.lane.b32.xlu1 %v956_v39, %s1003_s21 }
 0x3d3   : > { %391 = vrot.lane.b32.xlu0 %v957_v40, %s1001_s19 }
 0x3ee   : > { %693 = vadd.xlane.f32.xlu1 %v692_v45 }
 0x3ff   : > { %705 = vrot.lane.b32.xlu1 %v958_v46, %s1002_s20 }
 0x43a   : > { %v377_v48 = vpop.xlane.xlu0 %376 }
 0x43c   : > { %v380_v47 = vpop.xlane.xlu1 %379 }
 0x43d   : > { %979 = vrcp.f32 %v380_v47 }
 0x43e   : > { %981 = vrcp.f32 %v377_v48 }
 0x442   : > { %v534_v49 = vpop.xlane.xlu0 %533 }
 0x446   : > { %v537_v50 = vpop.xlane.xlu1 %536 }
 0x447   : > { %983 = vrcp.f32 %v537_v50  ;;  %v980_v51 = vpop.eup %979 }
 0x448   : > { %985 = vrcp.f32 %v534_v49  ;;  %v982_v53 = vpop.eup %981  ;;  %v384_v54 = vmul.f32 %v980_v51, %v970_v29 }
 0x449   : > { %v383_v55 = vmul.f32 %v982_v53, %v968_v25 }
 0x44a   : > { %v691_v52 = vpop.xlane.xlu0 %690  ;;  %v549_v59 = vpop.permute.xlu1 %548 }
 0x44b   : > { %v385_v57 = vpack.c.bf16 %v384_v54, %v383_v55  ;;  %987 = vrcp.f32 %v691_v52 }
 0x44e   : > { %v392_v56 = vpop.permute.xlu0 %391 }
 0x44f   : > { %904 = vmatpush3.bf16.msra.mxu0 %v392_v56 }
 0x450   : > { %915 = vmatprep.subr.bf16.mxu0 %v999_v0 }
 0x451   : > { %v984_v58 = vpop.eup %983 }
 0x452   : > { %906 = vmatmul.mubr.msk.bf16.vlgmr.msra.gmra.mrb[4].mxu0 %vm211_vm2, %v385_v57  ;;  %v986_v60 = vpop.eup %985  ;;  %v541_v61 = vmul.f32 %v984_v58, %v974_v35 }
 0x453   : > { %916 = vmatpush3.bf16.msra.mxu0 %v549_v59  ;;  %917 = vmatprep.mubr.msk.bf16.mxu0 %vm1000_vm0, %v999_v0  ;;  %v540_v62 = vmul.f32 %v986_v60, %v972_v33 }
 0x454   : > { %927 = vmatprep.subr.bf16.mxu0 %v999_v0 }
 0x455   : > { %v542_v63 = vpack.c.bf16 %v541_v61, %v540_v62  ;;  %v988_v3 = vpop.eup %987 }
 0x456   : > { %v697_v7 = vmul.f32 %v988_v3, %v976_v37 }
 0x45a   : > { %918 = vmatmul.mubr.msk.bf16.vlgmr.msra.gmra.mrb[8].mxu0 %vm211_vm2, %v542_v63 }
 0x45b   : > { %929 = vmatprep.mubr.msk.bf16.mxu0 %vm1000_vm0, %v999_v0 }
 0x47b   : > { %v694_v1 = vpop.xlane.xlu1 %693 }
 0x47c   : > { %989 = vrcp.f32 %v694_v1 }
 0x47f   : > { %v706_v2 = vpop.permute.xlu1 %705 }
 0x480   : > { %928 = vmatpush3.bf16.msra.mxu0 %v706_v2 }
 0x486   : > { %v990_v5 = vpop.eup %989 }
 0x487   : > { %v698_v8 = vmul.f32 %v990_v5, %v978_v44 }
 0x489   : > { %v699_v9 = vpack.c.bf16 %v698_v8, %v697_v7 }
 0x48b   : > { %930 = vmatmul.mubr.msk.bf16.vlgmr.msra.gmra.mrb[12].mxu0 %vm211_vm2, %v699_v9 }
 0x525   : > { %v431_v10 = vpop.f32.mrb[4].mxu0 }
 0x526   : > { %v863_v11 = vpack.c.bf16 %v431_v10, %v431_v10  ;;  %v907_v12 = vpop.f32.mrb[5].mxu0 }
 0x527   : > { %v434_v13 = vpop.f32.mrb[6].mxu0 }
 0x528   : > { %v864_v14 = vpack.c.bf16 %v434_v13, %v434_v13  ;;  %444 = vrot.lane.b32.xlu1 %v863_v11, %s1002_s20  ;;  %v908_v0 = vpop.f32.mrb[7].mxu0 }
 0x52a   : > { %446 = vrot.lane.b32.xlu0 %v864_v14, %s1002_s20 }
 0x52d   : > { %v588_v15 = vpop.f32.mrb[8].mxu0 }
 0x52e   : > { %v865_v16 = vpack.c.bf16 %v588_v15, %v588_v15  ;;  %v919_v17 = vpop.f32.mrb[9].mxu0 }
 0x52f   : > { %v591_v18 = vpop.f32.mrb[10].mxu0 }
 0x530   : > { %v866_v19 = vpack.c.bf16 %v591_v18, %v591_v18  ;;  %601 = vrot.lane.b32.xlu1 %v865_v16, %s1003_s21  ;;  %v920_v20 = vpop.f32.mrb[11].mxu0 }
 0x532   : > { %603 = vrot.lane.b32.xlu0 %v866_v19, %s1003_s21 }
 0x55e   : > { %v745_v21 = vpop.f32.mrb[12].mxu0 }
 0x55f   : > { %v867_v4 = vpack.c.bf16 %v745_v21, %v745_v21  ;;  %v931_v22 = vpop.f32.mrb[13].mxu0 }
 0x560   : > { %v748_v23 = vpop.f32.mrb[14].mxu0 }
 0x561   : > { %v868_v24 = vpack.c.bf16 %v748_v23, %v748_v23  ;;  %758 = vrot.lane.b32.xlu1 %v867_v4, %s1001_s19  ;;  %v932_v6 = vpop.f32.mrb[15].mxu0 }
 0x563   : > { %760 = vrot.lane.b32.xlu0 %v868_v24, %s1001_s19 }
 0x59a   : > { %v445_v25 = vpop.permute.xlu1 %444 }
 0x59b   : > { %451 = vst.msk [vmem:[%s1097_s25] sm:$0xf] %vm450_vm4, %v445_v25 }
 0x59c   : > { %v447_v26 = vpop.permute.xlu0 %446 }
 0x59d   : > { %452 = vst.msk [vmem:[%s1097_s25 + $0x4] sm:$0xf] %vm450_vm4, %v447_v26 }
 0x5a2   : > { %v602_v27 = vpop.permute.xlu1 %601 }
 0x5a3   : > { %608 = vst.msk [vmem:[%s1097_s25] sm:$0xf] %vm607_vm5, %v602_v27 }
 0x5a4   : > { %v604_v28 = vpop.permute.xlu0 %603 }
 0x5a5   : > { %609 = vst.msk [vmem:[%s1097_s25 + $0x4] sm:$0xf] %vm607_vm5, %v604_v28 }
 0x5d3   : > { %v759_v29 = vpop.permute.xlu1 %758 }
 0x5d4   : > { %765 = vst.msk [vmem:[%s1097_s25] sm:$0xf] %vm764_vm6, %v759_v29 }
 0x5d5   : > { %v761_v30 = vpop.permute.xlu0 %760 }
 0x5d6   : > { %766 = vst.msk [vmem:[%s1097_s25 + $0x4] sm:$0xf] %vm764_vm6, %v761_v30 }
 0x5d7 PF: > { %s12_s9 = sadd.s32 1, %s997_s9  }
 0x5d8   : > { %p9_p4 = scmp.ge.s32.totalorder %s12_s9, 4  }
 0x5da   :  { %11 = sbr.rel (!%p9_p4) target bundleno = 1 (0x1), region = 58 }

// kernel: decoder_layer_forward.12
= control target key start
LH: loop header
LB: loop body
LE: loop exit
PB: predicated region body
PF: predicated region fallthrough
CT: control target
= control target key end

     0   :  { %s335_s1 = inlined_call_operand.vmem [shape: bf16[128,128], index: 1, kind: input, shape index: {}]   ;;  %s336_s0 = inlined_call_operand.vmem [shape: bf16[32,128], index: 0, kind: input, shape index: {}]   ;;  %s337_s2 = inlined_call_operand.vmem [shape: f32[1,128], index: 2, kind: input, shape index: {}]   ;;  %s338_s3 = inlined_call_operand.vmem [shape: bf16[32,128], index: 3, kind: output, shape index: {}]  }
   0x1   :  { %v266_v0 = vld [vmem:[%s335_s1] sm:$0xff]   ;;  %v267_v1 = vld [vmem:[%s335_s1 + $0x8] sm:$0xff]   ;;  %v268_v2 = vld [vmem:[%s335_s1 + $0x10] sm:$0xff]  }
   0x2   :  { %246 = vmatprep.subr.bf16.mxu0 %v266_v0  ;;  %v269_v3 = vld [vmem:[%s335_s1 + $0x18] sm:$0xff]   ;;  %v274_v4 = vld [vmem:[%s336_s0] sm:$0xff]   ;;  %v271_v6 = vld [vmem:[%s335_s1 + $0x28] sm:$0xff]  }
   0x3   :  { %247 = vmatpush3.bf16.msra.mxu0 %v266_v0  ;;  %262 = vmatprep.mubr.bf16.mxu0 %v274_v4  ;;  %v270_v5 = vld [vmem:[%s335_s1 + $0x20] sm:$0xff]   ;;  %v272_v7 = vld [vmem:[%s335_s1 + $0x30] sm:$0xff]   ;;  %v273_v8 = vld [vmem:[%s335_s1 + $0x38] sm:$0xff]  }
   0x4   :  { %248 = vmatprep.subr.bf16.mxu0 %v267_v1  ;;  %v275_v9 = vld [vmem:[%s336_s0 + $0x8] sm:$0xff]   ;;  %v216_v11 = vld [vmem:[%s337_s2] ss:$0 sm:$0xff] }
   0x7   :  { %249 = vmatpush3.bf16.msra.mxu0 %v267_v1 }
   0x8   :  { %250 = vmatprep.subr.bf16.mxu0 %v268_v2 }
   0xb   :  { %251 = vmatpush3.bf16.msra.mxu0 %v268_v2 }
   0xc   :  { %252 = vmatprep.subr.bf16.mxu0 %v269_v3 }
   0xf   :  { %253 = vmatpush3.bf16.msra.mxu0 %v269_v3 }
  0x10   :  { %254 = vmatprep.subr.bf16.mxu0 %v270_v5 }
  0x13   :  { %255 = vmatpush3.bf16.msra.mxu0 %v270_v5 }
  0x14   :  { %256 = vmatprep.subr.bf16.mxu0 %v271_v6 }
  0x17   :  { %257 = vmatpush3.bf16.msra.mxu0 %v271_v6 }
  0x18   :  { %258 = vmatprep.subr.bf16.mxu0 %v272_v7 }
  0x1b   :  { %259 = vmatpush3.bf16.msra.mxu0 %v272_v7 }
  0x1c   :  { %260 = vmatprep.subr.bf16.mxu0 %v273_v8 }
  0x1f   :  { %261 = vmatpush3.bf16.msra.mxu0 %v273_v8 }
  0x22   :  { %263 = vmatmul.mubr.bf16.vlgmr.msra.gmra.mrb[0].mxu0 %v275_v9 }
  0xf5   :  { %v264_v10 = vpop.f32.mrb[0].mxu0 }
  0xf6   :  { %v141_v12 = vpop.f32.mrb[1].mxu0  ;;  %v180_v14 = vadd.f32 %v264_v10, %v216_v11 }
  0xf7   :  { %v265_v13 = vpop.f32.mrb[2].mxu0  ;;  %v178_v17 = vadd.f32 %v216_v11, %v141_v12 }
  0xf8   :  { %v181_v15 = vadd.f32 %v265_v13, %v216_v11  ;;  %v144_v16 = vpop.f32.mrb[3].mxu0 }
  0xf9   :  { %v179_v18 = vadd.f32 %v216_v11, %v144_v16 }
  0xfa   :  { %v233_v19 = vpack.c.bf16 %v181_v15, %v180_v14 }
  0xfb   :  { %v228_v20 = vpack.c.bf16 %v179_v18, %v178_v17 }
  0xfc   :  { %235 = vst [vmem:[%s338_s3 + $0x8] sm:$0xff] %v233_v19  }
  0xfd   :  { %229 = vst [vmem:[%s338_s3] sm:$0xff] %v228_v20  }

// kernel: decoder_layer_forward.16
= control target key start
LH: loop header
LB: loop body
LE: loop exit
PB: predicated region body
PF: predicated region fallthrough
CT: control target
= control target key end

     0   :  { %v356_v1 = vmov 0   ;;  %v229_v19 = vlaneseq  ;;  %s446_s1 = inlined_call_operand.vmem [shape: bf16[128,256], index: 1, kind: input, shape index: {}]   ;;  %s447_s0 = inlined_call_operand.vmem [shape: bf16[32,128], index: 0, kind: input, shape index: {}]   ;;  %s448_s2 = inlined_call_operand.vmem [shape: f32[1,256], index: 2, kind: input, shape index: {}]   ;;  %s449_s3 = inlined_call_operand.vmem [shape: bf16[32,256], index: 3, kind: output, shape index: {}]  }
   0x1   :  { %v330_v0 = vld [vmem:[%s446_s1 + $0x4] ss:$8 sps:$4 sm:$0xff]   ;;  %179 = vmatprep.mubr.bf16.mxu0 %v356_v1  ;;  %189 = vmatprep.mubr.bf16.mxu1 %v356_v1  ;;  %v332_v2 = vld [vmem:[%s446_s1] ss:$8 sps:$4 sm:$0xff]   ;;  %v333_v3 = vld [vmem:[%s446_s1 + $0x14] ss:$8 sps:$4 sm:$0xff]  }
   0x2   :  { %147 = vmatprep.subr.bf16.mxu0 %v330_v0  ;;  %313 = vmatprep.subr.bf16.mxu1 %v330_v0  ;;  %v335_v4 = vld [vmem:[%s446_s1 + $0x10] ss:$8 sps:$4 sm:$0xff]   ;;  %v336_v5 = vld [vmem:[%s446_s1 + $0x24] ss:$8 sps:$4 sm:$0xff]   ;;  %v338_v6 = vld [vmem:[%s446_s1 + $0x20] ss:$8 sps:$4 sm:$0xff]  }
   0x3   :  { %148 = vmatpush1.bf16.msra.mxu0 %v332_v2  ;;  %321 = vmatpush1.bf16.msra.mxu1 %v332_v2  ;;  %v339_v7 = vld [vmem:[%s446_s1 + $0x34] ss:$8 sps:$4 sm:$0xff]   ;;  %v341_v8 = vld [vmem:[%s446_s1 + $0x30] ss:$8 sps:$4 sm:$0xff]   ;;  %v342_v9 = vld [vmem:[%s446_s1 + $0x44] ss:$8 sps:$4 sm:$0xff]  }
   0x4   :  { %149 = vmatprep.subr.bf16.mxu0 %v333_v3  ;;  %314 = vmatprep.subr.bf16.mxu1 %v333_v3  ;;  %v344_v10 = vld [vmem:[%s446_s1 + $0x40] ss:$8 sps:$4 sm:$0xff]   ;;  %v345_v11 = vld [vmem:[%s446_s1 + $0x54] ss:$8 sps:$4 sm:$0xff]   ;;  %v347_v12 = vld [vmem:[%s446_s1 + $0x50] ss:$8 sps:$4 sm:$0xff]  }
   0x5   :  { %v348_v13 = vld [vmem:[%s446_s1 + $0x64] ss:$8 sps:$4 sm:$0xff]   ;;  %v350_v14 = vld [vmem:[%s446_s1 + $0x60] ss:$8 sps:$4 sm:$0xff]   ;;  %v351_v15 = vld [vmem:[%s446_s1 + $0x74] ss:$8 sps:$4 sm:$0xff]  }
   0x6   :  { %v353_v16 = vld [vmem:[%s446_s1 + $0x70] ss:$8 sps:$4 sm:$0xff]   ;;  %v354_v17 = vld [vmem:[%s447_s0] sm:$0xff]   ;;  %v355_v18 = vld [vmem:[%s447_s0 + $0x8] sm:$0xff]   ;;  %v230_v20 = vshrl.u32 %v229_v19, 7 }
   0x7   :  { %150 = vmatpush1.bf16.msra.mxu0 %v335_v4  ;;  %322 = vmatpush1.bf16.msra.mxu1 %v335_v4  ;;  %v227_v22 = vld [vmem:[%s448_s2] sm:$0x3] }
   0x8   :  { %151 = vmatprep.subr.bf16.mxu0 %v336_v5  ;;  %315 = vmatprep.subr.bf16.mxu1 %v336_v5  ;;  %v231_v21 = vsub.s32 0, %v230_v20  ;;  %v235_v23 = vsub.s32 1, %v230_v20 }
   0xa   :  { %v232_v24 = vrot.slane %v227_v22, %v231_v21  ;;  %v236_v25 = vrot.slane %v227_v22, %v235_v23 }
   0xb   :  { %152 = vmatpush1.bf16.msra.mxu0 %v338_v6  ;;  %323 = vmatpush1.bf16.msra.mxu1 %v338_v6 }
   0xc   :  { %153 = vmatprep.subr.bf16.mxu0 %v339_v7  ;;  %316 = vmatprep.subr.bf16.mxu1 %v339_v7 }
   0xf   :  { %154 = vmatpush1.bf16.msra.mxu0 %v341_v8  ;;  %324 = vmatpush1.bf16.msra.mxu1 %v341_v8 }
  0x10   :  { %155 = vmatprep.subr.bf16.mxu0 %v342_v9  ;;  %317 = vmatprep.subr.bf16.mxu1 %v342_v9 }
  0x13   :  { %156 = vmatpush1.bf16.msra.mxu0 %v344_v10  ;;  %325 = vmatpush1.bf16.msra.mxu1 %v344_v10 }
  0x14   :  { %157 = vmatprep.subr.bf16.mxu0 %v345_v11  ;;  %318 = vmatprep.subr.bf16.mxu1 %v345_v11 }
  0x17   :  { %158 = vmatpush1.bf16.msra.mxu0 %v347_v12  ;;  %326 = vmatpush1.bf16.msra.mxu1 %v347_v12 }
  0x18   :  { %159 = vmatprep.subr.bf16.mxu0 %v348_v13  ;;  %319 = vmatprep.subr.bf16.mxu1 %v348_v13 }
  0x1b   :  { %160 = vmatpush1.bf16.msra.mxu0 %v350_v14  ;;  %327 = vmatpush1.bf16.msra.mxu1 %v350_v14 }
  0x1c   :  { %161 = vmatprep.subr.bf16.mxu0 %v351_v15  ;;  %320 = vmatprep.subr.bf16.mxu1 %v351_v15 }
  0x1f   :  { %162 = vmatpush1.bf16.msra.mxu0 %v353_v16  ;;  %328 = vmatpush1.bf16.msra.mxu1 %v353_v16 }
  0x22   :  { %180 = vmatmul.mubr.bf16.vlgmr.msra.gmra.mrb[0].mxu0 %v354_v17  ;;  %190 = vmatmul.mubr.bf16.vlgmr.msra.gmra.mrb[0].mxu1 %v355_v18 }
  0xf5   :  { %v181_v26 = vpop.f32.mrb[0].mxu0  ;;  %v191_v27 = vpop.f32.mrb[0].mxu1 }
  0xf6   :  { %v239_v28 = vadd.f32 %v232_v24, %v181_v26  ;;  %v243_v29 = vadd.f32 %v232_v24, %v191_v27  ;;  %v183_v30 = vpop.f32.mrb[1].mxu0  ;;  %v193_v31 = vpop.f32.mrb[1].mxu1 }
  0xf7   :  { %v240_v32 = vadd.f32 %v236_v25, %v183_v30  ;;  %v244_v33 = vadd.f32 %v236_v25, %v193_v31  ;;  %v185_v34 = vpop.f32.mrb[2].mxu0  ;;  %v195_v35 = vpop.f32.mrb[2].mxu1 }
  0xf8   :  { %v247_v36 = vmax.f32 %v239_v28, 0.0  ;;  %v251_v37 = vmax.f32 %v243_v29, 0.0  ;;  %v241_v38 = vadd.f32 %v232_v24, %v185_v34  ;;  %v245_v39 = vadd.f32 %v232_v24, %v195_v35  ;;  %v187_v40 = vpop.f32.mrb[3].mxu0  ;;  %v197_v41 = vpop.f32.mrb[3].mxu1 }
  0xf9   :  { %v248_v42 = vmax.f32 %v240_v32, 0.0  ;;  %v252_v43 = vmax.f32 %v244_v33, 0.0  ;;  %v242_v44 = vadd.f32 %v236_v25, %v187_v40  ;;  %v246_v45 = vadd.f32 %v236_v25, %v197_v41 }
  0xfa   :  { %v249_v46 = vmax.f32 %v241_v38, 0.0  ;;  %v253_v47 = vmax.f32 %v245_v39, 0.0 }
  0xfb   :  { %v309_v48 = vpack.c.bf16 %v248_v42, %v247_v36  ;;  %v311_v49 = vpack.c.bf16 %v252_v43, %v251_v37  ;;  %v250_v50 = vmax.f32 %v242_v44, 0.0  ;;  %v254_v51 = vmax.f32 %v246_v45, 0.0 }
  0xfd   :  { %279 = vst [vmem:[%s449_s3] sm:$0xff] %v309_v48  ;;  %281 = vst [vmem:[%s449_s3 + $0x10] sm:$0xff] %v311_v49  ;;  %v310_v52 = vpack.c.bf16 %v250_v50, %v249_v46  ;;  %v312_v53 = vpack.c.bf16 %v254_v51, %v253_v47 }
  0xff   :  { %280 = vst [vmem:[%s449_s3 + $0x8] sm:$0xff] %v310_v52  ;;  %282 = vst [vmem:[%s449_s3 + $0x18] sm:$0xff] %v312_v53 }

// kernel: decoder_layer_forward.14
= control target key start
LH: loop header
LB: loop body
LE: loop exit
PB: predicated region body
PF: predicated region fallthrough
CT: control target
= control target key end

     0   :  { %10 = vsyncpa [#allocation3], 0  ;;  %s1562_s0 = inlined_call_operand.vmem [shape: bf16[2,16,128], index: 0, kind: input, shape index: {}]   ;;  %s1563_s1 = inlined_call_operand.vmem [shape: bf16[2,16,256], index: 1, kind: input, shape index: {}]   ;;  %s1564_s2 = inlined_call_operand.vmem [shape: f32[2,1,16], index: 2, kind: input, shape index: {}]   ;;  %s1565_s3 = inlined_call_operand.vmem [shape: bf16[2,16,128], index: 3, kind: output, shape index: {0}]   ;;  %s1566_s4 = inlined_call_operand.hbm [shape: f32[2,16,16], index: 4, kind: output, shape index: {1}]  }
   0x1   :  { %12 = vsyncpa [#allocation3 + $0x1], 0  ;;  %s1319_s15 = smov 0   ;;  %s1321_s16 = smov 0  }
   0x2   :  { %s1323_s17 = smov 0   ;;  %s1325_s18 = smov 0  }
   0x3 LB: > { %s1340_s19 = sadd.s32 4294967295, %s1284_s18   ;;  %s1011_s20 = sadd.s32 4294967294, %s1284_s18   ;;  %s1284_s18 = sphi %s1325_s18, %s1572_s18   ;;  %s1280_s17 = sphi %s1323_s17, %s1571_s17   ;;  %s1276_s16 = sphi %s1321_s16, %s1570_s16   ;;  %s1272_s15 = sphi %s1319_s15, %s1569_s15  }
   0x4   : > { %s1344_s21 = sadd.s32 1, %s1284_s18   ;;  %s129_s22 = sadd.s32 1, %s1280_s17 }
   0x5   : > { %s126_s23 = ssub.s32 %s1284_s18, %s1344_s21  ;;  %p139_p0 = scmp.ne.s32.totalorder %s1280_s17, %s1276_s16 }
   0x6   : > { %p127_p1 = scmp.eq.s32.totalorder %s126_s23, 0  ;;  %p140_p2 = scmp.eq.s32.totalorder %s1340_s19, 1 }
   0x7   : > { %p145_p3 = scmp.ne.s32.totalorder %s1276_s16, %s1272_s15  ;;  %p146_p4 = scmp.eq.s32.totalorder %s1011_s20, 1 }
   0x8   : > { %s1355_s24 = scalar_select %p127_p1, %s1280_s17, %s129_s22  }
   0x9   : > { %p1357_p5 = por %p140_p2, %p139_p0  ;;  %p1361_p6 = por %p146_p4, %p145_p3 }
   0xa   : > { %p1014_p7 = scmp.ge.s32.totalorder %s1284_s18, 1  ;;  %p186_p8 = scmp.lt.s32.totalorder %s1284_s18, 3 }
   0xc   : > { %p187_p9 = pnand %p1014_p7, %p186_p8 }
   0xd   : > { %p225_p10 = scmp.lt.s32.totalorder (!%p187_p9), %s1340_s19, 1  ;;  %v1286_v0 = vmov (!%p187_p9), 0.0   ;;  %vm1287_vm0 = vmmov (!%p187_p9), 0   ;;  %vm267_vm1 = vcmask (!%p187_p9), 261120   ;;  %vm315_vm2 = vcmask (!%p187_p9), 130048   ;;  %s1288_s13 = smov (!%p187_p9), 96  }
   0xe   : > { %190 = sbr.rel (%p187_p9) target bundleno = 1503 (0x5df), region = 32  ;;  %1084 = vmatprep.subr.bf16.mxu0 (!%p187_p9), %v1286_v0  ;;  %1086 = vmatprep.mubr.msk.bf16.mxu0 (!%p187_p9), %vm1287_vm0, %v1286_v0  ;;  %s1289_s14 = smov (!%p187_p9), 32   ;;  %vm397_vm3 = vcmask (!%p187_p9), 257024  }
   0xf   : > { %1090 = vmatprep.subr.bf16.mxu1 (!%p187_p9), %v1286_v0  ;;  %1092 = vmatprep.mubr.msk.bf16.mxu1 (!%p187_p9), %vm1287_vm0, %v1286_v0  ;;  %s1290_s20 = smov (!%p187_p9), 64   ;;  %s1067_s5 = sshll.u32 (!%p187_p9), %s1340_s19, 8 }
  0x15   : > { %s1372_s27 = scalar_select %p225_p10, %s1340_s19, 1 }
  0x16   : > { %s1291_s19 = smov [#allocation2]  }
  0x17   : > { %s1057_s28 = sshll.u32 %s1372_s27, 4  ;;  %s1056_s29 = sshll.u32 %s1372_s27, 3 }
  0x18   : > { %s1382_s6 = scalar_lea.vmem %s1563_s1, %s1057_s28  ;;  %s1390_s9 = scalar_lea.vmem %s1562_s0, %s1056_s29 }
  0x19   : > { %v1178_v1 = vld [vmem:[%s1382_s6] ss:$8 sps:$4 sm:$0xff]   ;;  %s237_s12 = scalar_lea.vmem %s1564_s2, %s1372_s27  ;;  %v1186_v26 = vld [vmem:[%s1382_s6 + $0x4] ss:$8 sps:$4 sm:$0xff]   ;;  %s1450_s28 = scalar_lea.vmem %s1565_s3, %s1056_s29 }
  0x1a   : > { %v272_v2 = vsel %vm267_vm1, %v1178_v1, 0  ;;  %v1179_v3 = vld [vmem:[%s1390_s9] sm:$0xff]   ;;  %1091 = vmatpush3.bf16.msra.mxu1 %v1186_v26  ;;  %s222_s27 = sand.u32 1, %s1276_s16  }
  0x1b   : > { %1085 = vmatpush3.bf16.xpose.msra.mxu0 %v272_v2  ;;  %v1402_v4 = vld [vmem:[%s237_s12] ss:$0 sm:$0xff]  ;;  %1096 = vmatprep.subr.bf16.mxu1 %v1286_v0  ;;  %s1015_s29 = sshll.u32 %s222_s27, 4  ;;  %s1513_s10 = scalar_lea.sflag [#allocation3], %s222_s27 }
  0x1c   : > { %1102 = vmatprep.subr.bf16.mxu0 %v1286_v0  ;;  %v1180_v13 = vld [vmem:[%s1382_s6] ss:$8 sps:$4 sm:$0xff]   ;;  %s1490_s30 = scalar_lea.vmem [#allocation2], %s1015_s29  ;;  %s1226_s12 = sshll.u32 %s1291_s19, 4  ;;  %s1227_s12 = int_to_ptr.vmem [resolvable:$false] %s1226_s12 }
  0x1d   : > { %v1183_v14 = vld [vmem:[%s1382_s6] ss:$8 sps:$4 sm:$0xff]  }
  0x1e   : > { %v1181_v25 = vld [vmem:[%s1390_s9] sm:$0xff]  }
  0x1f   : > { %v1182_v27 = vld [vmem:[%s1382_s6] ss:$8 sps:$4 sm:$0xff]  }
  0x20   : > { %v1184_v28 = vld [vmem:[%s1390_s9] sm:$0xff]  }
  0x21   : > { %v1185_v29 = vld [vmem:[%s1390_s9] sm:$0xff]   ;;  %s1507_s9 = scalar_lea.hbm %s1566_s4, %s1067_s5 }
  0x22   : > { %1087 = vmatmul.mubr.msk.bf16.vlgmr.msra.gmra.mrb[0].mxu0 %vm267_vm1, %v1179_v3 }
  0x23   : > { %1104 = vmatprep.mubr.msk.bf16.mxu0 %vm1287_vm0, %v1286_v0 }
  0xf5   : > { %v308_v5 = vpop.f32.mrb[0].mxu0 }
  0xf6   : > { %v309_v6 = vadd.f32 %v1402_v4, %v308_v5  ;;  %v1088_v7 = vpop.f32.mrb[1].mxu0 }
  0xf7   : > { %v311_v8 = vpop.f32.mrb[2].mxu0 }
  0xf8   : > { %v312_v9 = vadd.f32 %v1402_v4, %v311_v8  ;;  %v1089_v10 = vpop.f32.mrb[3].mxu0  ;;  %v316_v11 = vsel %vm315_vm2, %v309_v6, -inf }
  0xf9   : > { %317 = vmax.xlane.f32.xlu0 %v316_v11 }
  0xfa   : > { %v319_v12 = vsel %vm315_vm2, %v312_v9, -inf }
  0xfd   : > { %320 = vmax.xlane.f32.xlu0 %v319_v12 }
 0x113   : > { %418 = vrot.lane.b32.xlu0 %v1180_v13, %s1288_s13 }
 0x117   : > { %736 = vrot.lane.b32.xlu0 %v1183_v14, %s1289_s14 }
 0x186   : > { %v318_v15 = vpop.xlane.xlu0 %317 }
 0x187   : > { %v322_v16 = vsub.f32 %v309_v6, %v318_v15 }
 0x189   : > { %v324_v17 = vmul.f32 1.442695, %v322_v16 }
 0x18a   : > { %v321_v18 = vpop.xlane.xlu0 %320 }
 0x18b   : > { %1190 = vpow2.f32 %v324_v17  ;;  %v323_v19 = vsub.f32 %v312_v9, %v321_v18 }
 0x18d   : > { %v326_v20 = vmul.f32 1.442695, %v323_v19 }
 0x18e   : > { %v419_v34 = vpop.permute.xlu0 %418 }
 0x18f   : > { %1192 = vpow2.f32 %v326_v20  ;;  %v424_v38 = vsel %vm267_vm1, %v419_v34, 0 }
 0x192   : > { %v737_v42 = vpop.permute.xlu0 %736 }
 0x193   : > { %v742_v44 = vsel %vm267_vm1, %v737_v42, 0 }
 0x195   : > { %v1191_v21 = vpop.eup %1190 }
 0x196   : > { %v328_v22 = vsel %vm315_vm2, %v1191_v21, 0.0 }
 0x197   : > { %329 = vadd.xlane.f32.xlu1 %v328_v22 }
 0x199   : > { %v1193_v23 = vpop.eup %1192 }
 0x19a   : > { %v331_v24 = vsel %vm315_vm2, %v1193_v23, 0.0 }
 0x19b   : > { %332 = vadd.xlane.f32.xlu1 %v331_v24 }
 0x1ac   : > { %411 = vrot.lane.b32.xlu1 %v1181_v25, %s1288_s13 }
 0x1b0   : > { %577 = vrot.lane.b32.xlu1 %v1182_v27, %s1290_s20 }
 0x1b4   : > { %570 = vrot.lane.b32.xlu1 %v1184_v28, %s1290_s20 }
 0x1b8   : > { %729 = vrot.lane.b32.xlu1 %v1185_v29, %s1289_s14 }
 0x224   : > { %v330_v30 = vpop.xlane.xlu1 %329 }
 0x225   : > { %1194 = vrcp.f32 %v330_v30 }
 0x228   : > { %v333_v31 = vpop.xlane.xlu1 %332 }
 0x229   : > { %1196 = vrcp.f32 %v333_v31 }
 0x22c   : > { %v412_v37 = vpop.permute.xlu1 %411 }
 0x22f   : > { %v1195_v32 = vpop.eup %1194 }
 0x230   : > { %v1424_v35 = vmul.f32 %v1195_v32, %v1191_v21  ;;  %v578_v40 = vpop.permute.xlu1 %577 }
 0x231   : > { %v583_v41 = vsel %vm267_vm1, %v578_v40, 0  ;;  %v1187_v40 = vld [vmem:[%s1382_s6 + $0x4] ss:$8 sps:$4 sm:$0xff]  }
 0x233   : > { %v1197_v33 = vpop.eup %1196 }
 0x234   : > { %v1426_v36 = vmul.f32 %v1197_v33, %v1193_v23  ;;  %v571_v43 = vpop.permute.xlu1 %570 }
 0x236   : > { %v338_v39 = vpack.c.bf16 %v1426_v36, %v1424_v35 }
 0x238   : > { %1093 = vmatmul.mubr.msk.bf16.vlgmr.msra.gmra.mrb[0].mxu1 %vm315_vm2, %v338_v39  ;;  %v730_v45 = vpop.permute.xlu1 %729 }
 0x239   : > { %1097 = vmatpush3.bf16.xpose.msra.mxu1 %v424_v38  ;;  %1098 = vmatprep.mubr.msk.bf16.mxu1 %vm1287_vm0, %v1286_v0 }
 0x23a   : > { %1108 = vmatprep.subr.bf16.mxu1 %v1286_v0 }
 0x240   : > { %1099 = vmatmul.mubr.msk.bf16.vlgmr.msra.gmra.mrb[4].mxu1 %vm267_vm1, %v412_v37 }
 0x241   : > { %1109 = vmatpush3.bf16.xpose.msra.mxu1 %v583_v41  ;;  %1110 = vmatprep.mubr.msk.bf16.mxu1 %vm1287_vm0, %v1286_v0  ;;  %v1188_v41 = vld [vmem:[%s1382_s6 + $0x4] ss:$8 sps:$4 sm:$0xff]  }
 0x242   : > { %1120 = vmatprep.subr.bf16.mxu1 %v1286_v0 }
 0x248   : > { %1111 = vmatmul.mubr.msk.bf16.vlgmr.msra.gmra.mrb[8].mxu1 %vm267_vm1, %v571_v43 }
 0x249   : > { %1121 = vmatpush3.bf16.xpose.msra.mxu1 %v742_v44  ;;  %1122 = vmatprep.mubr.msk.bf16.mxu1 %vm1287_vm0, %v1286_v0 }
 0x250   : > { %1123 = vmatmul.mubr.msk.bf16.vlgmr.msra.gmra.mrb[12].mxu1 %vm267_vm1, %v730_v45 }
 0x30b   : > { %v382_v46 = vpop.f32.mrb[0].mxu1 }
 0x30c   : > { %v1059_v47 = vpack.c.bf16 %v382_v46, %v382_v46  ;;  %v1094_v48 = vpop.f32.mrb[1].mxu1 }
 0x30d   : > { %v385_v49 = vpop.f32.mrb[2].mxu1 }
 0x30e   : > { %398 = vst.msk [vmem:[%s1450_s28] sm:$0xf] %vm397_vm3, %v1059_v47  ;;  %v1060_v50 = vpack.c.bf16 %v385_v49, %v385_v49  ;;  %v1095_v51 = vpop.f32.mrb[3].mxu1  ;;  %v1189_v47 = vld [vmem:[%s1382_s6 + $0x4] ss:$8 sps:$4 sm:$0xff]   ;;  %s903_s6 = sshll.u32 %s1490_s30, 4  ;;  %s1509_s6 = int_to_ptr.vmem [resolvable:$true] %s903_s6 }
 0x30f   : > { %s1222_s11 = scalar_lea.vmem %s1509_s6, 256  ;;  %p1229_p0 = scmp.lt.s32.totalorder %s1509_s6, %s1227_s12 }
 0x310   : > { %399 = vst.msk [vmem:[%s1450_s28 + $0x4] sm:$0xf] %vm397_vm3, %v1060_v50  ;;  %p1223_p11 = scmp.ne.s32.totalorder %s1509_s6, %s1222_s11 }
 0x312   : > { %p1224_p12 = pnand %p1223_p11, %p1357_p5 }
 0x313   : > { %v460_v52 = vpop.f32.mrb[4].mxu1 }
 0x314   : > { %v461_v53 = vadd.f32 %v1402_v4, %v460_v52  ;;  %v1100_v54 = vpop.f32.mrb[5].mxu1  ;;  %p1225_p13 = pneg %p1224_p12 }
 0x315   : > { %v463_v55 = vpop.f32.mrb[6].mxu1 }
 0x316   : > { %v464_v56 = vadd.f32 %v1402_v4, %v463_v55  ;;  %v1101_v57 = vpop.f32.mrb[7].mxu1  ;;  %v467_v58 = vsel %vm315_vm2, %v461_v53, -inf }
 0x317   : > { %468 = vmax.xlane.f32.xlu0 %v467_v58 }
 0x318   : > { %v470_v59 = vsel %vm315_vm2, %v464_v56, -inf }
 0x319   : > { %471 = vmax.xlane.f32.xlu1 %v470_v59 }
 0x31b   : > { %v619_v60 = vpop.f32.mrb[8].mxu1 }
 0x31c   : > { %v620_v61 = vadd.f32 %v1402_v4, %v619_v60  ;;  %v1112_v62 = vpop.f32.mrb[9].mxu1 }
 0x31d   : > { %v622_v63 = vpop.f32.mrb[10].mxu1 }
 0x31e   : > { %v623_v1 = vadd.f32 %v1402_v4, %v622_v63  ;;  %v1113_v2 = vpop.f32.mrb[11].mxu1  ;;  %v626_v3 = vsel %vm315_vm2, %v620_v61, -inf }
 0x31f   : > { %627 = vmax.xlane.f32.xlu0 %v626_v3 }
 0x320   : > { %v629_v5 = vsel %vm315_vm2, %v623_v1, -inf }
 0x323   : > { %630 = vmax.xlane.f32.xlu0 %v629_v5  ;;  %v778_v6 = vpop.f32.mrb[12].mxu1 }
 0x324   : > { %v779_v7 = vadd.f32 %v1402_v4, %v778_v6  ;;  %v1124_v8 = vpop.f32.mrb[13].mxu1 }
 0x325   : > { %v781_v9 = vpop.f32.mrb[14].mxu1 }
 0x326   : > { %v782_v10 = vadd.f32 %v1402_v4, %v781_v9  ;;  %v785_v11 = vsel %vm315_vm2, %v779_v7, -inf  ;;  %v1125_v12 = vpop.f32.mrb[15].mxu1 }
 0x327   : > { %786 = vmax.xlane.f32.xlu0 %v785_v11 }
 0x328   : > { %v788_v13 = vsel %vm315_vm2, %v782_v10, -inf }
 0x329   : > { %789 = vmax.xlane.f32.xlu1 %v788_v13 }
 0x3a4   : > { %v469_v14 = vpop.xlane.xlu0 %468 }
 0x3a5   : > { %v473_v15 = vsub.f32 %v461_v53, %v469_v14 }
 0x3a6   : > { %v472_v16 = vpop.xlane.xlu1 %471 }
 0x3a7   : > { %v475_v17 = vmul.f32 1.442695, %v473_v15  ;;  %v474_v18 = vsub.f32 %v464_v56, %v472_v16 }
 0x3a9   : > { %1198 = vpow2.f32 %v475_v17  ;;  %v477_v19 = vmul.f32 1.442695, %v474_v18 }
 0x3ab   : > { %1200 = vpow2.f32 %v477_v19 }
 0x3ac   : > { %v628_v20 = vpop.xlane.xlu0 %627 }
 0x3ad   : > { %v632_v21 = vsub.f32 %v620_v61, %v628_v20 }
 0x3af   : > { %v634_v22 = vmul.f32 1.442695, %v632_v21 }
 0x3b0   : > { %v631_v23 = vpop.xlane.xlu0 %630 }
 0x3b1   : > { %1202 = vpow2.f32 %v634_v22  ;;  %v633_v4 = vsub.f32 %v623_v1, %v631_v23 }
 0x3b3   : > { %v1199_v24 = vpop.eup %1198  ;;  %v636_v25 = vmul.f32 1.442695, %v633_v4 }
 0x3b4   : > { %v787_v26 = vpop.xlane.xlu0 %786  ;;  %v479_v27 = vsel %vm315_vm2, %v1199_v24, 0.0 }
 0x3b5   : > { %v1201_v28 = vpop.eup %1200  ;;  %1204 = vpow2.f32 %v636_v25  ;;  %v791_v29 = vsub.f32 %v779_v7, %v787_v26  ;;  %480 = vadd.xlane.f32.xlu0 %v479_v27 }
 0x3b6   : > { %v482_v30 = vsel %vm315_vm2, %v1201_v28, 0.0  ;;  %v790_v42 = vpop.xlane.xlu1 %789 }
 0x3b7   : > { %v793_v31 = vmul.f32 1.442695, %v791_v29  ;;  %483 = vadd.xlane.f32.xlu1 %v482_v30  ;;  %v792_v43 = vsub.f32 %v782_v10, %v790_v42 }
 0x3b9   : > { %1206 = vpow2.f32 %v793_v31  ;;  %v795_v44 = vmul.f32 1.442695, %v792_v43 }
 0x3bb   : > { %v1203_v32 = vpop.eup %1202  ;;  %1208 = vpow2.f32 %v795_v44 }
 0x3bc   : > { %v638_v33 = vsel %vm315_vm2, %v1203_v32, 0.0 }
 0x3bd   : > { %639 = vadd.xlane.f32.xlu0 %v638_v33 }
 0x3bf   : > { %v1205_v34 = vpop.eup %1204 }
 0x3c0   : > { %v641_v37 = vsel %vm315_vm2, %v1205_v34, 0.0 }
 0x3c1   : > { %642 = vadd.xlane.f32.xlu1 %v641_v37 }
 0x3c3   : > { %v1207_v38 = vpop.eup %1206 }
 0x3c4   : > { %v797_v39 = vsel %vm315_vm2, %v1207_v38, 0.0 }
 0x3c5   : > { %798 = vadd.xlane.f32.xlu0 %v797_v39  ;;  %v1209_v45 = vpop.eup %1208 }
 0x3c6   : > { %v800_v46 = vsel %vm315_vm2, %v1209_v45, 0.0 }
 0x3d2   : > { %654 = vrot.lane.b32.xlu1 %v1187_v40, %s1290_s20 }
 0x3db   : > { %495 = vrot.lane.b32.xlu0 %v1188_v41, %s1288_s13 }
 0x3f6   : > { %801 = vadd.xlane.f32.xlu1 %v800_v46 }
 0x407   : > { %813 = vrot.lane.b32.xlu1 %v1189_v47, %s1289_s14 }
 0x442   : > { %v481_v49 = vpop.xlane.xlu0 %480 }
 0x444   : > { %v484_v48 = vpop.xlane.xlu1 %483 }
 0x445   : > { %1210 = vrcp.f32 %v484_v48 }
 0x446   : > { %1212 = vrcp.f32 %v481_v49 }
 0x44a   : > { %v640_v50 = vpop.xlane.xlu0 %639 }
 0x44b   : > { %1214 = vrcp.f32 %v640_v50 }
 0x44e   : > { %v643_v51 = vpop.xlane.xlu1 %642 }
 0x44f   : > { %1216 = vrcp.f32 %v643_v51  ;;  %v1211_v52 = vpop.eup %1210 }
 0x450   : > { %v1213_v54 = vpop.eup %1212  ;;  %v488_v55 = vmul.f32 %v1211_v52, %v1201_v28 }
 0x451   : > { %v487_v56 = vmul.f32 %v1213_v54, %v1199_v24 }
 0x452   : > { %v799_v53 = vpop.xlane.xlu0 %798  ;;  %v655_v62 = vpop.permute.xlu1 %654  ;;  %v558_v10 = vadd.f32 %v488_v55, %v1426_v36 }
 0x453   : > { %1218 = vrcp.f32 %v799_v53  ;;  %v489_v59 = vpack.c.bf16 %v488_v55, %v487_v56  ;;  %v557_v63 = vadd.f32 %v487_v56, %v1424_v35 }
 0x455   : > { %v1215_v58 = vpop.eup %1214 }
 0x456   : > { %v496_v57 = vpop.permute.xlu0 %495  ;;  %v646_v61 = vmul.f32 %v1215_v58, %v1203_v32 }
 0x457   : > { %1103 = vmatpush3.bf16.msra.mxu0 %v496_v57 }
 0x458   : > { %1114 = vmatprep.subr.bf16.mxu0 %v1286_v0  ;;  %v716_v3 = vadd.f32 %v646_v61, %v557_v63 }
 0x459   : > { %v1217_v60 = vpop.eup %1216 }
 0x45a   : > { %1105 = vmatmul.mubr.msk.bf16.vlgmr.msra.gmra.mrb[4].mxu0 %vm315_vm2, %v489_v59  ;;  %v647_v1 = vmul.f32 %v1217_v60, %v1205_v34 }
 0x45b   : > { %1115 = vmatpush3.bf16.msra.mxu0 %v655_v62  ;;  %1116 = vmatprep.mubr.msk.bf16.mxu0 %vm1287_vm0, %v1286_v0 }
 0x45c   : > { %1126 = vmatprep.subr.bf16.mxu0 %v1286_v0  ;;  %v648_v7 = vpack.c.bf16 %v647_v1, %v646_v61  ;;  %v717_v12 = vadd.f32 %v647_v1, %v558_v10 }
 0x45d   : > { %v1219_v2 = vpop.eup %1218 }
 0x45e   : > { %v805_v5 = vmul.f32 %v1219_v2, %v1207_v38 }
 0x460   : > { %v875_v6 = vadd.f32 %v805_v5, %v716_v3 }
 0x462   : > { %v877_v8 = vmul.f32 0.25, %v875_v6  ;;  %1117 = vmatmul.mubr.msk.bf16.vlgmr.msra.gmra.mrb[8].mxu0 %vm315_vm2, %v648_v7 }
 0x463   : > { %1128 = vmatprep.mubr.msk.bf16.mxu0 %vm1287_vm0, %v1286_v0 }
 0x464   : > { %879 = vst.msk [vmem:[%s1490_s30] sm:$0xff] %vm315_vm2, %v877_v8 }
 0x483   : > { %v802_v35 = vpop.xlane.xlu1 %801 }
 0x484   : > { %1220 = vrcp.f32 %v802_v35 }
 0x487   : > { %v814_v9 = vpop.permute.xlu1 %813 }
 0x488   : > { %1127 = vmatpush3.bf16.msra.mxu0 %v814_v9 }
 0x48e   : > { %v1221_v11 = vpop.eup %1220 }
 0x48f   : > { %v806_v13 = vmul.f32 %v1221_v11, %v1209_v45 }
 0x491   : > { %v876_v14 = vadd.f32 %v806_v13, %v717_v12  ;;  %v807_v15 = vpack.c.bf16 %v806_v13, %v805_v5 }
 0x493   : > { %v878_v16 = vmul.f32 0.25, %v876_v14  ;;  %1129 = vmatmul.mubr.msk.bf16.vlgmr.msra.gmra.mrb[12].mxu0 %vm315_vm2, %v807_v15 }
 0x495   : > { %880 = vst.msk [vmem:[%s1490_s30 + $0x8] sm:$0xff] %vm315_vm2, %v878_v16 }
 0x52d   : > { %v535_v0 = vpop.f32.mrb[4].mxu0 }
 0x52e   : > { %v1061_v17 = vpack.c.bf16 %v535_v0, %v535_v0  ;;  %v1106_v18 = vpop.f32.mrb[5].mxu0 }
 0x52f   : > { %v538_v19 = vpop.f32.mrb[6].mxu0 }
 0x530   : > { %v1062_v20 = vpack.c.bf16 %v538_v19, %v538_v19  ;;  %548 = vrot.lane.b32.xlu1 %v1061_v17, %s1289_s14  ;;  %v1107_v36 = vpop.f32.mrb[7].mxu0 }
 0x532   : > { %550 = vrot.lane.b32.xlu0 %v1062_v20, %s1289_s14  ;;  %s1228_s14 = scalar_lea.vmem %s1227_s12, 512 }
 0x533   : > { %p1230_p1 = scmp.lt.s32.totalorder %s1228_s14, %s1222_s11 }
 0x535   : > { %v694_v21 = vpop.f32.mrb[8].mxu0  ;;  %p1231_p2 = por %p1230_p1, %p1229_p0 }
 0x536   : > { %v1063_v22 = vpack.c.bf16 %v694_v21, %v694_v21  ;;  %v1118_v23 = vpop.f32.mrb[9].mxu0 }
 0x537   : > { %v697_v4 = vpop.f32.mrb[10].mxu0  ;;  %p1232_p3 = pnand %p1231_p2, %p1225_p13 }
 0x538   : > { %v1064_v24 = vpack.c.bf16 %v697_v4, %v697_v4  ;;  %707 = vrot.lane.b32.xlu1 %v1063_v22, %s1290_s20  ;;  %v1119_v25 = vpop.f32.mrb[11].mxu0 }
 0x53a   : > { %709 = vrot.lane.b32.xlu0 %v1064_v24, %s1290_s20 }
 0x53b   : > { %1235 = shalt.err (!%p1232_p3)
}
 0x53c   : > { %s1236_s20 = scalar_lea.hbm %s1507_s9, 256  ;;  %s1240_s27 = scalar_lea.hbm %s1566_s4, 512 }
 0x53d   : > { %p1237_p4 = scmp.ne.s32.totalorder %s1507_s9, %s1236_s20  ;;  %p1241_p9 = scmp.lt.u32.totalorder %s1507_s9, %s1566_s4 }
 0x53e   : > { %p1242_p10 = scmp.lt.u32.totalorder %s1240_s27, %s1236_s20  ;;  %p1244_p12 = scmp.lt.u32.totalorder %s1236_s20, %s1507_s9 }
 0x53f   : > { %p1238_p7 = pnand %p1237_p4, %p1357_p5 }
 0x540   : > { %p1243_p11 = por %p1242_p10, %p1241_p9 }
 0x541   : > { %p1239_p8 = pneg %p1238_p7 }
 0x542   : > { %p1245_p13 = por %p1244_p12, %p1243_p11 }
 0x544   : > { %p1246_p0 = pnand %p1245_p13, %p1239_p8 }
 0x546   : > { %1249 = shalt.err (!%p1246_p0)
}
 0x547   : > { %s1292_s5 = smov 128   ;;  %s1293_s7 = smov 8   ;;  %vm554_vm4 = vcmask 519424   ;;  %vm713_vm5 = vcmask 781824   ;;  %vm872_vm6 = vcmask 1044224  }
 0x548   : > { %1132 = dma.vmem_to_hbm [thread:$0]  (%p1357_p5), %s1509_s6, 256, %s1507_s9, %s1513_s10, %s1292_s5, %s1292_s5, %s1293_s7  }
 0x566   : > { %v853_v26 = vpop.f32.mrb[12].mxu0 }
 0x567   : > { %v1065_v27 = vpack.c.bf16 %v853_v26, %v853_v26  ;;  %v1130_v28 = vpop.f32.mrb[13].mxu0 }
 0x568   : > { %v856_v29 = vpop.f32.mrb[14].mxu0 }
 0x569   : > { %v1066_v30 = vpack.c.bf16 %v856_v29, %v856_v29  ;;  %866 = vrot.lane.b32.xlu1 %v1065_v27, %s1288_s13  ;;  %v1131_v31 = vpop.f32.mrb[15].mxu0 }
 0x56b   : > { %868 = vrot.lane.b32.xlu0 %v1066_v30, %s1288_s13 }
 0x5a2   : > { %v549_v32 = vpop.permute.xlu1 %548 }
 0x5a3   : > { %555 = vst.msk [vmem:[%s1450_s28] sm:$0xf] %vm554_vm4, %v549_v32 }
 0x5a4   : > { %v551_v33 = vpop.permute.xlu0 %550 }
 0x5a5   : > { %556 = vst.msk [vmem:[%s1450_s28 + $0x4] sm:$0xf] %vm554_vm4, %v551_v33 }
 0x5aa   : > { %v708_v34 = vpop.permute.xlu1 %707 }
 0x5ab   : > { %714 = vst.msk [vmem:[%s1450_s28] sm:$0xf] %vm713_vm5, %v708_v34 }
 0x5ac   : > { %v710_v37 = vpop.permute.xlu0 %709 }
 0x5ad   : > { %715 = vst.msk [vmem:[%s1450_s28 + $0x4] sm:$0xf] %vm713_vm5, %v710_v37 }
 0x5db   : > { %v867_v38 = vpop.permute.xlu1 %866 }
 0x5dc   : > { %873 = vst.msk [vmem:[%s1450_s28] sm:$0xf] %vm872_vm6, %v867_v38 }
 0x5dd   : > { %v869_v39 = vpop.permute.xlu0 %868 }
 0x5de   : > { %874 = vst.msk [vmem:[%s1450_s28 + $0x4] sm:$0xf] %vm872_vm6, %v869_v39 }
 0x5df PF: > { %p1138_p5 = scmp.ge.s32.totalorder %s1284_s18, 2  ;;  %s926_s25 = sand.u32 1, %s1272_s15  }
 0x5e0   : > { %s927_s13 = scalar_lea.sflag [#allocation3], %s926_s25 }
 0x5e1   : > { %p1135_p1 = pnand %p1138_p5, %p1361_p6 }
 0x5e3   : > { %1267 = dma.done.wait (!%p1135_p1), %s927_s13, 256  }
 0x5e4   : > { %1269 = vsyncadd (!%p1135_p1), %s927_s13, 4294967040  ;;  %p15_p2 = scmp.ge.s32.totalorder %s1344_s21, 4   ;;  %s1569_s15 = smov %s1276_s16 }
 0x5e5   : > { %s1570_s16 = smov %s1280_s17  ;;  %s1571_s17 = smov %s1355_s24 }
 0x5e6   : > { %s1572_s18 = smov %s1344_s21  ;;  %17 = sbr.rel (!%p15_p2) target bundleno = 3 (0x3), region = 85 }
 0x5ed   :  { %932 = vsyncpa [#allocation3], 1 }
 0x5ee   :  { %934 = vsyncpa [#allocation3 + $0x1], 1 }

// kernel: decoder_layer_forward.17
= control target key start
LH: loop header
LB: loop body
LE: loop exit
PB: predicated region body
PF: predicated region fallthrough
CT: control target
= control target key end

     0   :  { %s578_s1 = inlined_call_operand.vmem [shape: bf16[256,128], index: 1, kind: input, shape index: {}]   ;;  %s579_s0 = inlined_call_operand.vmem [shape: bf16[32,256], index: 0, kind: input, shape index: {}]   ;;  %s580_s3 = inlined_call_operand.vmem [shape: bf16[32,128], index: 3, kind: input, shape index: {}]   ;;  %s581_s2 = inlined_call_operand.vmem [shape: f32[1,128], index: 2, kind: input, shape index: {}]   ;;  %s582_s4 = inlined_call_operand.vmem [shape: f32[1,128], index: 4, kind: input, shape index: {}]   ;;  %s583_s5 = inlined_call_operand.vmem [shape: f32[1,128], index: 5, kind: input, shape index: {}]   ;;  %s584_s6 = inlined_call_operand.vmem [shape: f32[32,128], index: 6, kind: output, shape index: {}]  }
   0x1   :  { %v426_v0 = vld [vmem:[%s578_s1 + $0x40] sm:$0xff]   ;;  %v428_v2 = vld [vmem:[%s578_s1 + $0x48] sm:$0xff]   ;;  %v430_v4 = vld [vmem:[%s578_s1 + $0x50] sm:$0xff]  }
   0x2   :  { %v427_v1 = vld [vmem:[%s578_s1] sm:$0xff]   ;;  %382 = vmatprep.subr.bf16.mxu0 %v426_v0  ;;  %410 = vmatprep.subr.bf16.mxu1 %v426_v0  ;;  %v429_v3 = vld [vmem:[%s578_s1 + $0x8] sm:$0xff]   ;;  %v431_v5 = vld [vmem:[%s578_s1 + $0x10] sm:$0xff]  }
   0x3   :  { %383 = vmatpush3.bf16.msra.mxu0 %v427_v1  ;;  %418 = vmatpush3.bf16.msra.mxu1 %v427_v1  ;;  %v432_v6 = vld [vmem:[%s578_s1 + $0x58] sm:$0xff]   ;;  %v434_v8 = vld [vmem:[%s578_s1 + $0x60] sm:$0xff]   ;;  %v436_v10 = vld [vmem:[%s578_s1 + $0x68] sm:$0xff]  }
   0x4   :  { %384 = vmatprep.subr.bf16.mxu0 %v428_v2  ;;  %411 = vmatprep.subr.bf16.mxu1 %v428_v2  ;;  %v433_v7 = vld [vmem:[%s578_s1 + $0x18] sm:$0xff]   ;;  %v435_v9 = vld [vmem:[%s578_s1 + $0x20] sm:$0xff]   ;;  %v437_v13 = vld [vmem:[%s578_s1 + $0x28] sm:$0xff]  }
   0x5   :  { %v444_v11 = vld [vmem:[%s579_s0 + $0x4] ss:$8 sps:$4 sm:$0xff]   ;;  %v447_v12 = vld [vmem:[%s579_s0 + $0x14] ss:$8 sps:$4 sm:$0xff]   ;;  %v442_v18 = vld [vmem:[%s579_s0] ss:$8 sps:$4 sm:$0xff]  }
   0x6   :  { %v438_v14 = vld [vmem:[%s578_s1 + $0x70] sm:$0xff]   ;;  %220 = vmatprep.mubr.bf16.mxu0 %v444_v11  ;;  %228 = vmatprep.mubr.bf16.mxu1 %v447_v12  ;;  %v440_v16 = vld [vmem:[%s578_s1 + $0x78] sm:$0xff]   ;;  %v381_v20 = vld [vmem:[%s580_s3 + $0x8] sm:$0xff]  }
   0x7   :  { %385 = vmatpush3.bf16.msra.mxu0 %v429_v3  ;;  %419 = vmatpush3.bf16.msra.mxu1 %v429_v3  ;;  %v439_v15 = vld [vmem:[%s578_s1 + $0x30] sm:$0xff]   ;;  %v441_v17 = vld [vmem:[%s578_s1 + $0x38] sm:$0xff]   ;;  %v374_v21 = vld [vmem:[%s580_s3] sm:$0xff]   ;;  %v379_v31 = vunpack.c.l.bf16 %v381_v20  ;;  %v380_v35 = vunpack.c.h.bf16 %v381_v20 }
   0x8   :  { %386 = vmatprep.subr.bf16.mxu0 %v430_v4  ;;  %412 = vmatprep.subr.bf16.mxu1 %v430_v4  ;;  %v445_v19 = vld [vmem:[%s579_s0 + $0x10] ss:$8 sps:$4 sm:$0xff]   ;;  %v370_v25 = vld [vmem:[%s581_s2] ss:$0 sm:$0xff]  ;;  %v375_v32 = vunpack.c.l.bf16 %v374_v21  ;;  %v376_v40 = vunpack.c.h.bf16 %v374_v21 }
   0x9   :  { %v371_v12 = vld [vmem:[%s582_s4] ss:$0 sm:$0xff] }
   0xb   :  { %387 = vmatpush3.bf16.msra.mxu0 %v431_v5  ;;  %420 = vmatpush3.bf16.msra.mxu1 %v431_v5 }
   0xc   :  { %388 = vmatprep.subr.bf16.mxu0 %v432_v6  ;;  %413 = vmatprep.subr.bf16.mxu1 %v432_v6 }
   0xf   :  { %389 = vmatpush3.bf16.msra.mxu0 %v433_v7  ;;  %421 = vmatpush3.bf16.msra.mxu1 %v433_v7 }
  0x10   :  { %390 = vmatprep.subr.bf16.mxu0 %v434_v8  ;;  %414 = vmatprep.subr.bf16.mxu1 %v434_v8 }
  0x13   :  { %391 = vmatpush3.bf16.msra.mxu0 %v435_v9  ;;  %422 = vmatpush3.bf16.msra.mxu1 %v435_v9 }
  0x14   :  { %392 = vmatprep.subr.bf16.mxu0 %v436_v10  ;;  %415 = vmatprep.subr.bf16.mxu1 %v436_v10 }
  0x17   :  { %393 = vmatpush3.bf16.msra.mxu0 %v437_v13  ;;  %423 = vmatpush3.bf16.msra.mxu1 %v437_v13 }
  0x18   :  { %394 = vmatprep.subr.bf16.mxu0 %v438_v14  ;;  %416 = vmatprep.subr.bf16.mxu1 %v438_v14  ;;  %v372_v14 = vld [vmem:[%s583_s5] ss:$0 sm:$0xff] }
  0x1b   :  { %395 = vmatpush3.bf16.msra.mxu0 %v439_v15  ;;  %424 = vmatpush3.bf16.msra.mxu1 %v439_v15 }
  0x1c   :  { %396 = vmatprep.subr.bf16.mxu0 %v440_v16  ;;  %417 = vmatprep.subr.bf16.mxu1 %v440_v16 }
  0x1f   :  { %397 = vmatpush3.bf16.msra.mxu0 %v441_v17  ;;  %425 = vmatpush3.bf16.msra.mxu1 %v441_v17 }
  0x22   :  { %221 = vmatmul.mubr.bf16.vlgmr.msra.gmra.mrb[0].mxu0 %v442_v18  ;;  %229 = vmatmul.mubr.bf16.vlgmr.msra.gmra.mrb[0].mxu1 %v445_v19 }
  0xf5   :  { %v398_v22 = vpop.f32.mrb[0].mxu0  ;;  %v404_v23 = vpop.f32.mrb[0].mxu1 }
  0xf6   :  { %v399_v24 = vpop.f32.mrb[1].mxu0  ;;  %v405_v26 = vpop.f32.mrb[1].mxu1 }
  0xf7   :  { %v400_v27 = vadd.f32 %v399_v24, %v398_v22  ;;  %v406_v28 = vadd.f32 %v405_v26, %v404_v23  ;;  %v401_v29 = vpop.f32.mrb[2].mxu0  ;;  %v407_v30 = vpop.f32.mrb[2].mxu1 }
  0xf8   :  { %v402_v33 = vpop.f32.mrb[3].mxu0  ;;  %v408_v34 = vpop.f32.mrb[3].mxu1 }
  0xf9   :  { %v259_v36 = vadd.f32 %v400_v27, %v370_v25  ;;  %v261_v37 = vadd.f32 %v406_v28, %v370_v25  ;;  %v403_v38 = vadd.f32 %v402_v33, %v401_v29  ;;  %v409_v39 = vadd.f32 %v408_v34, %v407_v30 }
  0xfb   :  { %v260_v41 = vadd.f32 %v403_v38, %v370_v25  ;;  %v262_v42 = vadd.f32 %v409_v39, %v370_v25  ;;  %v273_v43 = vadd.f32 %v379_v31, %v261_v37  ;;  %v271_v44 = vadd.f32 %v375_v32, %v259_v36 }
  0xfd   :  { %279 = vadd.xlane.f32.xlu1 %v273_v43  ;;  %275 = vadd.xlane.f32.xlu0 %v271_v44  ;;  %v274_v45 = vadd.f32 %v380_v35, %v262_v42  ;;  %v272_v46 = vadd.f32 %v376_v40, %v260_v41 }
 0x101   :  { %281 = vadd.xlane.f32.xlu1 %v274_v45  ;;  %277 = vadd.xlane.f32.xlu0 %v272_v46 }
 0x18a   :  { %v280_v47 = vpop.xlane.xlu1 %279  ;;  %v276_v48 = vpop.xlane.xlu0 %275 }
 0x18b   :  { %v286_v49 = vmul.f32 0.0078125, %v280_v47  ;;  %v284_v50 = vmul.f32 0.0078125, %v276_v48 }
 0x18d   :  { %v288_v51 = vsub.f32 %v271_v44, %v284_v50  ;;  %v290_v54 = vsub.f32 %v273_v43, %v286_v49 }
 0x18e   :  { %v282_v52 = vpop.xlane.xlu1 %281  ;;  %v278_v53 = vpop.xlane.xlu0 %277 }
 0x18f   :  { %v287_v55 = vmul.f32 0.0078125, %v282_v52  ;;  %v285_v56 = vmul.f32 0.0078125, %v278_v53  ;;  %v292_v57 = vmul.f32 %v288_v51, %v288_v51  ;;  %v294_v60 = vmul.f32 %v290_v54, %v290_v54 }
 0x191   :  { %v289_v58 = vsub.f32 %v272_v46, %v285_v56  ;;  %296 = vadd.xlane.f32.xlu0 %v292_v57  ;;  %v291_v59 = vsub.f32 %v274_v45, %v287_v55 }
 0x193   :  { %v293_v61 = vmul.f32 %v289_v58, %v289_v58  ;;  %v295_v62 = vmul.f32 %v291_v59, %v291_v59 }
 0x195   :  { %300 = vadd.xlane.f32.xlu0 %v294_v60  ;;  %298 = vadd.xlane.f32.xlu1 %v293_v61 }
 0x199   :  { %302 = vadd.xlane.f32.xlu1 %v295_v62 }
 0x21e   :  { %v297_v63 = vpop.xlane.xlu0 %296 }
 0x21f   :  { %v304_v0 = vmul.f32 0.0078125, %v297_v63 }
 0x221   :  { %v308_v1 = vadd.f32 1e-05, %v304_v0 }
 0x222   :  { %v299_v2 = vpop.xlane.xlu1 %298  ;;  %v301_v3 = vpop.xlane.xlu0 %300 }
 0x223   :  { %448 = vrsqrt.f32 %v308_v1  ;;  %v305_v4 = vmul.f32 0.0078125, %v299_v2  ;;  %v306_v5 = vmul.f32 0.0078125, %v301_v3 }
 0x225   :  { %v309_v6 = vadd.f32 1e-05, %v305_v4  ;;  %v310_v7 = vadd.f32 1e-05, %v306_v5 }
 0x226   :  { %v303_v8 = vpop.xlane.xlu1 %302 }
 0x227   :  { %450 = vrsqrt.f32 %v309_v6  ;;  %v307_v9 = vmul.f32 0.0078125, %v303_v8 }
 0x228   :  { %452 = vrsqrt.f32 %v310_v7 }
 0x229   :  { %v311_v10 = vadd.f32 1e-05, %v307_v9 }
 0x22b   :  { %454 = vrsqrt.f32 %v311_v10 }
 0x22d   :  { %v449_v11 = vpop.eup %448 }
 0x22e   :  { %v316_v13 = vmul.f32 %v449_v11, %v288_v51 }
 0x230   :  { %v327_v15 = vmul.f32 %v371_v12, %v316_v13 }
 0x231   :  { %v451_v16 = vpop.eup %450 }
 0x232   :  { %v453_v17 = vpop.eup %452  ;;  %v338_v18 = vadd.f32 %v372_v14, %v327_v15  ;;  %v317_v19 = vmul.f32 %v451_v16, %v289_v58 }
 0x233   :  { %v318_v20 = vmul.f32 %v453_v17, %v290_v54 }
 0x234   :  { %342 = vst [vmem:[%s584_s6] sm:$0xff] %v338_v18  ;;  %v328_v21 = vmul.f32 %v371_v12, %v317_v19 }
 0x235   :  { %v455_v22 = vpop.eup %454  ;;  %v329_v23 = vmul.f32 %v371_v12, %v318_v20 }
 0x236   :  { %v339_v24 = vadd.f32 %v372_v14, %v328_v21  ;;  %v319_v25 = vmul.f32 %v455_v22, %v291_v59 }
 0x237   :  { %v340_v26 = vadd.f32 %v372_v14, %v329_v23 }
 0x238   :  { %343 = vst [vmem:[%s584_s6 + $0x8] sm:$0xff] %v339_v24  ;;  %v330_v27 = vmul.f32 %v371_v12, %v319_v25 }
 0x239   :  { %344 = vst [vmem:[%s584_s6 + $0x10] sm:$0xff] %v340_v26 }
 0x23a   :  { %v341_v28 = vadd.f32 %v372_v14, %v330_v27 }
 0x23c   :  { %345 = vst [vmem:[%s584_s6 + $0x18] sm:$0xff] %v341_v28 }

</bundles_post_ra>
